<compile_context>
chip_gen: v7x
topology: tpu7x:2x2x1
jax: 0.10.0
libtpu: 0.0.40
codegen_flags: <defaults>
</compile_context>

<pallas_src>
import functools

import jax
import jax.numpy as jnp
from jax.experimental import pallas as pl
from jax.experimental.pallas import tpu as pltpu


# ----------------------------------------------------------------------------
# small helpers
# ----------------------------------------------------------------------------
def _round_up(x, m):
    return ((x + m - 1) // m) * m


def _pad_axis(x, axis, mult):
    pad = (-x.shape[axis]) % mult
    if pad == 0:
        return x
    widths = [(0, 0)] * x.ndim
    widths[axis] = (0, pad)
    return jnp.pad(x, widths)


# ----------------------------------------------------------------------------
# Pallas fused matmul(+activation) kernel -- bf16 MXU operands, f32 accumulate
# ----------------------------------------------------------------------------
def _matmul_act_kernel(a_ref, b_ref, o_ref, acc_ref, *, act):
    @pl.when(pl.program_id(2) == 0)
    def _():
        acc_ref[...] = jnp.zeros_like(acc_ref)

    acc_ref[...] += jnp.dot(a_ref[...], b_ref[...],
                            preferred_element_type=jnp.float32)

    # Store (and run the activation epilogue) only on the last K step.
    @pl.when(pl.program_id(2) == pl.num_programs(2) - 1)
    def _():
        y = acc_ref[...]
        if act == "relu":
            y = jnp.maximum(y, 0.0)
        elif act == "sigmoid":
            # exact form keeps the output strictly inside [0, 1]
            y = 1.0 / (1.0 + jnp.exp(-y))
        o_ref[...] = y.astype(o_ref.dtype)


def matmul_act(a, b, act=None, *, tn=None):
    """act(a @ b) on the MXU.  a:(M,K), b:(K,N) -> (M,N) f32.

    Operands are cast to bf16 (f32 accumulation).  M is padded only to 16
    (bf16 sublane minimum), K and N to lane multiples.  M and K are a single
    tile each (all M, K in this network are tiny); N is tiled by `tn`
    (a multiple of 128) so the grid has multiple "parallel" steps.
    """
    M, K = a.shape
    K2, N = b.shape
    assert K == K2
    a_p = _pad_axis(_pad_axis(a.astype(jnp.bfloat16), 0, 16), 1, 128)
    Mp, Kp = a_p.shape
    if tn is None:
        tn = _round_up(min(N, 1024), 128)
    assert tn % 128 == 0
    b_p = _pad_axis(_pad_axis(b.astype(jnp.bfloat16), 0, 128), 1, tn)
    Np = b_p.shape[1]
    assert b_p.shape[0] == Kp and Np % tn == 0

    tm, tk = Mp, Kp                       # single M / K tile (M<=112, K<=1152)
    grid = (Mp // tm, Np // tn, Kp // tk)

    out = pl.pallas_call(
        functools.partial(_matmul_act_kernel, act=act),
        out_shape=jax.ShapeDtypeStruct((Mp, Np), jnp.float32),
        grid_spec=pltpu.PrefetchScalarGridSpec(
            num_scalar_prefetch=0,
            grid=grid,
            in_specs=[pl.BlockSpec((tm, tk), lambda i, j, k: (i, k)),
                      pl.BlockSpec((tk, tn), lambda i, j, k: (k, j))],
            out_specs=pl.BlockSpec((tm, tn), lambda i, j, k: (i, j)),
            scratch_shapes=[pltpu.VMEM((tm, tn), jnp.float32)]),
        compiler_params=pltpu.CompilerParams(
            dimension_semantics=("parallel", "parallel", "arbitrary")),
    )(a_p, b_p)
    return out[:M, :N]


# ----------------------------------------------------------------------------
# JAX glue: BatchNorm (train-mode batch stats) + ReLU, sub-pixel ConvT pieces
# ----------------------------------------------------------------------------
def bn_relu(x, gamma, beta, eps=1e-5):
    """Per-channel (last axis) train-mode BatchNorm (biased var) + ReLU."""
    red = tuple(range(x.ndim - 1))
    mean = jnp.mean(x, axis=red)
    var = jnp.mean(jnp.square(x - mean), axis=red)
    scale = gamma * jax.lax.rsqrt(var + eps)
    return jnp.maximum(x * scale + (beta - mean * scale), 0.0)


def subpixel_patches(x_nhwc):
    """3x3 patches of the 1-zero-padded input: (N,H,W,C) -> (N*H*W, 9*C).

    Shared patch feeding all 4 output phases of a ConvT(k=4, s=2, p=1)."""
    N, H, W, C = x_nhwc.shape
    xp = jnp.pad(x_nhwc, ((0, 0), (1, 1), (1, 1), (0, 0)))
    cols = [xp[:, dh:dh + H, dw:dw + W, :] for dh in range(3) for dw in range(3)]
    p = jnp.stack(cols, axis=3)                       # (N, H, W, 9, C)
    return p.reshape(N * H * W, 9 * C)


def convt_s2_combined_weight(w):
    """PyTorch ConvTranspose2d(k=4, s=2, p=1) weight (Cin,Cout,4,4) ->
    sub-pixel combined matrix (9*Cin, 4*Cout).

    Output column block (p, q) (output-pixel parity) only contains the 2x2
    kernel taps that actually hit non-zero input positions for that phase."""
    Cin, Cout = w.shape[0], w.shape[1]
    wc = jnp.zeros((3, 3, Cin, 2, 2, Cout), w.dtype)
    for p in (0, 1):
        for q in (0, 1):
            for a in (0, 1):
                for b in (0, 1):
                    tap = w[:, :, 3 - p - 2 * a, 3 - q - 2 * b]   # (Cin, Cout)
                    wc = wc.at[p + a, q + b, :, p, q, :].set(tap)
    return wc.reshape(9 * Cin, 4 * Cout)


def depth_to_space2(o, N, H, W, Cout):
    """(N*H*W, 4*Cout) phase-major output -> (N, 2H, 2W, Cout)."""
    o = o.reshape(N, H, W, 2, 2, Cout)
    o = jnp.transpose(o, (0, 1, 3, 2, 4, 5))
    return o.reshape(N, 2 * H, 2 * W, Cout)


# ----------------------------------------------------------------------------
# Parameters and forward pass
# ----------------------------------------------------------------------------
def init_params(total_vars, key):
    ks = jax.random.split(key, 4)
    p = {}
    # ConvT(Tv->1024, k=1): weight (Tv, 1024, 1, 1) -> (Tv, 1024); layer 1 runs
    # in XLA (65 KFLOP), so keep it f32.
    p["w1"] = 0.05 * jax.random.normal(ks[0], (total_vars, 1024), jnp.float32)
    # ConvT(1024->128, k=7) on a 1x1 input == matmul; columns ordered (kh,kw,co).
    w2 = 0.05 * jax.random.normal(ks[1], (1024, 128, 7, 7), jnp.float32)
    p["w2mat"] = jnp.transpose(w2, (0, 2, 3, 1)).reshape(1024, 7 * 7 * 128) \
                    .astype(jnp.bfloat16)                        # (1024, 6272)
    # ConvT(128->64, k=4, s=2, p=1): sub-pixel combined weight.
    w3 = 0.05 * jax.random.normal(ks[2], (128, 64, 4, 4), jnp.float32)
    p["wc3"] = convt_s2_combined_weight(w3).astype(jnp.bfloat16)  # (1152, 256)
    # ConvT(64->1, k=4, s=2, p=1): combined weight, stored transposed so the
    # final GEMM is (4,576)@(576,392) with a lane-dense output.
    w4 = 0.05 * jax.random.normal(ks[3], (64, 1, 4, 4), jnp.float32)
    p["wc4T"] = convt_s2_combined_weight(w4).T.astype(jnp.bfloat16)  # (4, 576)
    # BatchNorm affine params (PyTorch default init: weight=1, bias=0)
    p["g1"], p["b1"] = jnp.ones((1024,)), jnp.zeros((1024,))
    p["g2"], p["b2"] = jnp.ones((128,)), jnp.zeros((128,))
    p["g3"], p["b3"] = jnp.ones((64,)), jnp.zeros((64,))
    return p


def g_forward(params, x_nchw):
    N, Tv = x_nchw.shape[0], x_nchw.shape[1]
    x = x_nchw.reshape(N, Tv).astype(jnp.float32)              # spatial is 1x1

    # Layer 1: ConvT 1x1 (== 2x32 @ 32x1024 matmul) + BN + ReLU -- XLA glue,
    # a Pallas launch would be pure overhead here (per perf review).
    y1 = bn_relu(jnp.dot(x, params["w1"]), params["g1"], params["b1"])

    # Layer 2: ConvT 7x7 on 1x1 input == (N,1024)@(1024,6272) Pallas matmul.
    z2 = matmul_act(y1, params["w2mat"], tn=896)               # (N, 6272) f32
    y2 = bn_relu(z2.reshape(N, 7, 7, 128), params["g2"], params["b2"])

    # Layer 3: ConvT(128->64, 4, 2, 1) via sub-pixel decomposition:
    # one (N*49, 1152) @ (1152, 256) matmul, then pixel-shuffle to 14x14.
    p3 = subpixel_patches(y2)                                  # (N*49, 1152)
    z3 = matmul_act(p3, params["wc3"], tn=128)                 # (N*49, 256)
    y3 = bn_relu(depth_to_space2(z3, N, 7, 7, 64),
                 params["g3"], params["b3"])                   # (N, 14, 14, 64)

    # Layer 4: ConvT(64->1, 4, 2, 1) + Sigmoid. Computed transposed so the
    # output is lane-dense; sigmoid fused into the matmul epilogue.
    p4t = subpixel_patches(y3).T                               # (576, N*196)
    o4t = matmul_act(params["wc4T"], p4t, act="sigmoid", tn=256)  # (4, N*196)
    o = o4t.reshape(2, 2, N, 14, 14)                           # (p, q, n, i, j)
    img = jnp.transpose(o, (2, 3, 0, 4, 1)).reshape(N, 28, 28)  # (n, 2i+p, 2j+q)
    return img[:, None, :, :]                                  # NCHW (N,1,28,28)


if __name__ == "__main__":
    TOTAL_VARS = 32
    BATCH = 2

    key = jax.random.PRNGKey(0)
    k_param, k_x = jax.random.split(key)
    params = init_params(TOTAL_VARS, k_param)
    x = jax.random.normal(k_x, (BATCH, TOTAL_VARS, 1, 1), jnp.float32)

    out = jax.jit(g_forward)(params, x)
    out = jax.block_until_ready(out)

    assert out.shape == (BATCH, 1, 28, 28), out.shape
    assert bool(jnp.all(jnp.isfinite(out)))
    assert bool(jnp.all((out >= 0.0) & (out <= 1.0)))  # sigmoid output range
    print("KERNEL_OK")
</pallas_src>

<mosaic_0001>
module attributes {stable_mosaic.version = 11 : i64} {
  func.func @_matmul_act_kernel(%arg0: i32, %arg1: i32, %arg2: i32, %arg3: memref<16x1024xbf16, #tpu.memory_space<vmem>>, %arg4: memref<1024x896xbf16, #tpu.memory_space<vmem>>, %arg5: memref<16x896xf32, #tpu.memory_space<vmem>>, %arg6: memref<16x896xf32, #tpu.memory_space<vmem>>) attributes {dimension_semantics = [#tpu.dimension_semantics<parallel>, #tpu.dimension_semantics<parallel>, #tpu.dimension_semantics<arbitrary>], iteration_bounds = array<i64: 1, 7, 1>, scalar_prefetch = 0 : i64, scratch_operands = 1 : i64, tpu.core_type = #tpu.core_type<tc>, window_params = [{transform_indices = @transform_0, window_bounds = array<i64: 16, 1024>}, {transform_indices = @transform_1, window_bounds = array<i64: 1024, 896>}, {transform_indices = @transform_2, window_bounds = array<i64: 16, 896>}]} {
    %c0_i32 = arith.constant 0 : i32
    %0 = arith.cmpi eq, %arg2, %c0_i32 : i32
    %1 = arith.extui %0 : i1 to i32
    %c0_i32_0 = arith.constant 0 : i32
    %2 = arith.cmpi ne, %1, %c0_i32_0 : i32
    scf.if %2 {
      %cst_10 = arith.constant 0.000000e+00 : f32
      %12 = vector.broadcast %cst_10 : f32 to vector<16x896xf32>
      %c0_11 = arith.constant 0 : index
      %c0_12 = arith.constant 0 : index
      %13 = vector.load %arg6[%c0_11, %c0_12] : memref<16x896xf32, #tpu.memory_space<vmem>>, vector<16x896xf32>
      tpu.vector_store %arg6[%c0_11, %c0_12], %12 {strides = array<i32>} : memref<16x896xf32, #tpu.memory_space<vmem>>, vector<16x896xf32>,
    } else {
    }
    %c0 = arith.constant 0 : index
    %c0_1 = arith.constant 0 : index
    %3 = vector.load %arg6[%c0, %c0_1] : memref<16x896xf32, #tpu.memory_space<vmem>>, vector<16x896xf32>
    %c0_2 = arith.constant 0 : index
    %c0_3 = arith.constant 0 : index
    %4 = vector.load %arg3[%c0_2, %c0_3] : memref<16x1024xbf16, #tpu.memory_space<vmem>>, vector<16x1024xbf16>
    %c0_4 = arith.constant 0 : index
    %c0_5 = arith.constant 0 : index
    %5 = vector.load %arg4[%c0_4, %c0_5] : memref<1024x896xbf16, #tpu.memory_space<vmem>>, vector<1024x896xbf16>
    %cst = arith.constant dense<0.000000e+00> : vector<16x896xf32>
    %6 = tpu.matmul %4, %5, %cst {dimension_numbers = #tpu.dot_dimension_numbers<[1], [0], [0], [1], [0, 0, 1, 1], [], []>} : vector<16x1024xbf16>, vector<1024x896xbf16>, vector<16x896xf32> -> vector<16x896xf32>
    %7 = arith.addf %3, %6 : vector<16x896xf32>
    %c0_6 = arith.constant 0 : index
    %c0_7 = arith.constant 0 : index
    %8 = vector.load %arg6[%c0_6, %c0_7] : memref<16x896xf32, #tpu.memory_space<vmem>>, vector<16x896xf32>
    tpu.vector_store %arg6[%c0_6, %c0_7], %7 {strides = array<i32>} : memref<16x896xf32, #tpu.memory_space<vmem>>, vector<16x896xf32>,
    %c0_i32_8 = arith.constant 0 : i32
    %9 = arith.cmpi eq, %arg2, %c0_i32_8 : i32
    %10 = arith.extui %9 : i1 to i32
    %c0_i32_9 = arith.constant 0 : i32
    %11 = arith.cmpi ne, %10, %c0_i32_9 : i32
    scf.if %11 {
      %c0_10 = arith.constant 0 : index
      %c0_11 = arith.constant 0 : index
      %12 = vector.load %arg6[%c0_10, %c0_11] : memref<16x896xf32, #tpu.memory_space<vmem>>, vector<16x896xf32>
      %c0_12 = arith.constant 0 : index
      %c0_13 = arith.constant 0 : index
      %13 = vector.load %arg5[%c0_12, %c0_13] : memref<16x896xf32, #tpu.memory_space<vmem>>, vector<16x896xf32>
      tpu.vector_store %arg5[%c0_12, %c0_13], %12 {strides = array<i32>} : memref<16x896xf32, #tpu.memory_space<vmem>>, vector<16x896xf32>,
    } else {
    }
    return
  }
  func.func @transform_0(%arg0: i32, %arg1: i32, %arg2: i32) -> (i32, i32) {
    %c0_i32 = arith.constant 0 : i32
    return %arg0, %arg2 : i32, i32
  }
  func.func @transform_1(%arg0: i32, %arg1: i32, %arg2: i32) -> (i32, i32) {
    %c0_i32 = arith.constant 0 : i32
    return %arg2, %arg1 : i32, i32
  }
  func.func @transform_2(%arg0: i32, %arg1: i32, %arg2: i32) -> (i32, i32) {
    %c0_i32 = arith.constant 0 : i32
    return %arg0, %arg1 : i32, i32
  }
}

module attributes {stable_mosaic.version = 11 : i64} {
  func.func @_matmul_act_kernel(%arg0: i32, %arg1: i32, %arg2: i32, %arg3: memref<112x1152xbf16, #tpu.memory_space<vmem>>, %arg4: memref<1152x128xbf16, #tpu.memory_space<vmem>>, %arg5: memref<112x128xf32, #tpu.memory_space<vmem>>, %arg6: memref<112x128xf32, #tpu.memory_space<vmem>>) attributes {dimension_semantics = [#tpu.dimension_semantics<parallel>, #tpu.dimension_semantics<parallel>, #tpu.dimension_semantics<arbitrary>], iteration_bounds = array<i64: 1, 2, 1>, scalar_prefetch = 0 : i64, scratch_operands = 1 : i64, tpu.core_type = #tpu.core_type<tc>, window_params = [{transform_indices = @transform_0, window_bounds = array<i64: 112, 1152>}, {transform_indices = @transform_1, window_bounds = array<i64: 1152, 128>}, {transform_indices = @transform_2, window_bounds = array<i64: 112, 128>}]} {
    %c0_i32 = arith.constant 0 : i32
    %0 = arith.cmpi eq, %arg2, %c0_i32 : i32
    %1 = arith.extui %0 : i1 to i32
    %c0_i32_0 = arith.constant 0 : i32
    %2 = arith.cmpi ne, %1, %c0_i32_0 : i32
    scf.if %2 {
      %cst_10 = arith.constant 0.000000e+00 : f32
      %12 = vector.broadcast %cst_10 : f32 to vector<112x128xf32>
      %c0_11 = arith.constant 0 : index
      %c0_12 = arith.constant 0 : index
      %13 = vector.load %arg6[%c0_11, %c0_12] : memref<112x128xf32, #tpu.memory_space<vmem>>, vector<112x128xf32>
      tpu.vector_store %arg6[%c0_11, %c0_12], %12 {strides = array<i32>} : memref<112x128xf32, #tpu.memory_space<vmem>>, vector<112x128xf32>,
    } else {
    }
    %c0 = arith.constant 0 : index
    %c0_1 = arith.constant 0 : index
    %3 = vector.load %arg6[%c0, %c0_1] : memref<112x128xf32, #tpu.memory_space<vmem>>, vector<112x128xf32>
    %c0_2 = arith.constant 0 : index
    %c0_3 = arith.constant 0 : index
    %4 = vector.load %arg3[%c0_2, %c0_3] : memref<112x1152xbf16, #tpu.memory_space<vmem>>, vector<112x1152xbf16>
    %c0_4 = arith.constant 0 : index
    %c0_5 = arith.constant 0 : index
    %5 = vector.load %arg4[%c0_4, %c0_5] : memref<1152x128xbf16, #tpu.memory_space<vmem>>, vector<1152x128xbf16>
    %cst = arith.constant dense<0.000000e+00> : vector<112x128xf32>
    %6 = tpu.matmul %4, %5, %cst {dimension_numbers = #tpu.dot_dimension_numbers<[1], [0], [0], [1], [0, 0, 1, 1], [], []>} : vector<112x1152xbf16>, vector<1152x128xbf16>, vector<112x128xf32> -> vector<112x128xf32>
    %7 = arith.addf %3, %6 : vector<112x128xf32>
    %c0_6 = arith.constant 0 : index
    %c0_7 = arith.constant 0 : index
    %8 = vector.load %arg6[%c0_6, %c0_7] : memref<112x128xf32, #tpu.memory_space<vmem>>, vector<112x128xf32>
    tpu.vector_store %arg6[%c0_6, %c0_7], %7 {strides = array<i32>} : memref<112x128xf32, #tpu.memory_space<vmem>>, vector<112x128xf32>,
    %c0_i32_8 = arith.constant 0 : i32
    %9 = arith.cmpi eq, %arg2, %c0_i32_8 : i32
    %10 = arith.extui %9 : i1 to i32
    %c0_i32_9 = arith.constant 0 : i32
    %11 = arith.cmpi ne, %10, %c0_i32_9 : i32
    scf.if %11 {
      %c0_10 = arith.constant 0 : index
      %c0_11 = arith.constant 0 : index
      %12 = vector.load %arg6[%c0_10, %c0_11] : memref<112x128xf32, #tpu.memory_space<vmem>>, vector<112x128xf32>
      %c0_12 = arith.constant 0 : index
      %c0_13 = arith.constant 0 : index
      %13 = vector.load %arg5[%c0_12, %c0_13] : memref<112x128xf32, #tpu.memory_space<vmem>>, vector<112x128xf32>
      tpu.vector_store %arg5[%c0_12, %c0_13], %12 {strides = array<i32>} : memref<112x128xf32, #tpu.memory_space<vmem>>, vector<112x128xf32>,
    } else {
    }
    return
  }
  func.func @transform_0(%arg0: i32, %arg1: i32, %arg2: i32) -> (i32, i32) {
    %c0_i32 = arith.constant 0 : i32
    return %arg0, %arg2 : i32, i32
  }
  func.func @transform_1(%arg0: i32, %arg1: i32, %arg2: i32) -> (i32, i32) {
    %c0_i32 = arith.constant 0 : i32
    return %arg2, %arg1 : i32, i32
  }
  func.func @transform_2(%arg0: i32, %arg1: i32, %arg2: i32) -> (i32, i32) {
    %c0_i32 = arith.constant 0 : i32
    return %arg0, %arg1 : i32, i32
  }
}

module attributes {stable_mosaic.version = 11 : i64} {
  func.func @_matmul_act_kernel(%arg0: i32, %arg1: i32, %arg2: i32, %arg3: memref<16x640xbf16, #tpu.memory_space<vmem>>, %arg4: memref<640x256xbf16, #tpu.memory_space<vmem>>, %arg5: memref<16x256xf32, #tpu.memory_space<vmem>>, %arg6: memref<16x256xf32, #tpu.memory_space<vmem>>) attributes {dimension_semantics = [#tpu.dimension_semantics<parallel>, #tpu.dimension_semantics<parallel>, #tpu.dimension_semantics<arbitrary>], iteration_bounds = array<i64: 1, 2, 1>, scalar_prefetch = 0 : i64, scratch_operands = 1 : i64, tpu.core_type = #tpu.core_type<tc>, window_params = [{transform_indices = @transform_0, window_bounds = array<i64: 16, 640>}, {transform_indices = @transform_1, window_bounds = array<i64: 640, 256>}, {transform_indices = @transform_2, window_bounds = array<i64: 16, 256>}]} {
    %c0_i32 = arith.constant 0 : i32
    %0 = arith.cmpi eq, %arg2, %c0_i32 : i32
    %1 = arith.extui %0 : i1 to i32
    %c0_i32_0 = arith.constant 0 : i32
    %2 = arith.cmpi ne, %1, %c0_i32_0 : i32
    scf.if %2 {
      %cst_10 = arith.constant 0.000000e+00 : f32
      %12 = vector.broadcast %cst_10 : f32 to vector<16x256xf32>
      %c0_11 = arith.constant 0 : index
      %c0_12 = arith.constant 0 : index
      %13 = vector.load %arg6[%c0_11, %c0_12] : memref<16x256xf32, #tpu.memory_space<vmem>>, vector<16x256xf32>
      tpu.vector_store %arg6[%c0_11, %c0_12], %12 {strides = array<i32>} : memref<16x256xf32, #tpu.memory_space<vmem>>, vector<16x256xf32>,
    } else {
    }
    %c0 = arith.constant 0 : index
    %c0_1 = arith.constant 0 : index
    %3 = vector.load %arg6[%c0, %c0_1] : memref<16x256xf32, #tpu.memory_space<vmem>>, vector<16x256xf32>
    %c0_2 = arith.constant 0 : index
    %c0_3 = arith.constant 0 : index
    %4 = vector.load %arg3[%c0_2, %c0_3] : memref<16x640xbf16, #tpu.memory_space<vmem>>, vector<16x640xbf16>
    %c0_4 = arith.constant 0 : index
    %c0_5 = arith.constant 0 : index
    %5 = vector.load %arg4[%c0_4, %c0_5] : memref<640x256xbf16, #tpu.memory_space<vmem>>, vector<640x256xbf16>
    %cst = arith.constant dense<0.000000e+00> : vector<16x256xf32>
    %6 = tpu.matmul %4, %5, %cst {dimension_numbers = #tpu.dot_dimension_numbers<[1], [0], [0], [1], [0, 0, 1, 1], [], []>} : vector<16x640xbf16>, vector<640x256xbf16>, vector<16x256xf32> -> vector<16x256xf32>
    %7 = arith.addf %3, %6 : vector<16x256xf32>
    %c0_6 = arith.constant 0 : index
    %c0_7 = arith.constant 0 : index
    %8 = vector.load %arg6[%c0_6, %c0_7] : memref<16x256xf32, #tpu.memory_space<vmem>>, vector<16x256xf32>
    tpu.vector_store %arg6[%c0_6, %c0_7], %7 {strides = array<i32>} : memref<16x256xf32, #tpu.memory_space<vmem>>, vector<16x256xf32>,
    %c0_i32_8 = arith.constant 0 : i32
    %9 = arith.cmpi eq, %arg2, %c0_i32_8 : i32
    %10 = arith.extui %9 : i1 to i32
    %c0_i32_9 = arith.constant 0 : i32
    %11 = arith.cmpi ne, %10, %c0_i32_9 : i32
    scf.if %11 {
      %c0_10 = arith.constant 0 : index
      %c0_11 = arith.constant 0 : index
      %12 = vector.load %arg6[%c0_10, %c0_11] : memref<16x256xf32, #tpu.memory_space<vmem>>, vector<16x256xf32>
      %cst_12 = arith.constant 0.000000e+00 : f32
      %13 = vector.broadcast %cst_12 : f32 to vector<16x256xf32>
      %14 = arith.subf %13, %12 : vector<16x256xf32>
      %15 = math.exp %14 : vector<16x256xf32>
      %cst_13 = arith.constant 1.000000e+00 : f32
      %16 = vector.broadcast %cst_13 : f32 to vector<16x256xf32>
      %17 = arith.addf %16, %15 : vector<16x256xf32>
      %cst_14 = arith.constant 1.000000e+00 : f32
      %18 = vector.broadcast %cst_14 : f32 to vector<16x256xf32>
      %19 = arith.divf %18, %17 : vector<16x256xf32>
      %c0_15 = arith.constant 0 : index
      %c0_16 = arith.constant 0 : index
      %20 = vector.load %arg5[%c0_15, %c0_16] : memref<16x256xf32, #tpu.memory_space<vmem>>, vector<16x256xf32>
      tpu.vector_store %arg5[%c0_15, %c0_16], %19 {strides = array<i32>} : memref<16x256xf32, #tpu.memory_space<vmem>>, vector<16x256xf32>,
    } else {
    }
    return
  }
  func.func @transform_0(%arg0: i32, %arg1: i32, %arg2: i32) -> (i32, i32) {
    %c0_i32 = arith.constant 0 : i32
    return %arg0, %arg2 : i32, i32
  }
  func.func @transform_1(%arg0: i32, %arg1: i32, %arg2: i32) -> (i32, i32) {
    %c0_i32 = arith.constant 0 : i32
    return %arg2, %arg1 : i32, i32
  }
  func.func @transform_2(%arg0: i32, %arg1: i32, %arg2: i32) -> (i32, i32) {
    %c0_i32 = arith.constant 0 : i32
    return %arg0, %arg1 : i32, i32
  }
}

</mosaic_0001>

<bundles_post_ra>
// kernel: g_forward.3
= control target key start
LH: loop header
LB: loop body
LE: loop exit
PB: predicated region body
PF: predicated region fallthrough
CT: control target
= control target key end

     0   :  { %7 = vsyncpa [#allocation4], 0  ;;  %s6131_s0 = inlined_call_operand.vmem [shape: bf16[16,1024], index: 0, kind: input, shape index: {}]   ;;  %s6132_s1 = inlined_call_operand.hbm [shape: bf16[1024,6272], index: 1, kind: input, shape index: {}]   ;;  %s6133_s2 = inlined_call_operand.vmem [shape: f32[16,6272], index: 2, kind: output, shape index: {}]  }
   0x1   :  { %9 = vsyncpa [#allocation4 + $0x1], 0  ;;  %s5415_s9 = smov 0   ;;  %s5417_s10 = smov 0  }
   0x2   :  { %s5419_s11 = smov 0   ;;  %s5421_s12 = smov 0  }
   0x3   :  { %s5423_s13 = smov 0   ;;  %s5425_s14 = smov 0  }
   0x4 LB: > { %s4021_s15 = sadd.s32 4294967295, %s5394_s14   ;;  %s30_s16 = sadd.s32 1, %s5390_s13  ;;  %s5394_s14 = sphi %s5425_s14, %s15_s14   ;;  %s5390_s13 = sphi %s5423_s13, %s6144_s13   ;;  %s5386_s12 = sphi %s5421_s12, %s6143_s12   ;;  %s5382_s11 = sphi %s5419_s11, %s6142_s11   ;;  %s5378_s10 = sphi %s5417_s10, %s6141_s10   ;;  %s5374_s9 = sphi %s5415_s9, %s6140_s9  }
   0x5   : > { %p32_p0 = scmp.ge.s32.totalorder %s30_s16, 7  ;;  %s71_s17 = sadd.s32 1, %s5382_s11 }
   0x6   : > { %p78_p1 = scmp.ne.s32.totalorder %s5382_s11, %s5378_s10  ;;  %p79_p2 = scmp.eq.s32.totalorder %s5394_s14, 0 }
   0x7   : > { %s6146_s16 = smov (%p32_p0, %s30_s16), 0  ;;  %p84_p4 = scmp.ne.s32.totalorder %s5378_s10, %s5374_s9 }
   0x8   : > { %p5451_p3 = por %p79_p2, %p78_p1  ;;  %s67_s19 = ssub.s32 %s5390_s13, %s6146_s16 }
   0x9   : > { %p85_p5 = scmp.eq.s32.totalorder %s4021_s15, 0  ;;  %p69_p6 = scmp.eq.s32.totalorder %s67_s19, 0 }
   0xa   : > { %p110_p7 = scmp.eq.s32.totalorder %s4021_s15, 6  ;;  %p4622_p10 = scmp.lt.s32.totalorder %s5394_s14, 7 }
   0xb   : > { %p5458_p8 = por %p85_p5, %p84_p4  ;;  %s151_s23 = sand.u32 1, %s5382_s11  }
   0xc   : > { %s5463_s21 = scalar_select %p69_p6, %s5382_s11, %s71_s17  }
   0xd   : > { %p5465_p9 = por %p110_p7, %p78_p1  ;;  %s4487_s24 = smul.u32 448, %s5390_s13 }
   0xe   : > { %s4613_s25 = smul.u32 3584, %s151_s23  ;;  %p5479_p11 = pnand %p4622_p10, %p5451_p3 }
   0xf   : > { %s6136_s22 = scalar_select %p5465_p9, 1, 0 }
  0x10   : > { %s5475_s28 = scalar_lea.hbm %s6132_s1, %s4487_s24  ;;  %s155_s30 = scalar_lea.vmem [#allocation3], %s4613_s25 }
  0x11   : > { %s165_s3 = sshll.u32 %s155_s30, 4  ;;  %s5486_s4 = scalar_lea.sflag [#allocation4], %s151_s23  ;;  %s5483_s3 = int_to_ptr.vmem [resolvable:$true] %s165_s3 }
  0x12   : > { %s5314_s5 = scalar_lea.hbm %s5475_s28, 57344  ;;  %p5316_p0 = pneg %p5479_p11 }
  0x13   : > { %p5315_p13 = scmp.ne.s32.totalorder %s5475_s28, %s5314_s5  ;;  %s5319_s8 = scalar_lea.hbm %s6132_s1, 401408 }
  0x14   : > { %p5320_p3 = scmp.lt.u32.totalorder %s5475_s28, %s6132_s1  ;;  %p5321_p4 = scmp.lt.u32.totalorder %s5319_s8, %s5314_s5 }
  0x15   : > { %p5317_p1 = pnand %p5316_p0, %p5315_p13  ;;  %p5323_p6 = scmp.lt.u32.totalorder %s5314_s5, %s5475_s28 }
  0x16   : > { %p5322_p5 = por %p5321_p4, %p5320_p3 }
  0x17   : > { %p5318_p2 = pneg %p5317_p1 }
  0x18   : > { %p5324_p7 = por %p5323_p6, %p5322_p5 }
  0x1a   : > { %p5325_p10 = pnand %p5324_p7, %p5318_p2 }
  0x1c   : > { %5328 = shalt.err (!%p5325_p10)
}
  0x1d   : > { %s5329_s17 = scalar_lea.vmem %s5483_s3, 57344  ;;  %s5396_s18 = smov [#allocation3]  }
  0x1e   : > { %p5330_p13 = scmp.ne.s32.totalorder %s5483_s3, %s5329_s17  ;;  %s5334_s19 = sshll.u32 %s5396_s18, 4  ;;  %s5335_s19 = int_to_ptr.vmem [resolvable:$false] %s5334_s19 }
  0x1f   : > { %s5336_s23 = scalar_lea.vmem %s5335_s19, 114688  ;;  %p5337_p9 = scmp.lt.s32.totalorder %s5483_s3, %s5335_s19 }
  0x20   : > { %p5332_p1 = pnand %p5330_p13, %p5316_p0  ;;  %p5338_p3 = scmp.lt.s32.totalorder %s5336_s23, %s5329_s17 }
  0x22   : > { %p5333_p12 = pneg %p5332_p1  ;;  %p5339_p4 = por %p5338_p3, %p5337_p9 }
  0x24   : > { %p5340_p5 = pnand %p5339_p4, %p5333_p12 }
  0x26   : > { %5343 = shalt.err (!%p5340_p5)
}
  0x27   : > { %s5397_s24 = smov 3136   ;;  %s5398_s25 = smov 448  }
  0x28   : > { %s5399_s26 = smov 28   ;;  %p173_p0 = scmp.lt.s32.totalorder %s5394_s14, 8 }
  0x29   : > { %4621 = dma.hbm_to_vmem [thread:$0]  (!%p5479_p11), %s5475_s28, 57344, %s5483_s3, %s5486_s4, %s5397_s24, %s5398_s25, %s5399_s26  }
  0x2a   : > { %p6138_p2 = scmp.ge.s32.totalorder %s5394_s14, 1 }
  0x2c   : > { %p174_p6 = pnand %p6138_p2, %p173_p0 }
  0x2d   : > { %s5518_s27 = sand.u32 (!%p174_p6), 1, %s5378_s10  }
  0x2e   : > { %177 = sbr.rel (%p174_p6) target bundleno = 732 (0x2dc), region = 28  ;;  %s180_s5 = scalar_lea.sflag (!%p174_p6), [#allocation4], %s5518_s27 }
  0x2f   : > { %s4614_s30 = smul.u32 (!%p174_p6), 3584, %s5518_s27 }
  0x31   : > { %s5522_s6 = scalar_lea.vmem (!%p174_p6), [#allocation3], %s4614_s30 }
  0x35   : > { %5369 = dma.done.wait (%p5458_p8), %s180_s5, 57344  }
  0x36   : > { %5371 = vsyncadd (%p5458_p8), %s180_s5, 4294909952  ;;  %v4674_v0 = vld [vmem:[%s5522_s6 + $0x4] ss:$28 sps:$4 sm:$0xff]   ;;  %v4680_v4 = vld [vmem:[%s5522_s6 + $0x3c] ss:$28 sps:$4 sm:$0xff]   ;;  %s4615_s30 = smul.u32 112, %s5518_s27 }
  0x37   : > { %v4676_v1 = vld [vmem:[%s5522_s6 + $0x384] ss:$28 sps:$4 sm:$0xff]   ;;  %3126 = vmatprep.subr.bf16.mxu1 %v4674_v0  ;;  %v4682_v5 = vld [vmem:[%s5522_s6 + $0x3bc] ss:$28 sps:$4 sm:$0xff]   ;;  %v4686_v8 = vld [vmem:[%s5522_s6 + $0x74] ss:$28 sps:$4 sm:$0xff]  }
  0x38   : > { %v4678_v2 = vld [vmem:[%s5522_s6] ss:$28 sps:$4 sm:$0xff]   ;;  %3169 = vmatprep.subr.bf16.mxu0 %v4676_v1  ;;  %v4684_v6 = vld [vmem:[%s5522_s6 + $0x38] ss:$28 sps:$4 sm:$0xff]   ;;  %v4690_v10 = vld [vmem:[%s5522_s6 + $0x70] ss:$28 sps:$4 sm:$0xff]  }
  0x39   : > { %v4679_v3 = vld [vmem:[%s5522_s6 + $0x380] ss:$28 sps:$4 sm:$0xff]   ;;  %3127 = vmatpush1.bf16.msra.mxu1 %v4678_v2  ;;  %v4685_v7 = vld [vmem:[%s5522_s6 + $0x3b8] ss:$28 sps:$4 sm:$0xff]   ;;  %v4691_v11 = vld [vmem:[%s5522_s6 + $0x3f0] ss:$28 sps:$4 sm:$0xff]  }
  0x3a   : > { %3170 = vmatpush1.bf16.msra.mxu0 %v4679_v3  ;;  %3128 = vmatprep.subr.bf16.mxu1 %v4680_v4  ;;  %v4688_v9 = vld [vmem:[%s5522_s6 + $0x3f4] ss:$28 sps:$4 sm:$0xff]   ;;  %v4692_v12 = vld [vmem:[%s5522_s6 + $0xac] ss:$28 sps:$4 sm:$0xff]   ;;  %v4698_v16 = vld [vmem:[%s5522_s6 + $0xe4] ss:$28 sps:$4 sm:$0xff]  }
  0x3b   : > { %3171 = vmatprep.subr.bf16.mxu0 %v4682_v5  ;;  %v4694_v13 = vld [vmem:[%s5522_s6 + $0x42c] ss:$28 sps:$4 sm:$0xff]   ;;  %v4700_v17 = vld [vmem:[%s5522_s6 + $0x464] ss:$28 sps:$4 sm:$0xff]   ;;  %v4704_v20 = vld [vmem:[%s5522_s6 + $0x11c] ss:$28 sps:$4 sm:$0xff]  }
  0x3c   : > { %v4696_v14 = vld [vmem:[%s5522_s6 + $0xa8] ss:$28 sps:$4 sm:$0xff]   ;;  %v4702_v18 = vld [vmem:[%s5522_s6 + $0xe0] ss:$28 sps:$4 sm:$0xff]   ;;  %v4708_v22 = vld [vmem:[%s5522_s6 + $0x118] ss:$28 sps:$4 sm:$0xff]  }
  0x3d   : > { %3129 = vmatpush1.bf16.msra.mxu1 %v4684_v6  ;;  %v4697_v15 = vld [vmem:[%s5522_s6 + $0x428] ss:$28 sps:$4 sm:$0xff]   ;;  %v4703_v19 = vld [vmem:[%s5522_s6 + $0x460] ss:$28 sps:$4 sm:$0xff]   ;;  %v4709_v23 = vld [vmem:[%s5522_s6 + $0x498] ss:$28 sps:$4 sm:$0xff]  }
  0x3e   : > { %3172 = vmatpush1.bf16.msra.mxu0 %v4685_v7  ;;  %3130 = vmatprep.subr.bf16.mxu1 %v4686_v8  ;;  %v4706_v21 = vld [vmem:[%s5522_s6 + $0x49c] ss:$28 sps:$4 sm:$0xff]   ;;  %v4710_v24 = vld [vmem:[%s5522_s6 + $0x154] ss:$28 sps:$4 sm:$0xff]   ;;  %v4716_v28 = vld [vmem:[%s5522_s6 + $0x18c] ss:$28 sps:$4 sm:$0xff]  }
  0x3f   : > { %3173 = vmatprep.subr.bf16.mxu0 %v4688_v9  ;;  %v4712_v25 = vld [vmem:[%s5522_s6 + $0x4d4] ss:$28 sps:$4 sm:$0xff]   ;;  %v4718_v29 = vld [vmem:[%s5522_s6 + $0x50c] ss:$28 sps:$4 sm:$0xff]   ;;  %v4722_v32 = vld [vmem:[%s5522_s6 + $0x1c4] ss:$28 sps:$4 sm:$0xff]  }
  0x40   : > { %v4714_v26 = vld [vmem:[%s5522_s6 + $0x150] ss:$28 sps:$4 sm:$0xff]   ;;  %v4720_v30 = vld [vmem:[%s5522_s6 + $0x188] ss:$28 sps:$4 sm:$0xff]   ;;  %v4726_v34 = vld [vmem:[%s5522_s6 + $0x1c0] ss:$28 sps:$4 sm:$0xff]  }
  0x41   : > { %3131 = vmatpush1.bf16.msra.mxu1 %v4690_v10  ;;  %v4715_v27 = vld [vmem:[%s5522_s6 + $0x4d0] ss:$28 sps:$4 sm:$0xff]   ;;  %v4721_v31 = vld [vmem:[%s5522_s6 + $0x508] ss:$28 sps:$4 sm:$0xff]   ;;  %v4727_v35 = vld [vmem:[%s5522_s6 + $0x540] ss:$28 sps:$4 sm:$0xff]  }
  0x42   : > { %3174 = vmatpush1.bf16.msra.mxu0 %v4691_v11  ;;  %3132 = vmatprep.subr.bf16.mxu1 %v4692_v12  ;;  %v4724_v33 = vld [vmem:[%s5522_s6 + $0x544] ss:$28 sps:$4 sm:$0xff]   ;;  %v4728_v36 = vld [vmem:[%s5522_s6 + $0x1fc] ss:$28 sps:$4 sm:$0xff]   ;;  %v4734_v40 = vld [vmem:[%s5522_s6 + $0x234] ss:$28 sps:$4 sm:$0xff]  }
  0x43   : > { %3175 = vmatprep.subr.bf16.mxu0 %v4694_v13  ;;  %v4730_v37 = vld [vmem:[%s5522_s6 + $0x57c] ss:$28 sps:$4 sm:$0xff]   ;;  %v4736_v41 = vld [vmem:[%s5522_s6 + $0x5b4] ss:$28 sps:$4 sm:$0xff]   ;;  %v4740_v44 = vld [vmem:[%s5522_s6 + $0x26c] ss:$28 sps:$4 sm:$0xff]  }
  0x44   : > { %v4732_v38 = vld [vmem:[%s5522_s6 + $0x1f8] ss:$28 sps:$4 sm:$0xff]   ;;  %v4738_v42 = vld [vmem:[%s5522_s6 + $0x230] ss:$28 sps:$4 sm:$0xff]   ;;  %v4744_v46 = vld [vmem:[%s5522_s6 + $0x268] ss:$28 sps:$4 sm:$0xff]  }
  0x45   : > { %3133 = vmatpush1.bf16.msra.mxu1 %v4696_v14  ;;  %v4733_v39 = vld [vmem:[%s5522_s6 + $0x578] ss:$28 sps:$4 sm:$0xff]   ;;  %v4739_v43 = vld [vmem:[%s5522_s6 + $0x5b0] ss:$28 sps:$4 sm:$0xff]   ;;  %v4745_v47 = vld [vmem:[%s5522_s6 + $0x5e8] ss:$28 sps:$4 sm:$0xff]  }
  0x46   : > { %3176 = vmatpush1.bf16.msra.mxu0 %v4697_v15  ;;  %3134 = vmatprep.subr.bf16.mxu1 %v4698_v16  ;;  %v4742_v45 = vld [vmem:[%s5522_s6 + $0x5ec] ss:$28 sps:$4 sm:$0xff]   ;;  %v262_v48 = vld [vmem:[%s6131_s0] sm:$0xff]  ;;  %v4752_v58 = vld [vmem:[%s5522_s6 + $0x2dc] ss:$28 sps:$4 sm:$0xff]   ;;  %s6035_s27 = scalar_lea.vmem [#allocation5], %s4615_s30 }
  0x47   : > { %3177 = vmatprep.subr.bf16.mxu0 %v4700_v17  ;;  %v266_v49 = vld [vmem:[%s6131_s0 + $0x20] sm:$0xff]  ;;  %v263_v50 = vld [vmem:[%s6131_s0 + $0x8] sm:$0xff]  ;;  %v4754_v59 = vld [vmem:[%s5522_s6 + $0x65c] ss:$28 sps:$4 sm:$0xff]   ;;  %p6139_p8 = scmp.ne.s32.totalorder %s6136_s22, 0 }
  0x48   : > { %v267_v51 = vld [vmem:[%s6131_s0 + $0x28] sm:$0xff]  ;;  %v4746_v52 = vld [vmem:[%s5522_s6 + $0x2a4] ss:$28 sps:$4 sm:$0xff]   ;;  %v5589_v53 = vcombine.high %v262_v48, %v266_v49  ;;  %v4756_v60 = vld [vmem:[%s5522_s6 + $0x2d8] ss:$28 sps:$4 sm:$0xff]   ;;  %v5612_v8 = vcombine.low %v262_v48, %v266_v49  ;;  %s4488_s5 = smul.u32 (%p6139_p8), 56, %s5386_s12 }
  0x49   : > { %3135 = vmatpush1.bf16.msra.mxu1 %v4702_v18  ;;  %v5591_v54 = vcombine.high %v263_v50, %v267_v51  ;;  %v4748_v55 = vld [vmem:[%s5522_s6 + $0x624] ss:$28 sps:$4 sm:$0xff]   ;;  %v4757_v61 = vld [vmem:[%s5522_s6 + $0x658] ss:$28 sps:$4 sm:$0xff]   ;;  %v4762_v0 = vld [vmem:[%s5522_s6 + $0x310] ss:$28 sps:$4 sm:$0xff]   ;;  %v5616_v11 = vcombine.low %v263_v50, %v267_v51 }
  0x4a   : > { %3178 = vmatpush1.bf16.msra.mxu0 %v4703_v19  ;;  %3136 = vmatprep.subr.bf16.mxu1 %v4704_v20  ;;  %v4750_v56 = vld [vmem:[%s5522_s6 + $0x2a0] ss:$28 sps:$4 sm:$0xff]   ;;  %v4758_v62 = vld [vmem:[%s5522_s6 + $0x314] ss:$28 sps:$4 sm:$0xff]   ;;  %v4764_v2 = vld [vmem:[%s5522_s6 + $0x34c] ss:$28 sps:$4 sm:$0xff]   ;;  %s3877_s20 = scalar_lea.vmem (%p6139_p8), %s6133_s2, %s4488_s5 }
  0x4b   : > { %3179 = vmatprep.subr.bf16.mxu0 %v4706_v21  ;;  %3158 = vmatprep.mubr.bf16.mxu1 %v5589_v53  ;;  %v4751_v57 = vld [vmem:[%s5522_s6 + $0x620] ss:$28 sps:$4 sm:$0xff]   ;;  %v4760_v63 = vld [vmem:[%s5522_s6 + $0x694] ss:$28 sps:$4 sm:$0xff]   ;;  %v4766_v3 = vld [vmem:[%s5522_s6 + $0x6cc] ss:$28 sps:$4 sm:$0xff]  }
  0x4c   : > { %3201 = vmatprep.mubr.bf16.mxu0 %v5591_v54  ;;  %v4763_v1 = vld [vmem:[%s5522_s6 + $0x690] ss:$28 sps:$4 sm:$0xff]   ;;  %v4768_v4 = vld [vmem:[%s5522_s6 + $0x348] ss:$28 sps:$4 sm:$0xff]   ;;  %v4770_v9 = vld [vmem:[%s5522_s6 + $0x700] ss:$28 sps:$4 sm:$0xff]  }
  0x4d   : > { %3137 = vmatpush1.bf16.msra.mxu1 %v4708_v22  ;;  %v4769_v5 = vld [vmem:[%s5522_s6 + $0x6c8] ss:$28 sps:$4 sm:$0xff]   ;;  %v4778_v12 = vld [vmem:[%s5522_s6 + $0x73c] ss:$28 sps:$4 sm:$0xff]   ;;  %v4784_v16 = vld [vmem:[%s5522_s6 + $0x774] ss:$28 sps:$4 sm:$0xff]  }
  0x4e   : > { %3180 = vmatpush1.bf16.msra.mxu0 %v4709_v23  ;;  %3138 = vmatprep.subr.bf16.mxu1 %v4710_v24  ;;  %v4772_v6 = vld [vmem:[%s5522_s6 + $0x704] ss:$28 sps:$4 sm:$0xff]   ;;  %v4775_v7 = vld [vmem:[%s5522_s6 + $0xc] ss:$28 sps:$4 sm:$0xff]   ;;  %v4776_v14 = vld [vmem:[%s5522_s6 + $0x738] ss:$28 sps:$4 sm:$0xff]  }
  0x4f   : > { %3181 = vmatprep.subr.bf16.mxu0 %v4712_v25  ;;  %v4773_v10 = vld [vmem:[%s5522_s6 + $0x8] ss:$28 sps:$4 sm:$0xff]   ;;  %v4779_v15 = vld [vmem:[%s5522_s6 + $0x40] ss:$28 sps:$4 sm:$0xff]   ;;  %v4782_v18 = vld [vmem:[%s5522_s6 + $0x770] ss:$28 sps:$4 sm:$0xff]  }
  0x50   : > { %v4781_v13 = vld [vmem:[%s5522_s6 + $0x44] ss:$28 sps:$4 sm:$0xff]   ;;  %v4787_v17 = vld [vmem:[%s5522_s6 + $0x7c] ss:$28 sps:$4 sm:$0xff]   ;;  %v4790_v20 = vld [vmem:[%s5522_s6 + $0x7ac] ss:$28 sps:$4 sm:$0xff]  }
  0x51   : > { %3139 = vmatpush1.bf16.msra.mxu1 %v4714_v26  ;;  %v4785_v19 = vld [vmem:[%s5522_s6 + $0x78] ss:$28 sps:$4 sm:$0xff]   ;;  %v4788_v22 = vld [vmem:[%s5522_s6 + $0x7a8] ss:$28 sps:$4 sm:$0xff]   ;;  %v4791_v23 = vld [vmem:[%s5522_s6 + $0xb0] ss:$28 sps:$4 sm:$0xff]  }
  0x52   : > { %3182 = vmatpush1.bf16.msra.mxu0 %v4715_v27  ;;  %3140 = vmatprep.subr.bf16.mxu1 %v4716_v28  ;;  %v4793_v21 = vld [vmem:[%s5522_s6 + $0xb4] ss:$28 sps:$4 sm:$0xff]   ;;  %v4796_v24 = vld [vmem:[%s5522_s6 + $0x7e4] ss:$28 sps:$4 sm:$0xff]   ;;  %v4799_v25 = vld [vmem:[%s5522_s6 + $0xec] ss:$28 sps:$4 sm:$0xff]  }
  0x53   : > { %3183 = vmatprep.subr.bf16.mxu0 %v4718_v29  ;;  %v4794_v26 = vld [vmem:[%s5522_s6 + $0x7e0] ss:$28 sps:$4 sm:$0xff]   ;;  %v4797_v27 = vld [vmem:[%s5522_s6 + $0xe8] ss:$28 sps:$4 sm:$0xff]   ;;  %v4824_v49 = vld [vmem:[%s5522_s6 + $0x8f8] ss:$28 sps:$4 sm:$0xff]  }
  0x54   : > { %v4802_v28 = vld [vmem:[%s5522_s6 + $0x81c] ss:$28 sps:$4 sm:$0xff]   ;;  %v4805_v29 = vld [vmem:[%s5522_s6 + $0x124] ss:$28 sps:$4 sm:$0xff]   ;;  %v4832_v51 = vld [vmem:[%s5522_s6 + $0x934] ss:$28 sps:$4 sm:$0xff]  }
  0x55   : > { %3141 = vmatpush1.bf16.msra.mxu1 %v4720_v30  ;;  %v4800_v30 = vld [vmem:[%s5522_s6 + $0x818] ss:$28 sps:$4 sm:$0xff]   ;;  %v4829_v48 = vld [vmem:[%s5522_s6 + $0x204] ss:$28 sps:$4 sm:$0xff]  }
  0x56   : > { %3184 = vmatpush1.bf16.msra.mxu0 %v4721_v31  ;;  %3142 = vmatprep.subr.bf16.mxu1 %v4722_v32  ;;  %v4803_v31 = vld [vmem:[%s5522_s6 + $0x120] ss:$28 sps:$4 sm:$0xff]   ;;  %v4808_v32 = vld [vmem:[%s5522_s6 + $0x854] ss:$28 sps:$4 sm:$0xff]  }
  0x57   : > { %3185 = vmatprep.subr.bf16.mxu0 %v4724_v33  ;;  %v4811_v33 = vld [vmem:[%s5522_s6 + $0x15c] ss:$28 sps:$4 sm:$0xff]  }
  0x58   : > { %v4827_v50 = vld [vmem:[%s5522_s6 + $0x200] ss:$28 sps:$4 sm:$0xff]  }
  0x59   : > { %3143 = vmatpush1.bf16.msra.mxu1 %v4726_v34  ;;  %v5646_v34 = vld [vmem:[%s6131_s0 + $0x10] sm:$0xff] }
  0x5a   : > { %3186 = vmatpush1.bf16.msra.mxu0 %v4727_v35  ;;  %3144 = vmatprep.subr.bf16.mxu1 %v4728_v36  ;;  %v5651_v35 = vld [vmem:[%s6131_s0 + $0x30] sm:$0xff] }
  0x5b   : > { %3187 = vmatprep.subr.bf16.mxu0 %v4730_v37  ;;  %v4806_v36 = vld [vmem:[%s5522_s6 + $0x850] ss:$28 sps:$4 sm:$0xff]   ;;  %v4809_v37 = vld [vmem:[%s5522_s6 + $0x158] ss:$28 sps:$4 sm:$0xff]  }
  0x5d   : > { %3145 = vmatpush1.bf16.msra.mxu1 %v4732_v38  ;;  %v5657_v38 = vcombine.high %v5646_v34, %v5651_v35 }
  0x5e   : > { %3188 = vmatpush1.bf16.msra.mxu0 %v4733_v39  ;;  %3146 = vmatprep.subr.bf16.mxu1 %v4734_v40  ;;  %v4814_v39 = vld [vmem:[%s5522_s6 + $0x88c] ss:$28 sps:$4 sm:$0xff]   ;;  %v4817_v40 = vld [vmem:[%s5522_s6 + $0x194] ss:$28 sps:$4 sm:$0xff]  }
  0x5f   : > { %3189 = vmatprep.subr.bf16.mxu0 %v4736_v41  ;;  %v4812_v41 = vld [vmem:[%s5522_s6 + $0x888] ss:$28 sps:$4 sm:$0xff]  }
  0x61   : > { %3147 = vmatpush1.bf16.msra.mxu1 %v4738_v42  ;;  %v4815_v42 = vld [vmem:[%s5522_s6 + $0x190] ss:$28 sps:$4 sm:$0xff]  }
  0x62   : > { %3190 = vmatpush1.bf16.msra.mxu0 %v4739_v43  ;;  %3148 = vmatprep.subr.bf16.mxu1 %v4740_v44  ;;  %v4820_v43 = vld [vmem:[%s5522_s6 + $0x8c4] ss:$28 sps:$4 sm:$0xff]   ;;  %v4823_v44 = vld [vmem:[%s5522_s6 + $0x1cc] ss:$28 sps:$4 sm:$0xff]  }
  0x63   : > { %3191 = vmatprep.subr.bf16.mxu0 %v4742_v45  ;;  %v4818_v45 = vld [vmem:[%s5522_s6 + $0x8c0] ss:$28 sps:$4 sm:$0xff]  }
  0x65   : > { %3149 = vmatpush1.bf16.msra.mxu1 %v4744_v46  ;;  %v4821_v46 = vld [vmem:[%s5522_s6 + $0x1c8] ss:$28 sps:$4 sm:$0xff]  }
  0x66   : > { %3192 = vmatpush1.bf16.msra.mxu0 %v4745_v47  ;;  %3150 = vmatprep.subr.bf16.mxu1 %v4746_v52  ;;  %v4826_v47 = vld [vmem:[%s5522_s6 + $0x8fc] ss:$28 sps:$4 sm:$0xff]  }
  0x67   : > { %3193 = vmatprep.subr.bf16.mxu0 %v4748_v55  ;;  %v4835_v52 = vld [vmem:[%s5522_s6 + $0x23c] ss:$28 sps:$4 sm:$0xff]   ;;  %v4830_v55 = vld [vmem:[%s5522_s6 + $0x930] ss:$28 sps:$4 sm:$0xff]  }
  0x69   : > { %3151 = vmatpush1.bf16.msra.mxu1 %v4750_v56  ;;  %v4833_v56 = vld [vmem:[%s5522_s6 + $0x238] ss:$28 sps:$4 sm:$0xff]  }
  0x6a   : > { %3194 = vmatpush1.bf16.msra.mxu0 %v4751_v57  ;;  %3152 = vmatprep.subr.bf16.mxu1 %v4752_v58  ;;  %v4838_v57 = vld [vmem:[%s5522_s6 + $0x96c] ss:$28 sps:$4 sm:$0xff]   ;;  %v4841_v58 = vld [vmem:[%s5522_s6 + $0x274] ss:$28 sps:$4 sm:$0xff]  }
  0x6b   : > { %3195 = vmatprep.subr.bf16.mxu0 %v4754_v59  ;;  %v4836_v59 = vld [vmem:[%s5522_s6 + $0x968] ss:$28 sps:$4 sm:$0xff]  }
  0x6d   : > { %3153 = vmatpush1.bf16.msra.mxu1 %v4756_v60  ;;  %v4839_v60 = vld [vmem:[%s5522_s6 + $0x270] ss:$28 sps:$4 sm:$0xff]  }
  0x6e   : > { %3196 = vmatpush1.bf16.msra.mxu0 %v4757_v61  ;;  %3154 = vmatprep.subr.bf16.mxu1 %v4758_v62  ;;  %v4844_v61 = vld [vmem:[%s5522_s6 + $0x9a4] ss:$28 sps:$4 sm:$0xff]   ;;  %v4847_v62 = vld [vmem:[%s5522_s6 + $0x2ac] ss:$28 sps:$4 sm:$0xff]  }
  0x6f   : > { %3197 = vmatprep.subr.bf16.mxu0 %v4760_v63  ;;  %v4842_v63 = vld [vmem:[%s5522_s6 + $0x9a0] ss:$28 sps:$4 sm:$0xff]  }
  0x71   : > { %3155 = vmatpush1.bf16.msra.mxu1 %v4762_v0  ;;  %v4845_v0 = vld [vmem:[%s5522_s6 + $0x2a8] ss:$28 sps:$4 sm:$0xff]  }
  0x72   : > { %3198 = vmatpush1.bf16.msra.mxu0 %v4763_v1  ;;  %3156 = vmatprep.subr.bf16.mxu1 %v4764_v2  ;;  %v4850_v1 = vld [vmem:[%s5522_s6 + $0x9dc] ss:$28 sps:$4 sm:$0xff]   ;;  %v4853_v2 = vld [vmem:[%s5522_s6 + $0x2e4] ss:$28 sps:$4 sm:$0xff]  }
  0x73   : > { %3199 = vmatprep.subr.bf16.mxu0 %v4766_v3  ;;  %v4848_v3 = vld [vmem:[%s5522_s6 + $0x9d8] ss:$28 sps:$4 sm:$0xff]  }
  0x75   : > { %3157 = vmatpush1.bf16.msra.mxu1 %v4768_v4  ;;  %v4851_v4 = vld [vmem:[%s5522_s6 + $0x2e0] ss:$28 sps:$4 sm:$0xff]  }
  0x76   : > { %3200 = vmatpush1.bf16.msra.mxu0 %v4769_v5  ;;  %3298 = vmatprep.subr.bf16.mxu1 %v4775_v7  ;;  %v4856_v5 = vld [vmem:[%s5522_s6 + $0xa14] ss:$28 sps:$4 sm:$0xff]  }
  0x77   : > { %3212 = vmatprep.subr.bf16.mxu0 %v4772_v6  ;;  %v4859_v6 = vld [vmem:[%s5522_s6 + $0x31c] ss:$28 sps:$4 sm:$0xff]   ;;  %v4854_v7 = vld [vmem:[%s5522_s6 + $0xa10] ss:$28 sps:$4 sm:$0xff]  }
  0x78   : > { %3159 = vmatmul.mubr.bf16.vlgmr.msra.gmra.mrb[0].mxu1 %v5612_v8 }
  0x79   : > { %3202 = vmatmul.mubr.bf16.vlgmr.msra.gmra.mrb[0].mxu0 %v5616_v11  ;;  %3299 = vmatpush1.bf16.msra.mxu1 %v4773_v10  ;;  %v4862_v10 = vld [vmem:[%s5522_s6 + $0xa4c] ss:$28 sps:$4 sm:$0xff]  }
  0x7a   : > { %3213 = vmatpush1.bf16.msra.mxu0 %v4770_v9  ;;  %3300 = vmatprep.subr.bf16.mxu1 %v4781_v13  ;;  %v4857_v9 = vld [vmem:[%s5522_s6 + $0x318] ss:$28 sps:$4 sm:$0xff]   ;;  %v4860_v13 = vld [vmem:[%s5522_s6 + $0xa48] ss:$28 sps:$4 sm:$0xff]  }
  0x7b   : > { %3214 = vmatprep.subr.bf16.mxu0 %v4778_v12  ;;  %3330 = vmatprep.mubr.bf16.mxu1 %v5589_v53  ;;  %v4865_v12 = vld [vmem:[%s5522_s6 + $0x354] ss:$28 sps:$4 sm:$0xff]  }
  0x7c   : > { %3244 = vmatprep.mubr.bf16.mxu0 %v5657_v38 }
  0x7d   : > { %3301 = vmatpush1.bf16.msra.mxu1 %v4779_v15  ;;  %v4868_v15 = vld [vmem:[%s5522_s6 + $0xa84] ss:$28 sps:$4 sm:$0xff]  }
  0x7e   : > { %3215 = vmatpush1.bf16.msra.mxu0 %v4776_v14  ;;  %3302 = vmatprep.subr.bf16.mxu1 %v4787_v17  ;;  %v4863_v14 = vld [vmem:[%s5522_s6 + $0x350] ss:$28 sps:$4 sm:$0xff]   ;;  %v5700_v17 = vcombine.low %v5646_v34, %v5651_v35  ;;  %v4892_v35 = vld [vmem:[%s5522_s6 + $0xb64] ss:$28 sps:$4 sm:$0xff]  }
  0x7f   : > { %3216 = vmatprep.subr.bf16.mxu0 %v4784_v16  ;;  %v4871_v16 = vld [vmem:[%s5522_s6 + $0x38c] ss:$28 sps:$4 sm:$0xff]  }
  0x80   : > { %v4887_v34 = vld [vmem:[%s5522_s6 + $0x430] ss:$28 sps:$4 sm:$0xff]  }
  0x81   : > { %3303 = vmatpush1.bf16.msra.mxu1 %v4785_v19  ;;  %v4869_v19 = vld [vmem:[%s5522_s6 + $0x388] ss:$28 sps:$4 sm:$0xff]  }
  0x82   : > { %3217 = vmatpush1.bf16.msra.mxu0 %v4782_v18  ;;  %3304 = vmatprep.subr.bf16.mxu1 %v4793_v21  ;;  %v4866_v18 = vld [vmem:[%s5522_s6 + $0xa80] ss:$28 sps:$4 sm:$0xff]  }
  0x83   : > { %3218 = vmatprep.subr.bf16.mxu0 %v4790_v20  ;;  %v4874_v20 = vld [vmem:[%s5522_s6 + $0xabc] ss:$28 sps:$4 sm:$0xff]   ;;  %v4877_v21 = vld [vmem:[%s5522_s6 + $0x3c4] ss:$28 sps:$4 sm:$0xff]  }
  0x85   : > { %3305 = vmatpush1.bf16.msra.mxu1 %v4791_v23  ;;  %v5714_v23 = vld [vmem:[%s6131_s0 + $0x38] sm:$0xff] }
  0x86   : > { %3219 = vmatpush1.bf16.msra.mxu0 %v4788_v22  ;;  %3306 = vmatprep.subr.bf16.mxu1 %v4799_v25  ;;  %v5709_v22 = vld [vmem:[%s6131_s0 + $0x18] sm:$0xff] }
  0x87   : > { %3220 = vmatprep.subr.bf16.mxu0 %v4796_v24  ;;  %v4872_v24 = vld [vmem:[%s5522_s6 + $0xab8] ss:$28 sps:$4 sm:$0xff]   ;;  %v4875_v25 = vld [vmem:[%s5522_s6 + $0x3c0] ss:$28 sps:$4 sm:$0xff]  }
  0x89   : > { %3307 = vmatpush1.bf16.msra.mxu1 %v4797_v27  ;;  %v4880_v27 = vld [vmem:[%s5522_s6 + $0xaf4] ss:$28 sps:$4 sm:$0xff]  }
  0x8a   : > { %3221 = vmatpush1.bf16.msra.mxu0 %v4794_v26  ;;  %3308 = vmatprep.subr.bf16.mxu1 %v4805_v29  ;;  %v5722_v26 = vcombine.high %v5709_v22, %v5714_v23  ;;  %v4878_v29 = vld [vmem:[%s5522_s6 + $0xaf0] ss:$28 sps:$4 sm:$0xff]  }
  0x8b   : > { %3222 = vmatprep.subr.bf16.mxu0 %v4802_v28  ;;  %v4883_v28 = vld [vmem:[%s5522_s6 + $0x3fc] ss:$28 sps:$4 sm:$0xff]  }
  0x8d   : > { %3309 = vmatpush1.bf16.msra.mxu1 %v4803_v31  ;;  %v4886_v31 = vld [vmem:[%s5522_s6 + $0xb2c] ss:$28 sps:$4 sm:$0xff]  }
  0x8e   : > { %3223 = vmatpush1.bf16.msra.mxu0 %v4800_v30  ;;  %3310 = vmatprep.subr.bf16.mxu1 %v4811_v33  ;;  %v4881_v30 = vld [vmem:[%s5522_s6 + $0x3f8] ss:$28 sps:$4 sm:$0xff]   ;;  %v4884_v33 = vld [vmem:[%s5522_s6 + $0xb28] ss:$28 sps:$4 sm:$0xff]  }
  0x8f   : > { %3224 = vmatprep.subr.bf16.mxu0 %v4808_v32  ;;  %v4889_v32 = vld [vmem:[%s5522_s6 + $0x434] ss:$28 sps:$4 sm:$0xff]  }
  0x91   : > { %3311 = vmatpush1.bf16.msra.mxu1 %v4809_v37  ;;  %v4890_v37 = vld [vmem:[%s5522_s6 + $0xb60] ss:$28 sps:$4 sm:$0xff]  }
  0x92   : > { %3225 = vmatpush1.bf16.msra.mxu0 %v4806_v36  ;;  %3312 = vmatprep.subr.bf16.mxu1 %v4817_v40  ;;  %v4895_v36 = vld [vmem:[%s5522_s6 + $0x46c] ss:$28 sps:$4 sm:$0xff]   ;;  %v4898_v40 = vld [vmem:[%s5522_s6 + $0xb9c] ss:$28 sps:$4 sm:$0xff]  }
  0x93   : > { %3226 = vmatprep.subr.bf16.mxu0 %v4814_v39  ;;  %v4893_v39 = vld [vmem:[%s5522_s6 + $0x468] ss:$28 sps:$4 sm:$0xff]  }
  0x95   : > { %3313 = vmatpush1.bf16.msra.mxu1 %v4815_v42  ;;  %v4896_v42 = vld [vmem:[%s5522_s6 + $0xb98] ss:$28 sps:$4 sm:$0xff]  }
  0x96   : > { %3227 = vmatpush1.bf16.msra.mxu0 %v4812_v41  ;;  %3314 = vmatprep.subr.bf16.mxu1 %v4823_v44  ;;  %v4901_v41 = vld [vmem:[%s5522_s6 + $0x4a4] ss:$28 sps:$4 sm:$0xff]   ;;  %v4904_v44 = vld [vmem:[%s5522_s6 + $0xbd4] ss:$28 sps:$4 sm:$0xff]  }
  0x97   : > { %3228 = vmatprep.subr.bf16.mxu0 %v4820_v43  ;;  %v4899_v43 = vld [vmem:[%s5522_s6 + $0x4a0] ss:$28 sps:$4 sm:$0xff]  }
  0x99   : > { %3315 = vmatpush1.bf16.msra.mxu1 %v4821_v46  ;;  %v4902_v46 = vld [vmem:[%s5522_s6 + $0xbd0] ss:$28 sps:$4 sm:$0xff]  }
  0x9a   : > { %3229 = vmatpush1.bf16.msra.mxu0 %v4818_v45  ;;  %3316 = vmatprep.subr.bf16.mxu1 %v4829_v48  ;;  %v4907_v45 = vld [vmem:[%s5522_s6 + $0x4dc] ss:$28 sps:$4 sm:$0xff]   ;;  %v4910_v48 = vld [vmem:[%s5522_s6 + $0xc0c] ss:$28 sps:$4 sm:$0xff]  }
  0x9b   : > { %3230 = vmatprep.subr.bf16.mxu0 %v4826_v47  ;;  %v4905_v47 = vld [vmem:[%s5522_s6 + $0x4d8] ss:$28 sps:$4 sm:$0xff]  }
  0x9d   : > { %3317 = vmatpush1.bf16.msra.mxu1 %v4827_v50  ;;  %v4908_v50 = vld [vmem:[%s5522_s6 + $0xc08] ss:$28 sps:$4 sm:$0xff]  }
  0x9e   : > { %3231 = vmatpush1.bf16.msra.mxu0 %v4824_v49  ;;  %3318 = vmatprep.subr.bf16.mxu1 %v4835_v52  ;;  %v4913_v49 = vld [vmem:[%s5522_s6 + $0x514] ss:$28 sps:$4 sm:$0xff]   ;;  %v4916_v52 = vld [vmem:[%s5522_s6 + $0xc44] ss:$28 sps:$4 sm:$0xff]  }
  0x9f   : > { %3232 = vmatprep.subr.bf16.mxu0 %v4832_v51  ;;  %v4911_v51 = vld [vmem:[%s5522_s6 + $0x510] ss:$28 sps:$4 sm:$0xff]  }
  0xa1   : > { %3319 = vmatpush1.bf16.msra.mxu1 %v4833_v56  ;;  %v4914_v56 = vld [vmem:[%s5522_s6 + $0xc40] ss:$28 sps:$4 sm:$0xff]  }
  0xa2   : > { %3233 = vmatpush1.bf16.msra.mxu0 %v4830_v55  ;;  %3320 = vmatprep.subr.bf16.mxu1 %v4841_v58  ;;  %v4919_v55 = vld [vmem:[%s5522_s6 + $0x54c] ss:$28 sps:$4 sm:$0xff]   ;;  %v4922_v58 = vld [vmem:[%s5522_s6 + $0xc7c] ss:$28 sps:$4 sm:$0xff]  }
  0xa3   : > { %3234 = vmatprep.subr.bf16.mxu0 %v4838_v57  ;;  %v4917_v57 = vld [vmem:[%s5522_s6 + $0x548] ss:$28 sps:$4 sm:$0xff]  }
  0xa5   : > { %3321 = vmatpush1.bf16.msra.mxu1 %v4839_v60  ;;  %v4920_v60 = vld [vmem:[%s5522_s6 + $0xc78] ss:$28 sps:$4 sm:$0xff]  }
  0xa6   : > { %3235 = vmatpush1.bf16.msra.mxu0 %v4836_v59  ;;  %3322 = vmatprep.subr.bf16.mxu1 %v4847_v62  ;;  %v4925_v59 = vld [vmem:[%s5522_s6 + $0x584] ss:$28 sps:$4 sm:$0xff]   ;;  %v4928_v62 = vld [vmem:[%s5522_s6 + $0xcb4] ss:$28 sps:$4 sm:$0xff]  }
  0xa7   : > { %3236 = vmatprep.subr.bf16.mxu0 %v4844_v61  ;;  %v4923_v61 = vld [vmem:[%s5522_s6 + $0x580] ss:$28 sps:$4 sm:$0xff]  }
  0xa9   : > { %3323 = vmatpush1.bf16.msra.mxu1 %v4845_v0  ;;  %v4926_v0 = vld [vmem:[%s5522_s6 + $0xcb0] ss:$28 sps:$4 sm:$0xff]  }
  0xaa   : > { %3237 = vmatpush1.bf16.msra.mxu0 %v4842_v63  ;;  %3324 = vmatprep.subr.bf16.mxu1 %v4853_v2  ;;  %v4931_v63 = vld [vmem:[%s5522_s6 + $0x5bc] ss:$28 sps:$4 sm:$0xff]   ;;  %v4934_v2 = vld [vmem:[%s5522_s6 + $0xcec] ss:$28 sps:$4 sm:$0xff]  }
  0xab   : > { %3238 = vmatprep.subr.bf16.mxu0 %v4850_v1  ;;  %v4929_v1 = vld [vmem:[%s5522_s6 + $0x5b8] ss:$28 sps:$4 sm:$0xff]  }
  0xad   : > { %3325 = vmatpush1.bf16.msra.mxu1 %v4851_v4  ;;  %v4932_v4 = vld [vmem:[%s5522_s6 + $0xce8] ss:$28 sps:$4 sm:$0xff]  }
  0xae   : > { %3239 = vmatpush1.bf16.msra.mxu0 %v4848_v3  ;;  %3326 = vmatprep.subr.bf16.mxu1 %v4859_v6  ;;  %v4937_v3 = vld [vmem:[%s5522_s6 + $0x5f4] ss:$28 sps:$4 sm:$0xff]   ;;  %v4940_v6 = vld [vmem:[%s5522_s6 + $0xd24] ss:$28 sps:$4 sm:$0xff]  }
  0xaf   : > { %3240 = vmatprep.subr.bf16.mxu0 %v4856_v5  ;;  %v4935_v5 = vld [vmem:[%s5522_s6 + $0x5f0] ss:$28 sps:$4 sm:$0xff]  }
  0xb1   : > { %3327 = vmatpush1.bf16.msra.mxu1 %v4857_v9  ;;  %v4938_v9 = vld [vmem:[%s5522_s6 + $0xd20] ss:$28 sps:$4 sm:$0xff]  }
  0xb2   : > { %3241 = vmatpush1.bf16.msra.mxu0 %v4854_v7  ;;  %3328 = vmatprep.subr.bf16.mxu1 %v4865_v12  ;;  %v4943_v7 = vld [vmem:[%s5522_s6 + $0x62c] ss:$28 sps:$4 sm:$0xff]   ;;  %v4946_v12 = vld [vmem:[%s5522_s6 + $0xd5c] ss:$28 sps:$4 sm:$0xff]  }
  0xb3   : > { %3242 = vmatprep.subr.bf16.mxu0 %v4862_v10  ;;  %v4941_v10 = vld [vmem:[%s5522_s6 + $0x628] ss:$28 sps:$4 sm:$0xff]  }
  0xb5   : > { %3329 = vmatpush1.bf16.msra.mxu1 %v4863_v14  ;;  %v4944_v14 = vld [vmem:[%s5522_s6 + $0xd58] ss:$28 sps:$4 sm:$0xff]  }
  0xb6   : > { %3243 = vmatpush1.bf16.msra.mxu0 %v4860_v13  ;;  %3341 = vmatprep.subr.bf16.mxu1 %v4871_v16  ;;  %v4949_v13 = vld [vmem:[%s5522_s6 + $0x664] ss:$28 sps:$4 sm:$0xff]   ;;  %v4952_v16 = vld [vmem:[%s5522_s6 + $0xd94] ss:$28 sps:$4 sm:$0xff]  }
  0xb7   : > { %3255 = vmatprep.subr.bf16.mxu0 %v4868_v15  ;;  %v4947_v15 = vld [vmem:[%s5522_s6 + $0x660] ss:$28 sps:$4 sm:$0xff]  }
  0xb8   : > { %3331 = vmatmul.mubr.bf16.vlgmr.msra.gmra.mrb[4].mxu1 %v5612_v8 }
  0xb9   : > { %3245 = vmatmul.mubr.bf16.vlgmr.msra.gmra.mrb[0].mxu0 %v5700_v17  ;;  %3342 = vmatpush1.bf16.msra.mxu1 %v4869_v19  ;;  %v4950_v19 = vld [vmem:[%s5522_s6 + $0xd90] ss:$28 sps:$4 sm:$0xff]  }
  0xba   : > { %3256 = vmatpush1.bf16.msra.mxu0 %v4866_v18  ;;  %3343 = vmatprep.subr.bf16.mxu1 %v4877_v21  ;;  %v4955_v18 = vld [vmem:[%s5522_s6 + $0x69c] ss:$28 sps:$4 sm:$0xff]   ;;  %v4958_v21 = vld [vmem:[%s5522_s6 + $0xdcc] ss:$28 sps:$4 sm:$0xff]  }
  0xbb   : > { %3257 = vmatprep.subr.bf16.mxu0 %v4874_v20  ;;  %3287 = vmatprep.mubr.bf16.mxu0 %v5722_v26  ;;  %v4953_v20 = vld [vmem:[%s5522_s6 + $0x698] ss:$28 sps:$4 sm:$0xff]  }
  0xbc   : > { %3373 = vmatprep.mubr.bf16.mxu1 %v5591_v54 }
  0xbd   : > { %3344 = vmatpush1.bf16.msra.mxu1 %v4875_v25  ;;  %v4956_v25 = vld [vmem:[%s5522_s6 + $0xdc8] ss:$28 sps:$4 sm:$0xff]  }
  0xbe   : > { %3258 = vmatpush1.bf16.msra.mxu0 %v4872_v24  ;;  %3345 = vmatprep.subr.bf16.mxu1 %v4883_v28  ;;  %v4961_v24 = vld [vmem:[%s5522_s6 + $0x6d4] ss:$28 sps:$4 sm:$0xff]   ;;  %v4964_v28 = vld [vmem:[%s5522_s6 + $0x70c] ss:$28 sps:$4 sm:$0xff]  }
  0xbf   : > { %3259 = vmatprep.subr.bf16.mxu0 %v4880_v27  ;;  %v4959_v27 = vld [vmem:[%s5522_s6 + $0x6d0] ss:$28 sps:$4 sm:$0xff]  }
  0xc1   : > { %3346 = vmatpush1.bf16.msra.mxu1 %v4881_v30  ;;  %v5786_v30 = vcombine.low %v5709_v22, %v5714_v23  ;;  %v4976_v22 = vld [vmem:[%s5522_s6 + $0x77c] ss:$28 sps:$4 sm:$0xff]   ;;  %v4979_v23 = vld [vmem:[%s5522_s6 + $0x84] ss:$28 sps:$4 sm:$0xff]  }
  0xc2   : > { %3260 = vmatpush1.bf16.msra.mxu0 %v4878_v29  ;;  %3347 = vmatprep.subr.bf16.mxu1 %v4889_v32  ;;  %v4967_v29 = vld [vmem:[%s5522_s6 + $0x14] ss:$28 sps:$4 sm:$0xff]  }
  0xc3   : > { %3261 = vmatprep.subr.bf16.mxu0 %v4886_v31  ;;  %v4962_v31 = vld [vmem:[%s5522_s6 + $0x708] ss:$28 sps:$4 sm:$0xff]   ;;  %v4965_v32 = vld [vmem:[%s5522_s6 + $0x10] ss:$28 sps:$4 sm:$0xff]  }
  0xc5   : > { %3348 = vmatpush1.bf16.msra.mxu1 %v4887_v34  ;;  %v4973_v34 = vld [vmem:[%s5522_s6 + $0x4c] ss:$28 sps:$4 sm:$0xff]  }
  0xc6   : > { %3262 = vmatpush1.bf16.msra.mxu0 %v4884_v33  ;;  %3349 = vmatprep.subr.bf16.mxu1 %v4895_v36  ;;  %v4970_v33 = vld [vmem:[%s5522_s6 + $0x744] ss:$28 sps:$4 sm:$0xff]  }
  0xc7   : > { %3263 = vmatprep.subr.bf16.mxu0 %v4892_v35  ;;  %v4968_v35 = vld [vmem:[%s5522_s6 + $0x740] ss:$28 sps:$4 sm:$0xff]   ;;  %v4971_v36 = vld [vmem:[%s5522_s6 + $0x48] ss:$28 sps:$4 sm:$0xff]  }
  0xc9   : > { %3350 = vmatpush1.bf16.msra.mxu1 %v4893_v39  ;;  %v4977_v39 = vld [vmem:[%s5522_s6 + $0x80] ss:$28 sps:$4 sm:$0xff]  }
  0xca   : > { %3264 = vmatpush1.bf16.msra.mxu0 %v4890_v37  ;;  %3351 = vmatprep.subr.bf16.mxu1 %v4901_v41  ;;  %v4974_v37 = vld [vmem:[%s5522_s6 + $0x778] ss:$28 sps:$4 sm:$0xff]  }
  0xcb   : > { %3265 = vmatprep.subr.bf16.mxu0 %v4898_v40  ;;  %v4982_v40 = vld [vmem:[%s5522_s6 + $0x7b4] ss:$28 sps:$4 sm:$0xff]   ;;  %v4985_v41 = vld [vmem:[%s5522_s6 + $0xbc] ss:$28 sps:$4 sm:$0xff]  }
  0xcd   : > { %3352 = vmatpush1.bf16.msra.mxu1 %v4899_v43  ;;  %v4983_v43 = vld [vmem:[%s5522_s6 + $0xb8] ss:$28 sps:$4 sm:$0xff]  }
  0xce   : > { %3266 = vmatpush1.bf16.msra.mxu0 %v4896_v42  ;;  %3353 = vmatprep.subr.bf16.mxu1 %v4907_v45  ;;  %v4980_v42 = vld [vmem:[%s5522_s6 + $0x7b0] ss:$28 sps:$4 sm:$0xff]  }
  0xcf   : > { %3267 = vmatprep.subr.bf16.mxu0 %v4904_v44  ;;  %v4988_v44 = vld [vmem:[%s5522_s6 + $0x7ec] ss:$28 sps:$4 sm:$0xff]   ;;  %v4991_v45 = vld [vmem:[%s5522_s6 + $0xf4] ss:$28 sps:$4 sm:$0xff]  }
  0xd1   : > { %3354 = vmatpush1.bf16.msra.mxu1 %v4905_v47  ;;  %v4989_v47 = vld [vmem:[%s5522_s6 + $0xf0] ss:$28 sps:$4 sm:$0xff]  }
  0xd2   : > { %3268 = vmatpush1.bf16.msra.mxu0 %v4902_v46  ;;  %3355 = vmatprep.subr.bf16.mxu1 %v4913_v49  ;;  %v4986_v46 = vld [vmem:[%s5522_s6 + $0x7e8] ss:$28 sps:$4 sm:$0xff]  }
  0xd3   : > { %3269 = vmatprep.subr.bf16.mxu0 %v4910_v48  ;;  %v4994_v48 = vld [vmem:[%s5522_s6 + $0x824] ss:$28 sps:$4 sm:$0xff]   ;;  %v4997_v49 = vld [vmem:[%s5522_s6 + $0x12c] ss:$28 sps:$4 sm:$0xff]  }
  0xd5   : > { %3356 = vmatpush1.bf16.msra.mxu1 %v4911_v51  ;;  %v4995_v51 = vld [vmem:[%s5522_s6 + $0x128] ss:$28 sps:$4 sm:$0xff]  }
  0xd6   : > { %3270 = vmatpush1.bf16.msra.mxu0 %v4908_v50  ;;  %3357 = vmatprep.subr.bf16.mxu1 %v4919_v55  ;;  %v4992_v50 = vld [vmem:[%s5522_s6 + $0x820] ss:$28 sps:$4 sm:$0xff]  }
  0xd7   : > { %3271 = vmatprep.subr.bf16.mxu0 %v4916_v52  ;;  %v5000_v52 = vld [vmem:[%s5522_s6 + $0x85c] ss:$28 sps:$4 sm:$0xff]   ;;  %v5003_v55 = vld [vmem:[%s5522_s6 + $0x164] ss:$28 sps:$4 sm:$0xff]  }
  0xd9   : > { %3358 = vmatpush1.bf16.msra.mxu1 %v4917_v57  ;;  %v5001_v57 = vld [vmem:[%s5522_s6 + $0x160] ss:$28 sps:$4 sm:$0xff]  }
  0xda   : > { %3272 = vmatpush1.bf16.msra.mxu0 %v4914_v56  ;;  %3359 = vmatprep.subr.bf16.mxu1 %v4925_v59  ;;  %v4998_v56 = vld [vmem:[%s5522_s6 + $0x858] ss:$28 sps:$4 sm:$0xff]  }
  0xdb   : > { %3273 = vmatprep.subr.bf16.mxu0 %v4922_v58  ;;  %v5006_v58 = vld [vmem:[%s5522_s6 + $0x894] ss:$28 sps:$4 sm:$0xff]   ;;  %v5009_v59 = vld [vmem:[%s5522_s6 + $0x19c] ss:$28 sps:$4 sm:$0xff]  }
  0xdd   : > { %3360 = vmatpush1.bf16.msra.mxu1 %v4923_v61  ;;  %v5007_v61 = vld [vmem:[%s5522_s6 + $0x198] ss:$28 sps:$4 sm:$0xff]  }
  0xde   : > { %3274 = vmatpush1.bf16.msra.mxu0 %v4920_v60  ;;  %3361 = vmatprep.subr.bf16.mxu1 %v4931_v63  ;;  %v5004_v60 = vld [vmem:[%s5522_s6 + $0x890] ss:$28 sps:$4 sm:$0xff]  }
  0xdf   : > { %3275 = vmatprep.subr.bf16.mxu0 %v4928_v62  ;;  %v5012_v62 = vld [vmem:[%s5522_s6 + $0x8cc] ss:$28 sps:$4 sm:$0xff]   ;;  %v5015_v63 = vld [vmem:[%s5522_s6 + $0x1d4] ss:$28 sps:$4 sm:$0xff]  }
  0xe1   : > { %3362 = vmatpush1.bf16.msra.mxu1 %v4929_v1  ;;  %v5013_v1 = vld [vmem:[%s5522_s6 + $0x1d0] ss:$28 sps:$4 sm:$0xff]  }
  0xe2   : > { %3276 = vmatpush1.bf16.msra.mxu0 %v4926_v0  ;;  %3363 = vmatprep.subr.bf16.mxu1 %v4937_v3  ;;  %v5010_v0 = vld [vmem:[%s5522_s6 + $0x8c8] ss:$28 sps:$4 sm:$0xff]  }
  0xe3   : > { %3277 = vmatprep.subr.bf16.mxu0 %v4934_v2  ;;  %v5018_v2 = vld [vmem:[%s5522_s6 + $0x904] ss:$28 sps:$4 sm:$0xff]   ;;  %v5021_v3 = vld [vmem:[%s5522_s6 + $0x20c] ss:$28 sps:$4 sm:$0xff]  }
  0xe5   : > { %3364 = vmatpush1.bf16.msra.mxu1 %v4935_v5  ;;  %v5019_v5 = vld [vmem:[%s5522_s6 + $0x208] ss:$28 sps:$4 sm:$0xff]  }
  0xe6   : > { %3278 = vmatpush1.bf16.msra.mxu0 %v4932_v4  ;;  %3365 = vmatprep.subr.bf16.mxu1 %v4943_v7  ;;  %v5016_v4 = vld [vmem:[%s5522_s6 + $0x900] ss:$28 sps:$4 sm:$0xff]  }
  0xe7   : > { %3279 = vmatprep.subr.bf16.mxu0 %v4940_v6  ;;  %v5024_v6 = vld [vmem:[%s5522_s6 + $0x93c] ss:$28 sps:$4 sm:$0xff]   ;;  %v5027_v7 = vld [vmem:[%s5522_s6 + $0x244] ss:$28 sps:$4 sm:$0xff]  }
  0xe9   : > { %3366 = vmatpush1.bf16.msra.mxu1 %v4941_v10  ;;  %v5025_v10 = vld [vmem:[%s5522_s6 + $0x240] ss:$28 sps:$4 sm:$0xff]  }
  0xea   : > { %3280 = vmatpush1.bf16.msra.mxu0 %v4938_v9  ;;  %3367 = vmatprep.subr.bf16.mxu1 %v4949_v13  ;;  %v5022_v9 = vld [vmem:[%s5522_s6 + $0x938] ss:$28 sps:$4 sm:$0xff]  }
  0xeb   : > { %3281 = vmatprep.subr.bf16.mxu0 %v4946_v12  ;;  %v5030_v12 = vld [vmem:[%s5522_s6 + $0x974] ss:$28 sps:$4 sm:$0xff]   ;;  %v5033_v13 = vld [vmem:[%s5522_s6 + $0x27c] ss:$28 sps:$4 sm:$0xff]  }
  0xed   : > { %3368 = vmatpush1.bf16.msra.mxu1 %v4947_v15  ;;  %v5031_v15 = vld [vmem:[%s5522_s6 + $0x278] ss:$28 sps:$4 sm:$0xff]  }
  0xee   : > { %3282 = vmatpush1.bf16.msra.mxu0 %v4944_v14  ;;  %3369 = vmatprep.subr.bf16.mxu1 %v4955_v18  ;;  %v5028_v14 = vld [vmem:[%s5522_s6 + $0x970] ss:$28 sps:$4 sm:$0xff]  }
  0xef   : > { %3283 = vmatprep.subr.bf16.mxu0 %v4952_v16  ;;  %v5036_v16 = vld [vmem:[%s5522_s6 + $0x9ac] ss:$28 sps:$4 sm:$0xff]   ;;  %v5039_v18 = vld [vmem:[%s5522_s6 + $0x2b4] ss:$28 sps:$4 sm:$0xff]  }
  0xf1   : > { %3370 = vmatpush1.bf16.msra.mxu1 %v4953_v20  ;;  %v5037_v20 = vld [vmem:[%s5522_s6 + $0x2b0] ss:$28 sps:$4 sm:$0xff]  }
  0xf2   : > { %3284 = vmatpush1.bf16.msra.mxu0 %v4950_v19  ;;  %3371 = vmatprep.subr.bf16.mxu1 %v4961_v24  ;;  %v5034_v19 = vld [vmem:[%s5522_s6 + $0x9a8] ss:$28 sps:$4 sm:$0xff]  }
  0xf3   : > { %3285 = vmatprep.subr.bf16.mxu0 %v4958_v21  ;;  %v5042_v21 = vld [vmem:[%s5522_s6 + $0x9e4] ss:$28 sps:$4 sm:$0xff]   ;;  %v5045_v24 = vld [vmem:[%s5522_s6 + $0x2ec] ss:$28 sps:$4 sm:$0xff]  }
  0xf5   : > { %3372 = vmatpush1.bf16.msra.mxu1 %v4959_v27  ;;  %v5043_v27 = vld [vmem:[%s5522_s6 + $0x2e8] ss:$28 sps:$4 sm:$0xff]  }
  0xf6   : > { %3286 = vmatpush1.bf16.msra.mxu0 %v4956_v25  ;;  %3384 = vmatprep.subr.bf16.mxu1 %v4964_v28  ;;  %v5040_v25 = vld [vmem:[%s5522_s6 + $0x9e0] ss:$28 sps:$4 sm:$0xff]  }
  0xf7   : > { %3470 = vmatprep.subr.bf16.mxu0 %v4967_v29  ;;  %v5048_v28 = vld [vmem:[%s5522_s6 + $0xa1c] ss:$28 sps:$4 sm:$0xff]   ;;  %v5051_v29 = vld [vmem:[%s5522_s6 + $0x324] ss:$28 sps:$4 sm:$0xff]  }
  0xf8   : > { %3374 = vmatmul.mubr.bf16.vlgmr.msra.gmra.mrb[4].mxu1 %v5616_v11 }
  0xf9   : > { %3288 = vmatmul.mubr.bf16.vlgmr.msra.gmra.mrb[0].mxu0 %v5786_v30  ;;  %3385 = vmatpush1.bf16.msra.mxu1 %v4962_v31  ;;  %v5046_v31 = vld [vmem:[%s5522_s6 + $0xa18] ss:$28 sps:$4 sm:$0xff]  }
  0xfa   : > { %3471 = vmatpush1.bf16.msra.mxu0 %v4965_v32  ;;  %3386 = vmatprep.subr.bf16.mxu1 %v4970_v33  ;;  %v5049_v32 = vld [vmem:[%s5522_s6 + $0x320] ss:$28 sps:$4 sm:$0xff]   ;;  %v5054_v33 = vld [vmem:[%s5522_s6 + $0xa54] ss:$28 sps:$4 sm:$0xff]  }
  0xfb   : > { %3472 = vmatprep.subr.bf16.mxu0 %v4973_v34  ;;  %3416 = vmatprep.mubr.bf16.mxu1 %v5657_v38  ;;  %v5057_v34 = vld [vmem:[%s5522_s6 + $0x35c] ss:$28 sps:$4 sm:$0xff]  }
  0xfc   : > { %3502 = vmatprep.mubr.bf16.mxu0 %v5589_v53 }
  0xfd   : > { %3387 = vmatpush1.bf16.msra.mxu1 %v4968_v35  ;;  %v5052_v35 = vld [vmem:[%s5522_s6 + $0xa50] ss:$28 sps:$4 sm:$0xff]  }
  0xfe   : > { %3473 = vmatpush1.bf16.msra.mxu0 %v4971_v36  ;;  %3388 = vmatprep.subr.bf16.mxu1 %v4976_v22  ;;  %v5055_v36 = vld [vmem:[%s5522_s6 + $0x358] ss:$28 sps:$4 sm:$0xff]   ;;  %v5060_v22 = vld [vmem:[%s5522_s6 + $0xa8c] ss:$28 sps:$4 sm:$0xff]  }
  0xff   : > { %3474 = vmatprep.subr.bf16.mxu0 %v4979_v23  ;;  %v5063_v23 = vld [vmem:[%s5522_s6 + $0x394] ss:$28 sps:$4 sm:$0xff]  }
 0x101   : > { %3389 = vmatpush1.bf16.msra.mxu1 %v4974_v37  ;;  %v5058_v37 = vld [vmem:[%s5522_s6 + $0xa88] ss:$28 sps:$4 sm:$0xff]  }
 0x102   : > { %3475 = vmatpush1.bf16.msra.mxu0 %v4977_v39  ;;  %3390 = vmatprep.subr.bf16.mxu1 %v4982_v40  ;;  %v5061_v39 = vld [vmem:[%s5522_s6 + $0x390] ss:$28 sps:$4 sm:$0xff]   ;;  %v5066_v40 = vld [vmem:[%s5522_s6 + $0xac4] ss:$28 sps:$4 sm:$0xff]  }
 0x103   : > { %3476 = vmatprep.subr.bf16.mxu0 %v4985_v41  ;;  %v5069_v41 = vld [vmem:[%s5522_s6 + $0x3cc] ss:$28 sps:$4 sm:$0xff]  }
 0x105   : > { %3391 = vmatpush1.bf16.msra.mxu1 %v4980_v42  ;;  %v5064_v42 = vld [vmem:[%s5522_s6 + $0xac0] ss:$28 sps:$4 sm:$0xff]  }
 0x106   : > { %3477 = vmatpush1.bf16.msra.mxu0 %v4983_v43  ;;  %3392 = vmatprep.subr.bf16.mxu1 %v4988_v44  ;;  %v5067_v43 = vld [vmem:[%s5522_s6 + $0x3c8] ss:$28 sps:$4 sm:$0xff]   ;;  %v5072_v44 = vld [vmem:[%s5522_s6 + $0xafc] ss:$28 sps:$4 sm:$0xff]  }
 0x107   : > { %3478 = vmatprep.subr.bf16.mxu0 %v4991_v45  ;;  %v5075_v45 = vld [vmem:[%s5522_s6 + $0x404] ss:$28 sps:$4 sm:$0xff]  }
 0x109   : > { %3393 = vmatpush1.bf16.msra.mxu1 %v4986_v46  ;;  %v5070_v46 = vld [vmem:[%s5522_s6 + $0xaf8] ss:$28 sps:$4 sm:$0xff]  }
 0x10a   : > { %3479 = vmatpush1.bf16.msra.mxu0 %v4989_v47  ;;  %3394 = vmatprep.subr.bf16.mxu1 %v4994_v48  ;;  %v5073_v47 = vld [vmem:[%s5522_s6 + $0x400] ss:$28 sps:$4 sm:$0xff]   ;;  %v5078_v48 = vld [vmem:[%s5522_s6 + $0xb34] ss:$28 sps:$4 sm:$0xff]  }
 0x10b   : > { %3480 = vmatprep.subr.bf16.mxu0 %v4997_v49  ;;  %v5081_v49 = vld [vmem:[%s5522_s6 + $0x43c] ss:$28 sps:$4 sm:$0xff]  }
 0x10d   : > { %3395 = vmatpush1.bf16.msra.mxu1 %v4992_v50  ;;  %v5076_v50 = vld [vmem:[%s5522_s6 + $0xb30] ss:$28 sps:$4 sm:$0xff]  }
 0x10e   : > { %3481 = vmatpush1.bf16.msra.mxu0 %v4995_v51  ;;  %3396 = vmatprep.subr.bf16.mxu1 %v5000_v52  ;;  %v5079_v51 = vld [vmem:[%s5522_s6 + $0x438] ss:$28 sps:$4 sm:$0xff]   ;;  %v5084_v52 = vld [vmem:[%s5522_s6 + $0xb6c] ss:$28 sps:$4 sm:$0xff]  }
 0x10f   : > { %3482 = vmatprep.subr.bf16.mxu0 %v5003_v55  ;;  %v5087_v55 = vld [vmem:[%s5522_s6 + $0x474] ss:$28 sps:$4 sm:$0xff]  }
 0x111   : > { %3397 = vmatpush1.bf16.msra.mxu1 %v4998_v56  ;;  %v5082_v56 = vld [vmem:[%s5522_s6 + $0xb68] ss:$28 sps:$4 sm:$0xff]  }
 0x112   : > { %3483 = vmatpush1.bf16.msra.mxu0 %v5001_v57  ;;  %3398 = vmatprep.subr.bf16.mxu1 %v5006_v58  ;;  %v5085_v57 = vld [vmem:[%s5522_s6 + $0x470] ss:$28 sps:$4 sm:$0xff]   ;;  %v5090_v58 = vld [vmem:[%s5522_s6 + $0xba4] ss:$28 sps:$4 sm:$0xff]  }
 0x113   : > { %3484 = vmatprep.subr.bf16.mxu0 %v5009_v59  ;;  %v5093_v59 = vld [vmem:[%s5522_s6 + $0x4ac] ss:$28 sps:$4 sm:$0xff]  }
 0x115   : > { %3399 = vmatpush1.bf16.msra.mxu1 %v5004_v60  ;;  %v5088_v60 = vld [vmem:[%s5522_s6 + $0xba0] ss:$28 sps:$4 sm:$0xff]  }
 0x116   : > { %3485 = vmatpush1.bf16.msra.mxu0 %v5007_v61  ;;  %3400 = vmatprep.subr.bf16.mxu1 %v5012_v62  ;;  %v5091_v61 = vld [vmem:[%s5522_s6 + $0x4a8] ss:$28 sps:$4 sm:$0xff]   ;;  %v5096_v62 = vld [vmem:[%s5522_s6 + $0xbdc] ss:$28 sps:$4 sm:$0xff]  }
 0x117   : > { %3486 = vmatprep.subr.bf16.mxu0 %v5015_v63  ;;  %v5099_v63 = vld [vmem:[%s5522_s6 + $0x4e4] ss:$28 sps:$4 sm:$0xff]  }
 0x119   : > { %3401 = vmatpush1.bf16.msra.mxu1 %v5010_v0 }
 0x11a   : > { %3487 = vmatpush1.bf16.msra.mxu0 %v5013_v1  ;;  %3402 = vmatprep.subr.bf16.mxu1 %v5018_v2  ;;  %v5094_v1 = vld [vmem:[%s5522_s6 + $0xbd8] ss:$28 sps:$4 sm:$0xff]  }
 0x11b   : > { %3488 = vmatprep.subr.bf16.mxu0 %v5021_v3  ;;  %v5097_v3 = vld [vmem:[%s5522_s6 + $0x4e0] ss:$28 sps:$4 sm:$0xff]  }
 0x11d   : > { %3403 = vmatpush1.bf16.msra.mxu1 %v5016_v4 }
 0x11e   : > { %3489 = vmatpush1.bf16.msra.mxu0 %v5019_v5  ;;  %3404 = vmatprep.subr.bf16.mxu1 %v5024_v6  ;;  %v5102_v5 = vld [vmem:[%s5522_s6 + $0xc14] ss:$28 sps:$4 sm:$0xff]   ;;  %v5105_v6 = vld [vmem:[%s5522_s6 + $0x51c] ss:$28 sps:$4 sm:$0xff]  }
 0x11f   : > { %3490 = vmatprep.subr.bf16.mxu0 %v5027_v7 }
 0x121   : > { %3405 = vmatpush1.bf16.msra.mxu1 %v5022_v9  ;;  %v5100_v9 = vld [vmem:[%s5522_s6 + $0xc10] ss:$28 sps:$4 sm:$0xff]  }
 0x122   : > { %3491 = vmatpush1.bf16.msra.mxu0 %v5025_v10  ;;  %3406 = vmatprep.subr.bf16.mxu1 %v5030_v12  ;;  %v5103_v10 = vld [vmem:[%s5522_s6 + $0x518] ss:$28 sps:$4 sm:$0xff]   ;;  %v5108_v12 = vld [vmem:[%s5522_s6 + $0xc4c] ss:$28 sps:$4 sm:$0xff]  }
 0x123   : > { %3492 = vmatprep.subr.bf16.mxu0 %v5033_v13  ;;  %v5111_v13 = vld [vmem:[%s5522_s6 + $0x554] ss:$28 sps:$4 sm:$0xff]  }
 0x125   : > { %3407 = vmatpush1.bf16.msra.mxu1 %v5028_v14  ;;  %v5106_v14 = vld [vmem:[%s5522_s6 + $0xc48] ss:$28 sps:$4 sm:$0xff]  }
 0x126   : > { %3493 = vmatpush1.bf16.msra.mxu0 %v5031_v15  ;;  %3408 = vmatprep.subr.bf16.mxu1 %v5036_v16  ;;  %v5109_v15 = vld [vmem:[%s5522_s6 + $0x550] ss:$28 sps:$4 sm:$0xff]   ;;  %v5114_v16 = vld [vmem:[%s5522_s6 + $0xc84] ss:$28 sps:$4 sm:$0xff]  }
 0x127   : > { %3494 = vmatprep.subr.bf16.mxu0 %v5039_v18  ;;  %v5117_v18 = vld [vmem:[%s5522_s6 + $0x58c] ss:$28 sps:$4 sm:$0xff]  }
 0x129   : > { %3409 = vmatpush1.bf16.msra.mxu1 %v5034_v19  ;;  %v5112_v19 = vld [vmem:[%s5522_s6 + $0xc80] ss:$28 sps:$4 sm:$0xff]  }
 0x12a   : > { %3495 = vmatpush1.bf16.msra.mxu0 %v5037_v20  ;;  %3410 = vmatprep.subr.bf16.mxu1 %v5042_v21  ;;  %v5115_v20 = vld [vmem:[%s5522_s6 + $0x588] ss:$28 sps:$4 sm:$0xff]   ;;  %v5120_v21 = vld [vmem:[%s5522_s6 + $0xcbc] ss:$28 sps:$4 sm:$0xff]  }
 0x12b   : > { %3496 = vmatprep.subr.bf16.mxu0 %v5045_v24  ;;  %v5123_v24 = vld [vmem:[%s5522_s6 + $0x5c4] ss:$28 sps:$4 sm:$0xff]  }
 0x12d   : > { %3411 = vmatpush1.bf16.msra.mxu1 %v5040_v25  ;;  %v5118_v25 = vld [vmem:[%s5522_s6 + $0xcb8] ss:$28 sps:$4 sm:$0xff]  }
 0x12e   : > { %3497 = vmatpush1.bf16.msra.mxu0 %v5043_v27  ;;  %3412 = vmatprep.subr.bf16.mxu1 %v5048_v28  ;;  %v5121_v27 = vld [vmem:[%s5522_s6 + $0x5c0] ss:$28 sps:$4 sm:$0xff]   ;;  %v5126_v28 = vld [vmem:[%s5522_s6 + $0xcf4] ss:$28 sps:$4 sm:$0xff]  }
 0x12f   : > { %3498 = vmatprep.subr.bf16.mxu0 %v5051_v29  ;;  %v5129_v29 = vld [vmem:[%s5522_s6 + $0x5fc] ss:$28 sps:$4 sm:$0xff]  }
 0x131   : > { %3413 = vmatpush1.bf16.msra.mxu1 %v5046_v31  ;;  %v5124_v31 = vld [vmem:[%s5522_s6 + $0xcf0] ss:$28 sps:$4 sm:$0xff]  }
 0x132   : > { %3499 = vmatpush1.bf16.msra.mxu0 %v5049_v32  ;;  %3414 = vmatprep.subr.bf16.mxu1 %v5054_v33  ;;  %v5127_v32 = vld [vmem:[%s5522_s6 + $0x5f8] ss:$28 sps:$4 sm:$0xff]   ;;  %v5132_v33 = vld [vmem:[%s5522_s6 + $0xd2c] ss:$28 sps:$4 sm:$0xff]  }
 0x133   : > { %3500 = vmatprep.subr.bf16.mxu0 %v5057_v34  ;;  %v5135_v34 = vld [vmem:[%s5522_s6 + $0x634] ss:$28 sps:$4 sm:$0xff]  }
 0x135   : > { %3415 = vmatpush1.bf16.msra.mxu1 %v5052_v35  ;;  %v5130_v35 = vld [vmem:[%s5522_s6 + $0xd28] ss:$28 sps:$4 sm:$0xff]  }
 0x136   : > { %3501 = vmatpush1.bf16.msra.mxu0 %v5055_v36  ;;  %3427 = vmatprep.subr.bf16.mxu1 %v5060_v22  ;;  %v5133_v36 = vld [vmem:[%s5522_s6 + $0x630] ss:$28 sps:$4 sm:$0xff]   ;;  %v5138_v22 = vld [vmem:[%s5522_s6 + $0xd64] ss:$28 sps:$4 sm:$0xff]  }
 0x137   : > { %3513 = vmatprep.subr.bf16.mxu0 %v5063_v23  ;;  %v5141_v23 = vld [vmem:[%s5522_s6 + $0x66c] ss:$28 sps:$4 sm:$0xff]  }
 0x138   : > { %3417 = vmatmul.mubr.bf16.vlgmr.msra.gmra.mrb[4].mxu1 %v5700_v17 }
 0x139   : > { %3503 = vmatmul.mubr.bf16.vlgmr.msra.gmra.mrb[4].mxu0 %v5612_v8  ;;  %3428 = vmatpush1.bf16.msra.mxu1 %v5058_v37  ;;  %v5136_v37 = vld [vmem:[%s5522_s6 + $0xd60] ss:$28 sps:$4 sm:$0xff]  }
 0x13a   : > { %3514 = vmatpush1.bf16.msra.mxu0 %v5061_v39  ;;  %3429 = vmatprep.subr.bf16.mxu1 %v5066_v40  ;;  %v5139_v39 = vld [vmem:[%s5522_s6 + $0x668] ss:$28 sps:$4 sm:$0xff]   ;;  %v5144_v40 = vld [vmem:[%s5522_s6 + $0xd9c] ss:$28 sps:$4 sm:$0xff]  }
 0x13b   : > { %3515 = vmatprep.subr.bf16.mxu0 %v5069_v41  ;;  %3459 = vmatprep.mubr.bf16.mxu1 %v5722_v26  ;;  %v5147_v41 = vld [vmem:[%s5522_s6 + $0x6a4] ss:$28 sps:$4 sm:$0xff]  }
 0x13c   : > { %3545 = vmatprep.mubr.bf16.mxu0 %v5591_v54 }
 0x13d   : > { %3430 = vmatpush1.bf16.msra.mxu1 %v5064_v42  ;;  %v5142_v42 = vld [vmem:[%s5522_s6 + $0xd98] ss:$28 sps:$4 sm:$0xff]  }
 0x13e   : > { %3516 = vmatpush1.bf16.msra.mxu0 %v5067_v43  ;;  %3431 = vmatprep.subr.bf16.mxu1 %v5072_v44  ;;  %v5145_v43 = vld [vmem:[%s5522_s6 + $0x6a0] ss:$28 sps:$4 sm:$0xff]   ;;  %v5150_v44 = vld [vmem:[%s5522_s6 + $0xdd4] ss:$28 sps:$4 sm:$0xff]  }
 0x13f   : > { %3517 = vmatprep.subr.bf16.mxu0 %v5075_v45  ;;  %v5153_v45 = vld [vmem:[%s5522_s6 + $0x6dc] ss:$28 sps:$4 sm:$0xff]  }
 0x141   : > { %3432 = vmatpush1.bf16.msra.mxu1 %v5070_v46  ;;  %v5148_v46 = vld [vmem:[%s5522_s6 + $0xdd0] ss:$28 sps:$4 sm:$0xff]  }
 0x142   : > { %3518 = vmatpush1.bf16.msra.mxu0 %v5073_v47  ;;  %3433 = vmatprep.subr.bf16.mxu1 %v5078_v48  ;;  %v5151_v47 = vld [vmem:[%s5522_s6 + $0x6d8] ss:$28 sps:$4 sm:$0xff]  }
 0x143   : > { %3519 = vmatprep.subr.bf16.mxu0 %v5081_v49  ;;  %v5156_v48 = vld [vmem:[%s5522_s6 + $0x714] ss:$28 sps:$4 sm:$0xff]  }
 0x144   : > { %v5157_v49 = vld [vmem:[%s5522_s6 + $0x1d8] ss:$28 sps:$4 sm:$0xff]  }
 0x145   : > { %3434 = vmatpush1.bf16.msra.mxu1 %v5076_v50  ;;  %v5154_v50 = vld [vmem:[%s5522_s6 + $0x710] ss:$28 sps:$4 sm:$0xff]  }
 0x146   : > { %3520 = vmatpush1.bf16.msra.mxu0 %v5079_v51  ;;  %3435 = vmatprep.subr.bf16.mxu1 %v5084_v52  ;;  %v5158_v51 = vld [vmem:[%s5522_s6 + $0x18] ss:$28 sps:$4 sm:$0xff]   ;;  %v5161_v52 = vld [vmem:[%s5522_s6 + $0x74c] ss:$28 sps:$4 sm:$0xff]  }
 0x147   : > { %3521 = vmatprep.subr.bf16.mxu0 %v5087_v55  ;;  %v5162_v55 = vld [vmem:[%s5522_s6 + $0x210] ss:$28 sps:$4 sm:$0xff]  }
 0x149   : > { %3436 = vmatpush1.bf16.msra.mxu1 %v5082_v56  ;;  %v5159_v56 = vld [vmem:[%s5522_s6 + $0x748] ss:$28 sps:$4 sm:$0xff]  }
 0x14a   : > { %3522 = vmatpush1.bf16.msra.mxu0 %v5085_v57  ;;  %3437 = vmatprep.subr.bf16.mxu1 %v5090_v58  ;;  %v5163_v57 = vld [vmem:[%s5522_s6 + $0x50] ss:$28 sps:$4 sm:$0xff]   ;;  %v5166_v58 = vld [vmem:[%s5522_s6 + $0x784] ss:$28 sps:$4 sm:$0xff]  }
 0x14b   : > { %3523 = vmatprep.subr.bf16.mxu0 %v5093_v59  ;;  %v5884_v0 = vpop.f32.mrb[0].mxu1  ;;  %v5167_v59 = vld [vmem:[%s5522_s6 + $0x248] ss:$28 sps:$4 sm:$0xff]  }
 0x14c   : > { %v5887_v2 = vpop.f32.mrb[1].mxu1 }
 0x14d   : > { %v5890_v4 = vpop.f32.mrb[2].mxu1  ;;  %3438 = vmatpush1.bf16.msra.mxu1 %v5088_v60  ;;  %v5164_v60 = vld [vmem:[%s5522_s6 + $0x780] ss:$28 sps:$4 sm:$0xff]  }
 0x14e   : > { %3524 = vmatpush1.bf16.msra.mxu0 %v5091_v61  ;;  %v5894_v7 = vpop.f32.mrb[3].mxu1  ;;  %3439 = vmatprep.subr.bf16.mxu1 %v5096_v62  ;;  %v5168_v61 = vld [vmem:[%s5522_s6 + $0x88] ss:$28 sps:$4 sm:$0xff]   ;;  %v5171_v62 = vld [vmem:[%s5522_s6 + $0x7bc] ss:$28 sps:$4 sm:$0xff]  }
 0x14f   : > { %3525 = vmatprep.subr.bf16.mxu0 %v5099_v63  ;;  %v5172_v63 = vld [vmem:[%s5522_s6 + $0x280] ss:$28 sps:$4 sm:$0xff]  }
 0x151   : > { %3440 = vmatpush1.bf16.msra.mxu1 %v5094_v1  ;;  %v5169_v1 = vld [vmem:[%s5522_s6 + $0x7b8] ss:$28 sps:$4 sm:$0xff]  }
 0x152   : > { %3526 = vmatpush1.bf16.msra.mxu0 %v5097_v3  ;;  %3441 = vmatprep.subr.bf16.mxu1 %v5102_v5  ;;  %v5176_v3 = vld [vmem:[%s5522_s6 + $0x7f4] ss:$28 sps:$4 sm:$0xff]  }
 0x153   : > { %3527 = vmatprep.subr.bf16.mxu0 %v5105_v6  ;;  %v5177_v5 = vld [vmem:[%s5522_s6 + $0x2b8] ss:$28 sps:$4 sm:$0xff]   ;;  %v5174_v6 = vld [vmem:[%s5522_s6 + $0x7f0] ss:$28 sps:$4 sm:$0xff]  }
 0x155   : > { %3442 = vmatpush1.bf16.msra.mxu1 %v5100_v9  ;;  %v5178_v9 = vld [vmem:[%s5522_s6 + $0xf8] ss:$28 sps:$4 sm:$0xff]  }
 0x156   : > { %3528 = vmatpush1.bf16.msra.mxu0 %v5103_v10  ;;  %3443 = vmatprep.subr.bf16.mxu1 %v5108_v12  ;;  %v5181_v10 = vld [vmem:[%s5522_s6 + $0x82c] ss:$28 sps:$4 sm:$0xff]  }
 0x157   : > { %3529 = vmatprep.subr.bf16.mxu0 %v5111_v13  ;;  %v5182_v12 = vld [vmem:[%s5522_s6 + $0x2f0] ss:$28 sps:$4 sm:$0xff]   ;;  %v5179_v13 = vld [vmem:[%s5522_s6 + $0x828] ss:$28 sps:$4 sm:$0xff]  }
 0x159   : > { %3444 = vmatpush1.bf16.msra.mxu1 %v5106_v14  ;;  %v5183_v14 = vld [vmem:[%s5522_s6 + $0x130] ss:$28 sps:$4 sm:$0xff]  }
 0x15a   : > { %3530 = vmatpush1.bf16.msra.mxu0 %v5109_v15  ;;  %3445 = vmatprep.subr.bf16.mxu1 %v5114_v16  ;;  %v5186_v15 = vld [vmem:[%s5522_s6 + $0x864] ss:$28 sps:$4 sm:$0xff]  }
 0x15b   : > { %3531 = vmatprep.subr.bf16.mxu0 %v5117_v18  ;;  %v5187_v16 = vld [vmem:[%s5522_s6 + $0x328] ss:$28 sps:$4 sm:$0xff]   ;;  %v5184_v18 = vld [vmem:[%s5522_s6 + $0x860] ss:$28 sps:$4 sm:$0xff]  }
 0x15d   : > { %3446 = vmatpush1.bf16.msra.mxu1 %v5112_v19  ;;  %v5188_v19 = vld [vmem:[%s5522_s6 + $0x168] ss:$28 sps:$4 sm:$0xff]  }
 0x15e   : > { %3532 = vmatpush1.bf16.msra.mxu0 %v5115_v20  ;;  %3447 = vmatprep.subr.bf16.mxu1 %v5120_v21  ;;  %v5191_v20 = vld [vmem:[%s5522_s6 + $0x89c] ss:$28 sps:$4 sm:$0xff]  }
 0x15f   : > { %3533 = vmatprep.subr.bf16.mxu0 %v5123_v24  ;;  %v5192_v21 = vld [vmem:[%s5522_s6 + $0x360] ss:$28 sps:$4 sm:$0xff]   ;;  %v5189_v24 = vld [vmem:[%s5522_s6 + $0x898] ss:$28 sps:$4 sm:$0xff]  }
 0x161   : > { %3448 = vmatpush1.bf16.msra.mxu1 %v5118_v25  ;;  %v5193_v25 = vld [vmem:[%s5522_s6 + $0x1a0] ss:$28 sps:$4 sm:$0xff]  }
 0x162   : > { %3534 = vmatpush1.bf16.msra.mxu0 %v5121_v27  ;;  %3449 = vmatprep.subr.bf16.mxu1 %v5126_v28  ;;  %v5196_v27 = vld [vmem:[%s5522_s6 + $0x8d4] ss:$28 sps:$4 sm:$0xff]  }
 0x163   : > { %3535 = vmatprep.subr.bf16.mxu0 %v5129_v29  ;;  %v5197_v28 = vld [vmem:[%s5522_s6 + $0x558] ss:$28 sps:$4 sm:$0xff]   ;;  %v5194_v29 = vld [vmem:[%s5522_s6 + $0x8d0] ss:$28 sps:$4 sm:$0xff]  }
 0x165   : > { %3450 = vmatpush1.bf16.msra.mxu1 %v5124_v31  ;;  %v5198_v31 = vld [vmem:[%s5522_s6 + $0x398] ss:$28 sps:$4 sm:$0xff]  }
 0x166   : > { %3536 = vmatpush1.bf16.msra.mxu0 %v5127_v32  ;;  %3451 = vmatprep.subr.bf16.mxu1 %v5132_v33  ;;  %v5201_v32 = vld [vmem:[%s5522_s6 + $0x90c] ss:$28 sps:$4 sm:$0xff]  }
 0x167   : > { %3537 = vmatprep.subr.bf16.mxu0 %v5135_v34  ;;  %v5202_v33 = vld [vmem:[%s5522_s6 + $0x590] ss:$28 sps:$4 sm:$0xff]   ;;  %v5199_v34 = vld [vmem:[%s5522_s6 + $0x908] ss:$28 sps:$4 sm:$0xff]  }
 0x169   : > { %3452 = vmatpush1.bf16.msra.mxu1 %v5130_v35  ;;  %v5203_v35 = vld [vmem:[%s5522_s6 + $0x3d0] ss:$28 sps:$4 sm:$0xff]  }
 0x16a   : > { %3538 = vmatpush1.bf16.msra.mxu0 %v5133_v36  ;;  %3453 = vmatprep.subr.bf16.mxu1 %v5138_v22  ;;  %v5206_v36 = vld [vmem:[%s5522_s6 + $0x944] ss:$28 sps:$4 sm:$0xff]  }
 0x16b   : > { %3539 = vmatprep.subr.bf16.mxu0 %v5141_v23  ;;  %v5207_v22 = vld [vmem:[%s5522_s6 + $0x5c8] ss:$28 sps:$4 sm:$0xff]   ;;  %v5204_v23 = vld [vmem:[%s5522_s6 + $0x940] ss:$28 sps:$4 sm:$0xff]  }
 0x16d   : > { %3454 = vmatpush1.bf16.msra.mxu1 %v5136_v37  ;;  %v5211_v37 = vld [vmem:[%s5522_s6 + $0x97c] ss:$28 sps:$4 sm:$0xff]  }
 0x16e   : > { %3540 = vmatpush1.bf16.msra.mxu0 %v5139_v39  ;;  %3455 = vmatprep.subr.bf16.mxu1 %v5144_v40  ;;  %v5212_v39 = vld [vmem:[%s5522_s6 + $0x600] ss:$28 sps:$4 sm:$0xff]   ;;  %v5209_v40 = vld [vmem:[%s5522_s6 + $0x978] ss:$28 sps:$4 sm:$0xff]  }
 0x16f   : > { %3541 = vmatprep.subr.bf16.mxu0 %v5147_v41  ;;  %v5213_v41 = vld [vmem:[%s5522_s6 + $0x440] ss:$28 sps:$4 sm:$0xff]  }
 0x171   : > { %3456 = vmatpush1.bf16.msra.mxu1 %v5142_v42  ;;  %v5217_v42 = vld [vmem:[%s5522_s6 + $0x638] ss:$28 sps:$4 sm:$0xff]  }
 0x172   : > { %3542 = vmatpush1.bf16.msra.mxu0 %v5145_v43  ;;  %3457 = vmatprep.subr.bf16.mxu1 %v5150_v44  ;;  %v5214_v43 = vld [vmem:[%s5522_s6 + $0x9b0] ss:$28 sps:$4 sm:$0xff]   ;;  %v5218_v44 = vld [vmem:[%s5522_s6 + $0x478] ss:$28 sps:$4 sm:$0xff]  }
 0x173   : > { %3543 = vmatprep.subr.bf16.mxu0 %v5153_v45  ;;  %v5221_v45 = vld [vmem:[%s5522_s6 + $0x9ec] ss:$28 sps:$4 sm:$0xff]  }
 0x175   : > { %3458 = vmatpush1.bf16.msra.mxu1 %v5148_v46  ;;  %v5222_v46 = vld [vmem:[%s5522_s6 + $0x670] ss:$28 sps:$4 sm:$0xff]  }
 0x176   : > { %3544 = vmatpush1.bf16.msra.mxu0 %v5151_v47  ;;  %4489 = vmatprep.subr.bf16.mxu1 %v5157_v49  ;;  %v5219_v47 = vld [vmem:[%s5522_s6 + $0x9e8] ss:$28 sps:$4 sm:$0xff]  }
 0x177   : > { %3556 = vmatprep.subr.bf16.mxu0 %v5156_v48  ;;  %v5223_v48 = vld [vmem:[%s5522_s6 + $0x4b0] ss:$28 sps:$4 sm:$0xff]   ;;  %v5226_v49 = vld [vmem:[%s5522_s6 + $0xa24] ss:$28 sps:$4 sm:$0xff]  }
 0x178   : > { %3460 = vmatmul.mubr.bf16.vlgmr.msra.gmra.mrb[4].mxu1 %v5786_v30 }
 0x179   : > { %3546 = vmatmul.mubr.bf16.vlgmr.msra.gmra.mrb[4].mxu0 %v5616_v11  ;;  %4490 = vmatpush3.bf16.msra.mxu1 %v5158_v51  ;;  %v5224_v51 = vld [vmem:[%s5522_s6 + $0xa20] ss:$28 sps:$4 sm:$0xff]  }
 0x17a   : > { %3557 = vmatpush1.bf16.msra.mxu0 %v5154_v50  ;;  %4491 = vmatprep.subr.bf16.mxu1 %v5162_v55  ;;  %v5227_v50 = vld [vmem:[%s5522_s6 + $0x6a8] ss:$28 sps:$4 sm:$0xff]   ;;  %v5231_v55 = vld [vmem:[%s5522_s6 + $0xa5c] ss:$28 sps:$4 sm:$0xff]  }
 0x17b   : > { %3558 = vmatprep.subr.bf16.mxu0 %v5161_v52  ;;  %3674 = vmatprep.mubr.bf16.mxu1 %v5589_v53  ;;  %v5173_v53 = vld [vmem:[%s5522_s6 + $0xc0] ss:$28 sps:$4 sm:$0xff]   ;;  %v5228_v52 = vld [vmem:[%s5522_s6 + $0x4e8] ss:$28 sps:$4 sm:$0xff]  }
 0x17c   : > { %3588 = vmatprep.mubr.bf16.mxu0 %v5657_v38 }
 0x17d   : > { %4492 = vmatpush3.bf16.msra.mxu1 %v5163_v57  ;;  %v5229_v57 = vld [vmem:[%s5522_s6 + $0xa58] ss:$28 sps:$4 sm:$0xff]  }
 0x17e   : > { %3559 = vmatpush1.bf16.msra.mxu0 %v5159_v56  ;;  %4493 = vmatprep.subr.bf16.mxu1 %v5167_v59  ;;  %v5232_v56 = vld [vmem:[%s5522_s6 + $0x6e0] ss:$28 sps:$4 sm:$0xff]   ;;  %v5236_v59 = vld [vmem:[%s5522_s6 + $0xa94] ss:$28 sps:$4 sm:$0xff]  }
 0x17f   : > { %3560 = vmatprep.subr.bf16.mxu0 %v5166_v58  ;;  %v5233_v58 = vld [vmem:[%s5522_s6 + $0x520] ss:$28 sps:$4 sm:$0xff]  }
 0x181   : > { %4494 = vmatpush3.bf16.msra.mxu1 %v5168_v61  ;;  %v5234_v61 = vld [vmem:[%s5522_s6 + $0xa90] ss:$28 sps:$4 sm:$0xff]  }
 0x182   : > { %3561 = vmatpush1.bf16.msra.mxu0 %v5164_v60  ;;  %4495 = vmatprep.subr.bf16.mxu1 %v5172_v63  ;;  %v5237_v60 = vld [vmem:[%s5522_s6 + $0x8d8] ss:$28 sps:$4 sm:$0xff]   ;;  %v5241_v63 = vld [vmem:[%s5522_s6 + $0xacc] ss:$28 sps:$4 sm:$0xff]  }
 0x183   : > { %3562 = vmatprep.subr.bf16.mxu0 %v5171_v62  ;;  %v5238_v62 = vld [vmem:[%s5522_s6 + $0x718] ss:$28 sps:$4 sm:$0xff]  }
 0x185   : > { %4496 = vmatpush3.bf16.msra.mxu1 %v5173_v53  ;;  %v5239_v53 = vld [vmem:[%s5522_s6 + $0xac8] ss:$28 sps:$4 sm:$0xff]  }
 0x186   : > { %3563 = vmatpush1.bf16.msra.mxu0 %v5169_v1  ;;  %4497 = vmatprep.subr.bf16.mxu1 %v5177_v5  ;;  %v5242_v1 = vld [vmem:[%s5522_s6 + $0x910] ss:$28 sps:$4 sm:$0xff]   ;;  %v5246_v5 = vld [vmem:[%s5522_s6 + $0xb04] ss:$28 sps:$4 sm:$0xff]  }
 0x187   : > { %3564 = vmatprep.subr.bf16.mxu0 %v5176_v3  ;;  %v5243_v3 = vld [vmem:[%s5522_s6 + $0x750] ss:$28 sps:$4 sm:$0xff]  }
 0x189   : > { %4498 = vmatpush3.bf16.msra.mxu1 %v5178_v9  ;;  %v5248_v9 = vld [vmem:[%s5522_s6 + $0x788] ss:$28 sps:$4 sm:$0xff]  }
 0x18a   : > { %3565 = vmatpush1.bf16.msra.mxu0 %v5174_v6  ;;  %4499 = vmatprep.subr.bf16.mxu1 %v5182_v12  ;;  %v5247_v6 = vld [vmem:[%s5522_s6 + $0x948] ss:$28 sps:$4 sm:$0xff]   ;;  %v5252_v12 = vld [vmem:[%s5522_s6 + $0x980] ss:$28 sps:$4 sm:$0xff]  }
 0x18b   : > { %3566 = vmatprep.subr.bf16.mxu0 %v5181_v10  ;;  %v5251_v10 = vld [vmem:[%s5522_s6 + $0xb3c] ss:$28 sps:$4 sm:$0xff]  }
 0x18d   : > { %4500 = vmatpush3.bf16.msra.mxu1 %v5183_v14  ;;  %v5256_v14 = vld [vmem:[%s5522_s6 + $0xb74] ss:$28 sps:$4 sm:$0xff]  }
 0x18e   : > { %3567 = vmatpush1.bf16.msra.mxu0 %v5179_v13  ;;  %4501 = vmatprep.subr.bf16.mxu1 %v5187_v16  ;;  %v5253_v13 = vld [vmem:[%s5522_s6 + $0x7c0] ss:$28 sps:$4 sm:$0xff]   ;;  %v5254_v16 = vld [vmem:[%s5522_s6 + $0xb70] ss:$28 sps:$4 sm:$0xff]  }
 0x18f   : > { %3568 = vmatprep.subr.bf16.mxu0 %v5186_v15  ;;  %v5257_v15 = vld [vmem:[%s5522_s6 + $0x9b8] ss:$28 sps:$4 sm:$0xff]  }
 0x191   : > { %4502 = vmatpush3.bf16.msra.mxu1 %v5188_v19  ;;  %v5261_v19 = vld [vmem:[%s5522_s6 + $0xbac] ss:$28 sps:$4 sm:$0xff]  }
 0x192   : > { %3569 = vmatpush1.bf16.msra.mxu0 %v5184_v18  ;;  %4503 = vmatprep.subr.bf16.mxu1 %v5192_v21  ;;  %v5258_v18 = vld [vmem:[%s5522_s6 + $0x7f8] ss:$28 sps:$4 sm:$0xff]   ;;  %v5259_v21 = vld [vmem:[%s5522_s6 + $0xba8] ss:$28 sps:$4 sm:$0xff]  }
 0x193   : > { %3570 = vmatprep.subr.bf16.mxu0 %v5191_v20  ;;  %v5262_v20 = vld [vmem:[%s5522_s6 + $0x9f0] ss:$28 sps:$4 sm:$0xff]  }
 0x195   : > { %4504 = vmatpush3.bf16.msra.mxu1 %v5193_v25  ;;  %v5266_v25 = vld [vmem:[%s5522_s6 + $0xbe4] ss:$28 sps:$4 sm:$0xff]  }
 0x196   : > { %3571 = vmatpush1.bf16.msra.mxu0 %v5189_v24  ;;  %4511 = vmatprep.subr.bf16.mxu1 %v5197_v28  ;;  %v5263_v24 = vld [vmem:[%s5522_s6 + $0x830] ss:$28 sps:$4 sm:$0xff]  }
 0x197   : > { %3572 = vmatprep.subr.bf16.mxu0 %v5196_v27  ;;  %v5267_v27 = vld [vmem:[%s5522_s6 + $0xa28] ss:$28 sps:$4 sm:$0xff]  }
 0x198   : > { %3675 = vmatmul.mubr.bf16.vlgmr.msra.gmra.mrb[8].mxu1 %v5612_v8  ;;  %v5208_v8 = vld [vmem:[%s5522_s6 + $0x408] ss:$28 sps:$4 sm:$0xff]  }
 0x199   : > { %4512 = vmatpush3.bf16.msra.mxu1 %v5198_v31  ;;  %3715 = vmatprep.mubr.bf16.mxu1 %v5591_v54  ;;  %v5216_v54 = vld [vmem:[%s5522_s6 + $0x9b4] ss:$28 sps:$4 sm:$0xff]  }
 0x19a   : > { %3573 = vmatpush1.bf16.msra.mxu0 %v5194_v29  ;;  %4513 = vmatprep.subr.bf16.mxu1 %v5202_v33 }
 0x19b   : > { %3574 = vmatprep.subr.bf16.mxu0 %v5201_v32 }
 0x19d   : > { %4514 = vmatpush3.bf16.msra.mxu1 %v5203_v35  ;;  %v5268_v35 = vld [vmem:[%s5522_s6 + $0x868] ss:$28 sps:$4 sm:$0xff]  }
 0x19e   : > { %3575 = vmatpush1.bf16.msra.mxu0 %v5199_v34  ;;  %4515 = vmatprep.subr.bf16.mxu1 %v5207_v22  ;;  %v5264_v34 = vld [vmem:[%s5522_s6 + $0xbe0] ss:$28 sps:$4 sm:$0xff]  }
 0x19f   : > { %3576 = vmatprep.subr.bf16.mxu0 %v5206_v36  ;;  %v5272_v22 = vld [vmem:[%s5522_s6 + $0xa60] ss:$28 sps:$4 sm:$0xff]  }
 0x1a1   : > { %4516 = vmatpush3.bf16.msra.mxu1 %v5208_v8  ;;  %v5269_v8 = vld [vmem:[%s5522_s6 + $0xc18] ss:$28 sps:$4 sm:$0xff]  }
 0x1a2   : > { %3577 = vmatpush1.bf16.msra.mxu0 %v5204_v23  ;;  %4517 = vmatprep.subr.bf16.mxu1 %v5212_v39  ;;  %v5277_v39 = vld [vmem:[%s5522_s6 + $0xc58] ss:$28 sps:$4 sm:$0xff]  }
 0x1a3   : > { %3578 = vmatprep.subr.bf16.mxu0 %v5211_v37  ;;  %v5276_v37 = vld [vmem:[%s5522_s6 + $0xc54] ss:$28 sps:$4 sm:$0xff]  }
 0x1a5   : > { %4518 = vmatpush3.bf16.msra.mxu1 %v5213_v41  ;;  %v5281_v41 = vld [vmem:[%s5522_s6 + $0xc8c] ss:$28 sps:$4 sm:$0xff]  }
 0x1a6   : > { %3579 = vmatpush1.bf16.msra.mxu0 %v5209_v40  ;;  %4519 = vmatprep.subr.bf16.mxu1 %v5217_v42  ;;  %v5274_v40 = vld [vmem:[%s5522_s6 + $0xc50] ss:$28 sps:$4 sm:$0xff]   ;;  %v5279_v42 = vld [vmem:[%s5522_s6 + $0xc88] ss:$28 sps:$4 sm:$0xff]  }
 0x1a7   : > { %3580 = vmatprep.subr.bf16.mxu0 %v5216_v54  ;;  %v5282_v54 = vld [vmem:[%s5522_s6 + $0xc90] ss:$28 sps:$4 sm:$0xff]  }
 0x1a9   : > { %4520 = vmatpush3.bf16.msra.mxu1 %v5218_v44  ;;  %v5286_v44 = vld [vmem:[%s5522_s6 + $0xcc4] ss:$28 sps:$4 sm:$0xff]  }
 0x1aa   : > { %3581 = vmatpush1.bf16.msra.mxu0 %v5214_v43  ;;  %4521 = vmatprep.subr.bf16.mxu1 %v5222_v46  ;;  %v5283_v43 = vld [vmem:[%s5522_s6 + $0xad0] ss:$28 sps:$4 sm:$0xff]   ;;  %v5284_v46 = vld [vmem:[%s5522_s6 + $0xcc0] ss:$28 sps:$4 sm:$0xff]  }
 0x1ab   : > { %3582 = vmatprep.subr.bf16.mxu0 %v5221_v45  ;;  %v5287_v45 = vld [vmem:[%s5522_s6 + $0xcc8] ss:$28 sps:$4 sm:$0xff]  }
 0x1ad   : > { %4522 = vmatpush3.bf16.msra.mxu1 %v5223_v48  ;;  %v5292_v48 = vld [vmem:[%s5522_s6 + $0xd00] ss:$28 sps:$4 sm:$0xff]  }
 0x1ae   : > { %3583 = vmatpush1.bf16.msra.mxu0 %v5219_v47  ;;  %4523 = vmatprep.subr.bf16.mxu1 %v5227_v50  ;;  %v5291_v47 = vld [vmem:[%s5522_s6 + $0xcfc] ss:$28 sps:$4 sm:$0xff]  }
 0x1af   : > { %3584 = vmatprep.subr.bf16.mxu0 %v5226_v49  ;;  %v5289_v49 = vld [vmem:[%s5522_s6 + $0xcf8] ss:$28 sps:$4 sm:$0xff]   ;;  %v5293_v50 = vld [vmem:[%s5522_s6 + $0xb40] ss:$28 sps:$4 sm:$0xff]  }
 0x1b1   : > { %4524 = vmatpush3.bf16.msra.mxu1 %v5228_v52  ;;  %v5294_v52 = vld [vmem:[%s5522_s6 + $0xd30] ss:$28 sps:$4 sm:$0xff]  }
 0x1b2   : > { %3585 = vmatpush1.bf16.msra.mxu0 %v5224_v51  ;;  %4525 = vmatprep.subr.bf16.mxu1 %v5232_v56  ;;  %v5297_v51 = vld [vmem:[%s5522_s6 + $0xd38] ss:$28 sps:$4 sm:$0xff]   ;;  %v5301_v56 = vld [vmem:[%s5522_s6 + $0xd6c] ss:$28 sps:$4 sm:$0xff]  }
 0x1b3   : > { %3586 = vmatprep.subr.bf16.mxu0 %v5231_v55  ;;  %v5298_v55 = vld [vmem:[%s5522_s6 + $0xb78] ss:$28 sps:$4 sm:$0xff]  }
 0x1b5   : > { %4526 = vmatpush3.bf16.msra.mxu1 %v5233_v58  ;;  %v5299_v58 = vld [vmem:[%s5522_s6 + $0xd68] ss:$28 sps:$4 sm:$0xff]  }
 0x1b6   : > { %3587 = vmatpush1.bf16.msra.mxu0 %v5229_v57  ;;  %4533 = vmatprep.subr.bf16.mxu1 %v5237_v60  ;;  %v5302_v57 = vld [vmem:[%s5522_s6 + $0xd70] ss:$28 sps:$4 sm:$0xff]   ;;  %v5306_v60 = vld [vmem:[%s5522_s6 + $0xda4] ss:$28 sps:$4 sm:$0xff]  }
 0x1b7   : > { %3599 = vmatprep.subr.bf16.mxu0 %v5236_v59  ;;  %v5303_v59 = vld [vmem:[%s5522_s6 + $0xbb0] ss:$28 sps:$4 sm:$0xff]  }
 0x1b8   : > { %3716 = vmatmul.mubr.bf16.vlgmr.msra.gmra.mrb[12].mxu1 %v5616_v11  ;;  %v5244_v11 = vld [vmem:[%s5522_s6 + $0xb00] ss:$28 sps:$4 sm:$0xff]  }
 0x1b9   : > { %3589 = vmatmul.mubr.bf16.vlgmr.msra.gmra.mrb[4].mxu0 %v5700_v17  ;;  %4534 = vmatpush3.bf16.msra.mxu1 %v5238_v62  ;;  %v5304_v62 = vld [vmem:[%s5522_s6 + $0xda0] ss:$28 sps:$4 sm:$0xff]  }
 0x1ba   : > { %3600 = vmatpush1.bf16.msra.mxu0 %v5234_v61  ;;  %4535 = vmatprep.subr.bf16.mxu1 %v5242_v1  ;;  %v5307_v61 = vld [vmem:[%s5522_s6 + $0xda8] ss:$28 sps:$4 sm:$0xff]   ;;  %v5311_v1 = vld [vmem:[%s5522_s6 + $0xddc] ss:$28 sps:$4 sm:$0xff]  }
 0x1bb   : > { %3601 = vmatprep.subr.bf16.mxu0 %v5241_v63  ;;  %3756 = vmatprep.mubr.bf16.mxu1 %v5657_v38  ;;  %v5249_v38 = vld [vmem:[%s5522_s6 + $0xb38] ss:$28 sps:$4 sm:$0xff]   ;;  %v5308_v63 = vld [vmem:[%s5522_s6 + $0xbe8] ss:$28 sps:$4 sm:$0xff]  }
 0x1bc   : > { %3631 = vmatprep.mubr.bf16.mxu0 %v5722_v26 }
 0x1bd   : > { %4536 = vmatpush3.bf16.msra.mxu1 %v5243_v3  ;;  %v5309_v3 = vld [vmem:[%s5522_s6 + $0xdd8] ss:$28 sps:$4 sm:$0xff]  }
 0x1be   : > { %3602 = vmatpush1.bf16.msra.mxu0 %v5239_v53  ;;  %4537 = vmatprep.subr.bf16.mxu1 %v5247_v6  ;;  %v5312_v53 = vld [vmem:[%s5522_s6 + $0xde0] ss:$28 sps:$4 sm:$0xff]  }
 0x1bf   : > { %3603 = vmatprep.subr.bf16.mxu0 %v5246_v5  ;;  %v5313_v5 = vld [vmem:[%s5522_s6 + $0xc20] ss:$28 sps:$4 sm:$0xff]  }
 0x1c1   : > { %4538 = vmatpush3.bf16.msra.mxu1 %v5248_v9 }
 0x1c2   : > { %3604 = vmatpush1.bf16.msra.mxu0 %v5244_v11  ;;  %4539 = vmatprep.subr.bf16.mxu1 %v5252_v12 }
 0x1c3   : > { %3605 = vmatprep.subr.bf16.mxu0 %v5251_v10 }
 0x1c5   : > { %4540 = vmatpush3.bf16.msra.mxu1 %v5253_v13 }
 0x1c6   : > { %3606 = vmatpush1.bf16.msra.mxu0 %v5249_v38  ;;  %4541 = vmatprep.subr.bf16.mxu1 %v5257_v15 }
 0x1c7   : > { %3607 = vmatprep.subr.bf16.mxu0 %v5256_v14 }
 0x1c9   : > { %4542 = vmatpush3.bf16.msra.mxu1 %v5258_v18 }
 0x1ca   : > { %3608 = vmatpush1.bf16.msra.mxu0 %v5254_v16  ;;  %4543 = vmatprep.subr.bf16.mxu1 %v5262_v20 }
 0x1cb   : > { %3609 = vmatprep.subr.bf16.mxu0 %v5261_v19 }
 0x1cc   : > { %v3289_v28 = vpop.f32.mrb[0].mxu0 }
 0x1cd   : > { %v4577_v29 = vadd.f32 %v3289_v28, %v5884_v0  ;;  %v3291_v31 = vpop.f32.mrb[1].mxu0  ;;  %4544 = vmatpush3.bf16.msra.mxu1 %v5263_v24 }
 0x1ce   : > { %v4578_v32 = vadd.f32 %v3291_v31, %v5887_v2  ;;  %v3293_v33 = vpop.f32.mrb[2].mxu0  ;;  %3610 = vmatpush1.bf16.msra.mxu0 %v5259_v21  ;;  %4545 = vmatprep.subr.bf16.mxu1 %v5267_v27  ;;  %v5271_v2 = vld [vmem:[%s5522_s6 + $0xc1c] ss:$28 sps:$4 sm:$0xff]  }
 0x1cf   : > { %3851 = vst [vmem:[%s6035_s27] sm:$0xff] %v4577_v29  ;;  %v4579_v36 = vadd.f32 %v3293_v33, %v5890_v4  ;;  %v3295_v0 = vpop.f32.mrb[3].mxu0  ;;  %3611 = vmatprep.subr.bf16.mxu0 %v5266_v25  ;;  %v5273_v4 = vld [vmem:[%s5522_s6 + $0x8a0] ss:$28 sps:$4 sm:$0xff]  }
 0x1d0   : > { %3852 = vst [vmem:[%s6035_s27 + $0x8] sm:$0xff] %v4578_v32  ;;  %v4580_v23 = vadd.f32 %v3295_v0, %v5894_v7  ;;  %v5278_v7 = vld [vmem:[%s5522_s6 + $0xa98] ss:$28 sps:$4 sm:$0xff]  }
 0x1d1   : > { %3858 = vst [vmem:[%s6035_s27 + $0x38] sm:$0xff] %v4579_v36  ;;  %4546 = vmatpush3.bf16.msra.mxu1 %v5268_v35 }
 0x1d2   : > { %3859 = vst [vmem:[%s6035_s27 + $0x40] sm:$0xff] %v4580_v23  ;;  %3612 = vmatpush1.bf16.msra.mxu0 %v5264_v34  ;;  %4547 = vmatprep.subr.bf16.mxu1 %v5272_v22 }
 0x1d3   : > { %3613 = vmatprep.subr.bf16.mxu0 %v5271_v2 }
 0x1d5   : > { %4548 = vmatpush3.bf16.msra.mxu1 %v5273_v4 }
 0x1d6   : > { %3614 = vmatpush1.bf16.msra.mxu0 %v5269_v8  ;;  %4555 = vmatprep.subr.bf16.mxu1 %v5277_v39 }
 0x1d7   : > { %3615 = vmatprep.subr.bf16.mxu0 %v5276_v37 }
 0x1d8   : > { %3757 = vmatmul.mubr.bf16.vlgmr.msra.gmra.mrb[16].mxu1 %v5700_v17  ;;  %v5288_v17 = vld [vmem:[%s5522_s6 + $0xb08] ss:$28 sps:$4 sm:$0xff]  }
 0x1d9   : > { %4556 = vmatpush3.bf16.msra.mxu1 %v5278_v7  ;;  %3797 = vmatprep.mubr.bf16.mxu1 %v5722_v26  ;;  %v5296_v26 = vld [vmem:[%s5522_s6 + $0xd34] ss:$28 sps:$4 sm:$0xff]  }
 0x1da   : > { %3616 = vmatpush1.bf16.msra.mxu0 %v5274_v40  ;;  %4557 = vmatprep.subr.bf16.mxu1 %v5282_v54 }
 0x1db   : > { %3617 = vmatprep.subr.bf16.mxu0 %v5281_v41 }
 0x1dd   : > { %4558 = vmatpush3.bf16.msra.mxu1 %v5283_v43  ;;  %v3892_v43 = vld [vmem:[%s6035_s27 + $0x8] sm:$0xff] (%p6139_p8) }
 0x1de   : > { %3618 = vmatpush1.bf16.msra.mxu0 %v5279_v42  ;;  %4559 = vmatprep.subr.bf16.mxu1 %v5287_v45  ;;  %v3890_v42 = vld [vmem:[%s6035_s27] sm:$0xff] (%p6139_p8)  ;;  %3893 = vst [vmem:[%s3877_s20 + $0x8] sm:$0xff] (%p6139_p8), %v3892_v43 }
 0x1df   : > { %3619 = vmatprep.subr.bf16.mxu0 %v5286_v44  ;;  %3891 = vst [vmem:[%s3877_s20] sm:$0xff] (%p6139_p8), %v3890_v42 }
 0x1e1   : > { %4560 = vmatpush3.bf16.msra.mxu1 %v5288_v17 }
 0x1e2   : > { %3620 = vmatpush1.bf16.msra.mxu0 %v5284_v46  ;;  %4561 = vmatprep.subr.bf16.mxu1 %v5292_v48  ;;  %v3904_v48 = vld [vmem:[%s6035_s27 + $0x38] sm:$0xff] (%p6139_p8) }
 0x1e3   : > { %3621 = vmatprep.subr.bf16.mxu0 %v5291_v47  ;;  %3905 = vst [vmem:[%s3877_s20 + $0x188] sm:$0xff] (%p6139_p8), %v3904_v48 }
 0x1e5   : > { %4562 = vmatpush3.bf16.msra.mxu1 %v5293_v50 }
 0x1e6   : > { %3622 = vmatpush1.bf16.msra.mxu0 %v5289_v49  ;;  %4563 = vmatprep.subr.bf16.mxu1 %v5297_v51  ;;  %v3906_v49 = vld [vmem:[%s6035_s27 + $0x40] sm:$0xff] (%p6139_p8) }
 0x1e7   : > { %3623 = vmatprep.subr.bf16.mxu0 %v5296_v26  ;;  %3907 = vst [vmem:[%s3877_s20 + $0x190] sm:$0xff] (%p6139_p8), %v3906_v49 }
 0x1e9   : > { %4564 = vmatpush3.bf16.msra.mxu1 %v5298_v55 }
 0x1ea   : > { %3624 = vmatpush1.bf16.msra.mxu0 %v5294_v52  ;;  %4565 = vmatprep.subr.bf16.mxu1 %v5302_v57 }
 0x1eb   : > { %3625 = vmatprep.subr.bf16.mxu0 %v5301_v56 }
 0x1ed   : > { %4566 = vmatpush3.bf16.msra.mxu1 %v5303_v59 }
 0x1ee   : > { %3626 = vmatpush1.bf16.msra.mxu0 %v5299_v58  ;;  %4567 = vmatprep.subr.bf16.mxu1 %v5307_v61 }
 0x1ef   : > { %3627 = vmatprep.subr.bf16.mxu0 %v5306_v60 }
 0x1f1   : > { %4568 = vmatpush3.bf16.msra.mxu1 %v5308_v63 }
 0x1f2   : > { %3628 = vmatpush1.bf16.msra.mxu0 %v5304_v62  ;;  %4569 = vmatprep.subr.bf16.mxu1 %v5312_v53 }
 0x1f3   : > { %3629 = vmatprep.subr.bf16.mxu0 %v5311_v1 }
 0x1f5   : > { %4570 = vmatpush3.bf16.msra.mxu1 %v5313_v5 }
 0x1f6   : > { %3630 = vmatpush1.bf16.msra.mxu0 %v5309_v3 }
 0x1f8   : > { %3798 = vmatmul.mubr.bf16.vlgmr.msra.gmra.mrb[20].mxu1 %v5786_v30 }
 0x1f9   : > { %3632 = vmatmul.mubr.bf16.vlgmr.msra.gmra.mrb[4].mxu0 %v5786_v30 }
 0x24b   : > { %v3461_v6 = vpop.f32.mrb[4].mxu1 }
 0x24c   : > { %3853 = vst [vmem:[%s6035_s27 + $0x10] sm:$0xff] %v3461_v6  ;;  %v3463_v11 = vpop.f32.mrb[5].mxu1 }
 0x24d   : > { %3854 = vst [vmem:[%s6035_s27 + $0x18] sm:$0xff] %v3463_v11  ;;  %v3465_v9 = vpop.f32.mrb[6].mxu1 }
 0x24e   : > { %3860 = vst [vmem:[%s6035_s27 + $0x48] sm:$0xff] %v3465_v9  ;;  %v3467_v10 = vpop.f32.mrb[7].mxu1 }
 0x24f   : > { %3861 = vst [vmem:[%s6035_s27 + $0x50] sm:$0xff] %v3467_v10 }
 0x253   : > { %v3894_v44 = vld [vmem:[%s6035_s27 + $0x10] sm:$0xff] (%p6139_p8) }
 0x254   : > { %v3896_v45 = vld [vmem:[%s6035_s27 + $0x18] sm:$0xff] (%p6139_p8)  ;;  %3895 = vst [vmem:[%s3877_s20 + $0x10] sm:$0xff] (%p6139_p8), %v3894_v44 }
 0x255   : > { %3897 = vst [vmem:[%s3877_s20 + $0x18] sm:$0xff] (%p6139_p8), %v3896_v45  ;;  %v3908_v50 = vld [vmem:[%s6035_s27 + $0x48] sm:$0xff] (%p6139_p8) }
 0x256   : > { %v3910_v26 = vld [vmem:[%s6035_s27 + $0x50] sm:$0xff] (%p6139_p8)  ;;  %3909 = vst [vmem:[%s3877_s20 + $0x198] sm:$0xff] (%p6139_p8), %v3908_v50 }
 0x257   : > { %3911 = vst [vmem:[%s3877_s20 + $0x1a0] sm:$0xff] (%p6139_p8), %v3910_v26 }
 0x26b   : > { %v4505_v12 = vpop.f32.mrb[8].mxu1 }
 0x26c   : > { %v4506_v38 = vpop.f32.mrb[9].mxu1 }
 0x26d   : > { %v4507_v13 = vadd.f32 %v4506_v38, %v4505_v12  ;;  %v4508_v14 = vpop.f32.mrb[10].mxu1 }
 0x26e   : > { %v4509_v15 = vpop.f32.mrb[11].mxu1 }
 0x26f   : > { %v4510_v16 = vadd.f32 %v4509_v15, %v4508_v14 }
 0x28b   : > { %v4527_v18 = vpop.f32.mrb[12].mxu1 }
 0x28c   : > { %v4528_v19 = vpop.f32.mrb[13].mxu1 }
 0x28d   : > { %v4529_v20 = vadd.f32 %v4528_v19, %v4527_v18  ;;  %v4530_v21 = vpop.f32.mrb[14].mxu1 }
 0x28e   : > { %v4531_v30 = vpop.f32.mrb[15].mxu1 }
 0x28f   : > { %v3718_v24 = vadd.f32 %v4529_v20, %v4507_v13  ;;  %v4532_v25 = vadd.f32 %v4531_v30, %v4530_v21 }
 0x291   : > { %v3721_v27 = vadd.f32 %v4532_v25, %v4510_v16 }
 0x2ab   : > { %v4549_v28 = vpop.f32.mrb[16].mxu1 }
 0x2ac   : > { %v4550_v29 = vpop.f32.mrb[17].mxu1 }
 0x2ad   : > { %v4551_v31 = vadd.f32 %v4550_v29, %v4549_v28  ;;  %v4552_v32 = vpop.f32.mrb[18].mxu1 }
 0x2ae   : > { %v4553_v33 = vpop.f32.mrb[19].mxu1 }
 0x2af   : > { %v3759_v34 = vadd.f32 %v4551_v31, %v3718_v24  ;;  %v4554_v35 = vadd.f32 %v4553_v33, %v4552_v32 }
 0x2b1   : > { %v3762_v36 = vadd.f32 %v4554_v35, %v3721_v27 }
 0x2cb   : > { %v4571_v2 = vpop.f32.mrb[20].mxu1 }
 0x2cc   : > { %v3633_v0 = vpop.f32.mrb[4].mxu0  ;;  %v4572_v23 = vpop.f32.mrb[21].mxu1 }
 0x2cd   : > { %3855 = vst [vmem:[%s6035_s27 + $0x20] sm:$0xff] %v3633_v0  ;;  %v3635_v22 = vpop.f32.mrb[5].mxu0  ;;  %v4573_v8 = vadd.f32 %v4572_v23, %v4571_v2  ;;  %v4574_v37 = vpop.f32.mrb[22].mxu1  ;;  %3871 = sbr.rel (!%p6139_p8) target bundleno = 732 (0x2dc), region = 44 }
 0x2ce   : > { %3856 = vst [vmem:[%s6035_s27 + $0x28] sm:$0xff] %v3635_v22  ;;  %v3637_v4 = vpop.f32.mrb[6].mxu0  ;;  %v4575_v40 = vpop.f32.mrb[23].mxu1 }
 0x2cf   : > { %3862 = vst [vmem:[%s6035_s27 + $0x58] sm:$0xff] %v3637_v4  ;;  %v3639_v39 = vpop.f32.mrb[7].mxu0  ;;  %v3800_v7 = vadd.f32 %v4573_v8, %v3759_v34  ;;  %v4576_v41 = vadd.f32 %v4575_v40, %v4574_v37 }
 0x2d0   : > { %3863 = vst [vmem:[%s6035_s27 + $0x60] sm:$0xff] %v3639_v39 }
 0x2d1   : > { %3857 = vst [vmem:[%s6035_s27 + $0x30] sm:$0xff] %v3800_v7  ;;  %v3803_v54 = vadd.f32 %v4576_v41, %v3762_v36 }
 0x2d3   : > { %3864 = vst [vmem:[%s6035_s27 + $0x68] sm:$0xff] %v3803_v54 }
 0x2d4   : > { %v3898_v46 = vld [vmem:[%s6035_s27 + $0x20] sm:$0xff] }
 0x2d5   : > { %v3900_v17 = vld [vmem:[%s6035_s27 + $0x28] sm:$0xff]  ;;  %3899 = vst [vmem:[%s3877_s20 + $0x20] sm:$0xff] %v3898_v46 }
 0x2d6   : > { %3901 = vst [vmem:[%s3877_s20 + $0x28] sm:$0xff] %v3900_v17  ;;  %v3912_v51 = vld [vmem:[%s6035_s27 + $0x58] sm:$0xff] }
 0x2d7   : > { %3913 = vst [vmem:[%s3877_s20 + $0x1a8] sm:$0xff] %v3912_v51  ;;  %v3914_v52 = vld [vmem:[%s6035_s27 + $0x60] sm:$0xff] }
 0x2d8   : > { %v3902_v47 = vld [vmem:[%s6035_s27 + $0x30] sm:$0xff]  ;;  %3915 = vst [vmem:[%s3877_s20 + $0x1b0] sm:$0xff] %v3914_v52 }
 0x2d9   : > { %3903 = vst [vmem:[%s3877_s20 + $0x30] sm:$0xff] %v3902_v47 }
 0x2da   : > { %v3916_v55 = vld [vmem:[%s6035_s27 + $0x68] sm:$0xff] }
 0x2db   : > { %3917 = vst [vmem:[%s3877_s20 + $0x1b8] sm:$0xff] %v3916_v55 }
 0x2dc PF: > { %s15_s14 = sadd.s32 1, %s5394_s14   ;;  %s6140_s9 = smov %s5378_s10 }
 0x2dd   : > { %p12_p9 = scmp.ge.s32.totalorder %s15_s14, 9   ;;  %s6141_s10 = smov %s5382_s11 }
 0x2de   : > { %s6142_s11 = smov %s5463_s21  ;;  %s6143_s12 = smov %s5390_s13 }
 0x2df   : > { %s6144_s13 = smov %s6146_s16  ;;  %14 = sbr.rel (!%p12_p9) target bundleno = 4 (0x4), region = 102 }
 0x2e6   :  { %3933 = vsyncpa [#allocation4], 1 }
 0x2e7   :  { %3935 = vsyncpa [#allocation4 + $0x1], 1 }

// kernel: g_forward.4
= control target key start
LH: loop header
LB: loop body
LE: loop exit
PB: predicated region body
PF: predicated region fallthrough
CT: control target
= control target key end

     0   :  { %s3231_s9 = smov 0   ;;  %s3233_s10 = smov 0   ;;  %s3974_s0 = inlined_call_operand.vmem [shape: bf16[112,1152], index: 0, kind: input, shape index: {}]   ;;  %s3975_s1 = inlined_call_operand.vmem [shape: bf16[1152,256], index: 1, kind: input, shape index: {}]   ;;  %s3976_s2 = inlined_call_operand.vmem [shape: f32[112,256], index: 2, kind: output, shape index: {}]  }
   0x1   :  { %s3235_s11 = smov 0   ;;  %s3237_s12 = smov 0  }
   0x2   :  { %s3239_s13 = smov 0  }
   0x3 LB: > { %s27_s14 = sadd.s32 1, %s3208_s12  ;;  %s2514_s15 = sadd.s32 4294967295, %s3212_s13   ;;  %s3212_s13 = sphi %s3239_s13, %s12_s13   ;;  %s3208_s12 = sphi %s3237_s12, %s3981_s12   ;;  %s3204_s11 = sphi %s3235_s11, %s3980_s11   ;;  %s3200_s10 = sphi %s3233_s10, %s3979_s10   ;;  %s3196_s9 = sphi %s3231_s9, %s3978_s9  }
   0x4   : > { %p29_p0 = scmp.ge.s32.totalorder %s27_s14, 2  ;;  %p75_p1 = scmp.ne.s32.totalorder %s3200_s10, %s3196_s9 }
   0x5   : > { %p76_p2 = scmp.eq.s32.totalorder %s3212_s13, 0  ;;  %p107_p4 = scmp.eq.s32.totalorder %s2514_s15, 1 }
   0x6   : > { %s3983_s14 = smov (%p29_p0, %s27_s14), 0  ;;  %s68_s17 = sadd.s32 1, %s3200_s10 }
   0x7   : > { %p77_p3 = por %p76_p2, %p75_p1  ;;  %s64_s16 = ssub.s32 %s3208_s12, %s3983_s14 }
   0x8   : > { %p66_p5 = scmp.eq.s32.totalorder %s64_s16, 0  ;;  %p3266_p6 = por %p107_p4, %p75_p1 }
   0x9   : > { %p2518_p7 = scmp.ge.s32.totalorder %s3212_s13, 2 }
   0xa   : > { %s3271_s19 = scalar_select %p66_p5, %s3200_s10, %s68_s17  }
   0xb   : > { %144 = sbr.rel (%p2518_p7) target bundleno = 118 (0x76), region = 20 }
  0x12   : > { %147 = sbr.rel (!%p77_p3) target bundleno = 118 (0x76), region = 24  ;;  %s149_s20 = sand.u32 (%p77_p3), 1, %s3200_s10  }
  0x13   : > { %s2519_s21 = sshll.u32 (%p77_p3), %s3208_s12, 2  ;;  %s2966_s22 = smul.u32 (%p77_p3), 576, %s149_s20 }
  0x14   : > { %s3279_s25 = scalar_lea.vmem (%p77_p3), %s3975_s1, %s2519_s21 }
  0x15   : > { %v172_v0 = vld [vmem:[%s3279_s25] sm:$0xf] (%p77_p3)  ;;  %v174_v1 = vld [vmem:[%s3279_s25 + $0x8] sm:$0xf] (%p77_p3)  ;;  %v176_v2 = vld [vmem:[%s3279_s25 + $0x10] sm:$0xf] (%p77_p3) }
  0x16   : > { %v178_v3 = vld [vmem:[%s3279_s25 + $0x18] sm:$0xf] (%p77_p3)  ;;  %v180_v4 = vld [vmem:[%s3279_s25 + $0x20] sm:$0xf] (%p77_p3)  ;;  %s3286_s26 = scalar_lea.vmem (%p77_p3), [#allocation3], %s2966_s22 }
  0x17   : > { %173 = vst [vmem:[%s3286_s26] sm:$0xf] (%p77_p3), %v172_v0  ;;  %175 = vst [vmem:[%s3286_s26 + $0x4] sm:$0xf] (%p77_p3), %v174_v1  ;;  %v182_v5 = vld [vmem:[%s3279_s25 + $0x28] sm:$0xf] (%p77_p3) }
  0x18   : > { %177 = vst [vmem:[%s3286_s26 + $0x8] sm:$0xf] (%p77_p3), %v176_v2  ;;  %179 = vst [vmem:[%s3286_s26 + $0xc] sm:$0xf] (%p77_p3), %v178_v3  ;;  %v184_v6 = vld [vmem:[%s3279_s25 + $0x30] sm:$0xf] (%p77_p3) }
  0x19   : > { %181 = vst [vmem:[%s3286_s26 + $0x10] sm:$0xf] %v180_v4  ;;  %v186_v7 = vld [vmem:[%s3279_s25 + $0x38] sm:$0xf]  ;;  %183 = vst [vmem:[%s3286_s26 + $0x14] sm:$0xf] %v182_v5 }
  0x1a   : > { %185 = vst [vmem:[%s3286_s26 + $0x18] sm:$0xf] %v184_v6  ;;  %187 = vst [vmem:[%s3286_s26 + $0x1c] sm:$0xf] %v186_v7  ;;  %v188_v8 = vld [vmem:[%s3279_s25 + $0x40] sm:$0xf] }
  0x1b   : > { %v190_v9 = vld [vmem:[%s3279_s25 + $0x48] sm:$0xf]  ;;  %v192_v10 = vld [vmem:[%s3279_s25 + $0x50] sm:$0xf]  ;;  %189 = vst [vmem:[%s3286_s26 + $0x20] sm:$0xf] %v188_v8 }
  0x1c   : > { %191 = vst [vmem:[%s3286_s26 + $0x24] sm:$0xf] %v190_v9  ;;  %193 = vst [vmem:[%s3286_s26 + $0x28] sm:$0xf] %v192_v10  ;;  %v194_v11 = vld [vmem:[%s3279_s25 + $0x58] sm:$0xf] }
  0x1d   : > { %v196_v12 = vld [vmem:[%s3279_s25 + $0x60] sm:$0xf]  ;;  %v198_v13 = vld [vmem:[%s3279_s25 + $0x68] sm:$0xf]  ;;  %195 = vst [vmem:[%s3286_s26 + $0x2c] sm:$0xf] %v194_v11 }
  0x1e   : > { %197 = vst [vmem:[%s3286_s26 + $0x30] sm:$0xf] %v196_v12  ;;  %199 = vst [vmem:[%s3286_s26 + $0x34] sm:$0xf] %v198_v13  ;;  %v200_v14 = vld [vmem:[%s3279_s25 + $0x70] sm:$0xf] }
  0x1f   : > { %v202_v15 = vld [vmem:[%s3279_s25 + $0x78] sm:$0xf]  ;;  %v204_v16 = vld [vmem:[%s3279_s25 + $0x80] sm:$0xf]  ;;  %201 = vst [vmem:[%s3286_s26 + $0x38] sm:$0xf] %v200_v14 }
  0x20   : > { %203 = vst [vmem:[%s3286_s26 + $0x3c] sm:$0xf] %v202_v15  ;;  %205 = vst [vmem:[%s3286_s26 + $0x40] sm:$0xf] %v204_v16  ;;  %v206_v17 = vld [vmem:[%s3279_s25 + $0x88] sm:$0xf] }
  0x21   : > { %v208_v18 = vld [vmem:[%s3279_s25 + $0x90] sm:$0xf]  ;;  %v210_v19 = vld [vmem:[%s3279_s25 + $0x98] sm:$0xf]  ;;  %207 = vst [vmem:[%s3286_s26 + $0x44] sm:$0xf] %v206_v17 }
  0x22   : > { %209 = vst [vmem:[%s3286_s26 + $0x48] sm:$0xf] %v208_v18  ;;  %211 = vst [vmem:[%s3286_s26 + $0x4c] sm:$0xf] %v210_v19  ;;  %v212_v20 = vld [vmem:[%s3279_s25 + $0xa0] sm:$0xf] }
  0x23   : > { %v214_v21 = vld [vmem:[%s3279_s25 + $0xa8] sm:$0xf]  ;;  %v216_v22 = vld [vmem:[%s3279_s25 + $0xb0] sm:$0xf]  ;;  %213 = vst [vmem:[%s3286_s26 + $0x50] sm:$0xf] %v212_v20 }
  0x24   : > { %215 = vst [vmem:[%s3286_s26 + $0x54] sm:$0xf] %v214_v21  ;;  %217 = vst [vmem:[%s3286_s26 + $0x58] sm:$0xf] %v216_v22  ;;  %v218_v23 = vld [vmem:[%s3279_s25 + $0xb8] sm:$0xf] }
  0x25   : > { %v220_v24 = vld [vmem:[%s3279_s25 + $0xc0] sm:$0xf]  ;;  %v222_v25 = vld [vmem:[%s3279_s25 + $0xc8] sm:$0xf]  ;;  %219 = vst [vmem:[%s3286_s26 + $0x5c] sm:$0xf] %v218_v23 }
  0x26   : > { %221 = vst [vmem:[%s3286_s26 + $0x60] sm:$0xf] %v220_v24  ;;  %223 = vst [vmem:[%s3286_s26 + $0x64] sm:$0xf] %v222_v25  ;;  %v224_v26 = vld [vmem:[%s3279_s25 + $0xd0] sm:$0xf] }
  0x27   : > { %v226_v27 = vld [vmem:[%s3279_s25 + $0xd8] sm:$0xf]  ;;  %v228_v28 = vld [vmem:[%s3279_s25 + $0xe0] sm:$0xf]  ;;  %225 = vst [vmem:[%s3286_s26 + $0x68] sm:$0xf] %v224_v26 }
  0x28   : > { %227 = vst [vmem:[%s3286_s26 + $0x6c] sm:$0xf] %v226_v27  ;;  %229 = vst [vmem:[%s3286_s26 + $0x70] sm:$0xf] %v228_v28  ;;  %v230_v29 = vld [vmem:[%s3279_s25 + $0xe8] sm:$0xf] }
  0x29   : > { %v232_v30 = vld [vmem:[%s3279_s25 + $0xf0] sm:$0xf]  ;;  %v234_v31 = vld [vmem:[%s3279_s25 + $0xf8] sm:$0xf]  ;;  %231 = vst [vmem:[%s3286_s26 + $0x74] sm:$0xf] %v230_v29 }
  0x2a   : > { %233 = vst [vmem:[%s3286_s26 + $0x78] sm:$0xf] %v232_v30  ;;  %235 = vst [vmem:[%s3286_s26 + $0x7c] sm:$0xf] %v234_v31  ;;  %v236_v32 = vld [vmem:[%s3279_s25 + $0x100] sm:$0xf] }
  0x2b   : > { %v238_v33 = vld [vmem:[%s3279_s25 + $0x108] sm:$0xf]  ;;  %v240_v34 = vld [vmem:[%s3279_s25 + $0x110] sm:$0xf]  ;;  %237 = vst [vmem:[%s3286_s26 + $0x80] sm:$0xf] %v236_v32 }
  0x2c   : > { %239 = vst [vmem:[%s3286_s26 + $0x84] sm:$0xf] %v238_v33  ;;  %241 = vst [vmem:[%s3286_s26 + $0x88] sm:$0xf] %v240_v34  ;;  %v242_v35 = vld [vmem:[%s3279_s25 + $0x118] sm:$0xf] }
  0x2d   : > { %v244_v36 = vld [vmem:[%s3279_s25 + $0x120] sm:$0xf]  ;;  %v246_v37 = vld [vmem:[%s3279_s25 + $0x128] sm:$0xf]  ;;  %243 = vst [vmem:[%s3286_s26 + $0x8c] sm:$0xf] %v242_v35 }
  0x2e   : > { %245 = vst [vmem:[%s3286_s26 + $0x90] sm:$0xf] %v244_v36  ;;  %247 = vst [vmem:[%s3286_s26 + $0x94] sm:$0xf] %v246_v37  ;;  %v248_v38 = vld [vmem:[%s3279_s25 + $0x130] sm:$0xf] }
  0x2f   : > { %v250_v39 = vld [vmem:[%s3279_s25 + $0x138] sm:$0xf]  ;;  %v252_v40 = vld [vmem:[%s3279_s25 + $0x140] sm:$0xf]  ;;  %249 = vst [vmem:[%s3286_s26 + $0x98] sm:$0xf] %v248_v38 }
  0x30   : > { %251 = vst [vmem:[%s3286_s26 + $0x9c] sm:$0xf] %v250_v39  ;;  %253 = vst [vmem:[%s3286_s26 + $0xa0] sm:$0xf] %v252_v40  ;;  %v254_v41 = vld [vmem:[%s3279_s25 + $0x148] sm:$0xf] }
  0x31   : > { %v256_v42 = vld [vmem:[%s3279_s25 + $0x150] sm:$0xf]  ;;  %v258_v43 = vld [vmem:[%s3279_s25 + $0x158] sm:$0xf]  ;;  %255 = vst [vmem:[%s3286_s26 + $0xa4] sm:$0xf] %v254_v41 }
  0x32   : > { %257 = vst [vmem:[%s3286_s26 + $0xa8] sm:$0xf] %v256_v42  ;;  %259 = vst [vmem:[%s3286_s26 + $0xac] sm:$0xf] %v258_v43  ;;  %v260_v44 = vld [vmem:[%s3279_s25 + $0x160] sm:$0xf] }
  0x33   : > { %v262_v45 = vld [vmem:[%s3279_s25 + $0x168] sm:$0xf]  ;;  %v264_v46 = vld [vmem:[%s3279_s25 + $0x170] sm:$0xf]  ;;  %261 = vst [vmem:[%s3286_s26 + $0xb0] sm:$0xf] %v260_v44 }
  0x34   : > { %263 = vst [vmem:[%s3286_s26 + $0xb4] sm:$0xf] %v262_v45  ;;  %265 = vst [vmem:[%s3286_s26 + $0xb8] sm:$0xf] %v264_v46  ;;  %v266_v47 = vld [vmem:[%s3279_s25 + $0x178] sm:$0xf] }
  0x35   : > { %v268_v48 = vld [vmem:[%s3279_s25 + $0x180] sm:$0xf]  ;;  %v270_v49 = vld [vmem:[%s3279_s25 + $0x188] sm:$0xf]  ;;  %267 = vst [vmem:[%s3286_s26 + $0xbc] sm:$0xf] %v266_v47 }
  0x36   : > { %269 = vst [vmem:[%s3286_s26 + $0xc0] sm:$0xf] %v268_v48  ;;  %271 = vst [vmem:[%s3286_s26 + $0xc4] sm:$0xf] %v270_v49  ;;  %v272_v50 = vld [vmem:[%s3279_s25 + $0x190] sm:$0xf] }
  0x37   : > { %v274_v51 = vld [vmem:[%s3279_s25 + $0x198] sm:$0xf]  ;;  %v276_v52 = vld [vmem:[%s3279_s25 + $0x1a0] sm:$0xf]  ;;  %273 = vst [vmem:[%s3286_s26 + $0xc8] sm:$0xf] %v272_v50 }
  0x38   : > { %275 = vst [vmem:[%s3286_s26 + $0xcc] sm:$0xf] %v274_v51  ;;  %277 = vst [vmem:[%s3286_s26 + $0xd0] sm:$0xf] %v276_v52  ;;  %v278_v53 = vld [vmem:[%s3279_s25 + $0x1a8] sm:$0xf] }
  0x39   : > { %v280_v54 = vld [vmem:[%s3279_s25 + $0x1b0] sm:$0xf]  ;;  %v282_v55 = vld [vmem:[%s3279_s25 + $0x1b8] sm:$0xf]  ;;  %279 = vst [vmem:[%s3286_s26 + $0xd4] sm:$0xf] %v278_v53 }
  0x3a   : > { %281 = vst [vmem:[%s3286_s26 + $0xd8] sm:$0xf] %v280_v54  ;;  %283 = vst [vmem:[%s3286_s26 + $0xdc] sm:$0xf] %v282_v55  ;;  %v284_v56 = vld [vmem:[%s3279_s25 + $0x1c0] sm:$0xf] }
  0x3b   : > { %v286_v57 = vld [vmem:[%s3279_s25 + $0x1c8] sm:$0xf]  ;;  %v288_v58 = vld [vmem:[%s3279_s25 + $0x1d0] sm:$0xf]  ;;  %285 = vst [vmem:[%s3286_s26 + $0xe0] sm:$0xf] %v284_v56 }
  0x3c   : > { %287 = vst [vmem:[%s3286_s26 + $0xe4] sm:$0xf] %v286_v57  ;;  %289 = vst [vmem:[%s3286_s26 + $0xe8] sm:$0xf] %v288_v58  ;;  %v290_v59 = vld [vmem:[%s3279_s25 + $0x1d8] sm:$0xf] }
  0x3d   : > { %v292_v60 = vld [vmem:[%s3279_s25 + $0x1e0] sm:$0xf]  ;;  %v294_v61 = vld [vmem:[%s3279_s25 + $0x1e8] sm:$0xf]  ;;  %291 = vst [vmem:[%s3286_s26 + $0xec] sm:$0xf] %v290_v59 }
  0x3e   : > { %293 = vst [vmem:[%s3286_s26 + $0xf0] sm:$0xf] %v292_v60  ;;  %295 = vst [vmem:[%s3286_s26 + $0xf4] sm:$0xf] %v294_v61  ;;  %v296_v62 = vld [vmem:[%s3279_s25 + $0x1f0] sm:$0xf] }
  0x3f   : > { %v298_v63 = vld [vmem:[%s3279_s25 + $0x1f8] sm:$0xf]  ;;  %v300_v0 = vld [vmem:[%s3279_s25 + $0x200] sm:$0xf]  ;;  %297 = vst [vmem:[%s3286_s26 + $0xf8] sm:$0xf] %v296_v62 }
  0x40   : > { %299 = vst [vmem:[%s3286_s26 + $0xfc] sm:$0xf] %v298_v63  ;;  %301 = vst [vmem:[%s3286_s26 + $0x100] sm:$0xf] %v300_v0  ;;  %v302_v1 = vld [vmem:[%s3279_s25 + $0x208] sm:$0xf] }
  0x41   : > { %v304_v2 = vld [vmem:[%s3279_s25 + $0x210] sm:$0xf]  ;;  %v306_v3 = vld [vmem:[%s3279_s25 + $0x218] sm:$0xf]  ;;  %303 = vst [vmem:[%s3286_s26 + $0x104] sm:$0xf] %v302_v1 }
  0x42   : > { %305 = vst [vmem:[%s3286_s26 + $0x108] sm:$0xf] %v304_v2  ;;  %307 = vst [vmem:[%s3286_s26 + $0x10c] sm:$0xf] %v306_v3  ;;  %v308_v4 = vld [vmem:[%s3279_s25 + $0x220] sm:$0xf] }
  0x43   : > { %v310_v5 = vld [vmem:[%s3279_s25 + $0x228] sm:$0xf]  ;;  %v312_v6 = vld [vmem:[%s3279_s25 + $0x230] sm:$0xf]  ;;  %309 = vst [vmem:[%s3286_s26 + $0x110] sm:$0xf] %v308_v4 }
  0x44   : > { %311 = vst [vmem:[%s3286_s26 + $0x114] sm:$0xf] %v310_v5  ;;  %313 = vst [vmem:[%s3286_s26 + $0x118] sm:$0xf] %v312_v6  ;;  %v314_v7 = vld [vmem:[%s3279_s25 + $0x238] sm:$0xf] }
  0x45   : > { %v316_v8 = vld [vmem:[%s3279_s25 + $0x240] sm:$0xf]  ;;  %v318_v9 = vld [vmem:[%s3279_s25 + $0x248] sm:$0xf]  ;;  %315 = vst [vmem:[%s3286_s26 + $0x11c] sm:$0xf] %v314_v7 }
  0x46   : > { %317 = vst [vmem:[%s3286_s26 + $0x120] sm:$0xf] %v316_v8  ;;  %319 = vst [vmem:[%s3286_s26 + $0x124] sm:$0xf] %v318_v9  ;;  %v320_v10 = vld [vmem:[%s3279_s25 + $0x250] sm:$0xf] }
  0x47   : > { %v322_v11 = vld [vmem:[%s3279_s25 + $0x258] sm:$0xf]  ;;  %v324_v12 = vld [vmem:[%s3279_s25 + $0x260] sm:$0xf]  ;;  %321 = vst [vmem:[%s3286_s26 + $0x128] sm:$0xf] %v320_v10 }
  0x48   : > { %323 = vst [vmem:[%s3286_s26 + $0x12c] sm:$0xf] %v322_v11  ;;  %325 = vst [vmem:[%s3286_s26 + $0x130] sm:$0xf] %v324_v12  ;;  %v326_v13 = vld [vmem:[%s3279_s25 + $0x268] sm:$0xf] }
  0x49   : > { %v328_v14 = vld [vmem:[%s3279_s25 + $0x270] sm:$0xf]  ;;  %v330_v15 = vld [vmem:[%s3279_s25 + $0x278] sm:$0xf]  ;;  %327 = vst [vmem:[%s3286_s26 + $0x134] sm:$0xf] %v326_v13 }
  0x4a   : > { %329 = vst [vmem:[%s3286_s26 + $0x138] sm:$0xf] %v328_v14  ;;  %331 = vst [vmem:[%s3286_s26 + $0x13c] sm:$0xf] %v330_v15  ;;  %v332_v16 = vld [vmem:[%s3279_s25 + $0x280] sm:$0xf] }
  0x4b   : > { %v334_v17 = vld [vmem:[%s3279_s25 + $0x288] sm:$0xf]  ;;  %v336_v18 = vld [vmem:[%s3279_s25 + $0x290] sm:$0xf]  ;;  %333 = vst [vmem:[%s3286_s26 + $0x140] sm:$0xf] %v332_v16 }
  0x4c   : > { %335 = vst [vmem:[%s3286_s26 + $0x144] sm:$0xf] %v334_v17  ;;  %337 = vst [vmem:[%s3286_s26 + $0x148] sm:$0xf] %v336_v18  ;;  %v338_v19 = vld [vmem:[%s3279_s25 + $0x298] sm:$0xf] }
  0x4d   : > { %v340_v20 = vld [vmem:[%s3279_s25 + $0x2a0] sm:$0xf]  ;;  %v342_v21 = vld [vmem:[%s3279_s25 + $0x2a8] sm:$0xf]  ;;  %339 = vst [vmem:[%s3286_s26 + $0x14c] sm:$0xf] %v338_v19 }
  0x4e   : > { %341 = vst [vmem:[%s3286_s26 + $0x150] sm:$0xf] %v340_v20  ;;  %343 = vst [vmem:[%s3286_s26 + $0x154] sm:$0xf] %v342_v21  ;;  %v344_v22 = vld [vmem:[%s3279_s25 + $0x2b0] sm:$0xf] }
  0x4f   : > { %v346_v23 = vld [vmem:[%s3279_s25 + $0x2b8] sm:$0xf]  ;;  %v348_v24 = vld [vmem:[%s3279_s25 + $0x2c0] sm:$0xf]  ;;  %345 = vst [vmem:[%s3286_s26 + $0x158] sm:$0xf] %v344_v22 }
  0x50   : > { %347 = vst [vmem:[%s3286_s26 + $0x15c] sm:$0xf] %v346_v23  ;;  %349 = vst [vmem:[%s3286_s26 + $0x160] sm:$0xf] %v348_v24  ;;  %v350_v25 = vld [vmem:[%s3279_s25 + $0x2c8] sm:$0xf] }
  0x51   : > { %v352_v26 = vld [vmem:[%s3279_s25 + $0x2d0] sm:$0xf]  ;;  %v354_v27 = vld [vmem:[%s3279_s25 + $0x2d8] sm:$0xf]  ;;  %351 = vst [vmem:[%s3286_s26 + $0x164] sm:$0xf] %v350_v25 }
  0x52   : > { %353 = vst [vmem:[%s3286_s26 + $0x168] sm:$0xf] %v352_v26  ;;  %355 = vst [vmem:[%s3286_s26 + $0x16c] sm:$0xf] %v354_v27  ;;  %v356_v28 = vld [vmem:[%s3279_s25 + $0x2e0] sm:$0xf] }
  0x53   : > { %v358_v29 = vld [vmem:[%s3279_s25 + $0x2e8] sm:$0xf]  ;;  %v360_v30 = vld [vmem:[%s3279_s25 + $0x2f0] sm:$0xf]  ;;  %357 = vst [vmem:[%s3286_s26 + $0x170] sm:$0xf] %v356_v28 }
  0x54   : > { %359 = vst [vmem:[%s3286_s26 + $0x174] sm:$0xf] %v358_v29  ;;  %361 = vst [vmem:[%s3286_s26 + $0x178] sm:$0xf] %v360_v30  ;;  %v362_v31 = vld [vmem:[%s3279_s25 + $0x2f8] sm:$0xf] }
  0x55   : > { %v364_v32 = vld [vmem:[%s3279_s25 + $0x300] sm:$0xf]  ;;  %v366_v33 = vld [vmem:[%s3279_s25 + $0x308] sm:$0xf]  ;;  %363 = vst [vmem:[%s3286_s26 + $0x17c] sm:$0xf] %v362_v31 }
  0x56   : > { %365 = vst [vmem:[%s3286_s26 + $0x180] sm:$0xf] %v364_v32  ;;  %367 = vst [vmem:[%s3286_s26 + $0x184] sm:$0xf] %v366_v33  ;;  %v368_v34 = vld [vmem:[%s3279_s25 + $0x310] sm:$0xf] }
  0x57   : > { %v370_v35 = vld [vmem:[%s3279_s25 + $0x318] sm:$0xf]  ;;  %v372_v36 = vld [vmem:[%s3279_s25 + $0x320] sm:$0xf]  ;;  %369 = vst [vmem:[%s3286_s26 + $0x188] sm:$0xf] %v368_v34 }
  0x58   : > { %371 = vst [vmem:[%s3286_s26 + $0x18c] sm:$0xf] %v370_v35  ;;  %373 = vst [vmem:[%s3286_s26 + $0x190] sm:$0xf] %v372_v36  ;;  %v374_v37 = vld [vmem:[%s3279_s25 + $0x328] sm:$0xf] }
  0x59   : > { %v376_v38 = vld [vmem:[%s3279_s25 + $0x330] sm:$0xf]  ;;  %v378_v39 = vld [vmem:[%s3279_s25 + $0x338] sm:$0xf]  ;;  %375 = vst [vmem:[%s3286_s26 + $0x194] sm:$0xf] %v374_v37 }
  0x5a   : > { %377 = vst [vmem:[%s3286_s26 + $0x198] sm:$0xf] %v376_v38  ;;  %379 = vst [vmem:[%s3286_s26 + $0x19c] sm:$0xf] %v378_v39  ;;  %v380_v40 = vld [vmem:[%s3279_s25 + $0x340] sm:$0xf] }
  0x5b   : > { %v382_v41 = vld [vmem:[%s3279_s25 + $0x348] sm:$0xf]  ;;  %v384_v42 = vld [vmem:[%s3279_s25 + $0x350] sm:$0xf]  ;;  %381 = vst [vmem:[%s3286_s26 + $0x1a0] sm:$0xf] %v380_v40 }
  0x5c   : > { %383 = vst [vmem:[%s3286_s26 + $0x1a4] sm:$0xf] %v382_v41  ;;  %385 = vst [vmem:[%s3286_s26 + $0x1a8] sm:$0xf] %v384_v42  ;;  %v386_v43 = vld [vmem:[%s3279_s25 + $0x358] sm:$0xf] }
  0x5d   : > { %v388_v44 = vld [vmem:[%s3279_s25 + $0x360] sm:$0xf]  ;;  %v390_v45 = vld [vmem:[%s3279_s25 + $0x368] sm:$0xf]  ;;  %387 = vst [vmem:[%s3286_s26 + $0x1ac] sm:$0xf] %v386_v43 }
  0x5e   : > { %389 = vst [vmem:[%s3286_s26 + $0x1b0] sm:$0xf] %v388_v44  ;;  %391 = vst [vmem:[%s3286_s26 + $0x1b4] sm:$0xf] %v390_v45  ;;  %v392_v46 = vld [vmem:[%s3279_s25 + $0x370] sm:$0xf] }
  0x5f   : > { %v394_v47 = vld [vmem:[%s3279_s25 + $0x378] sm:$0xf]  ;;  %v396_v48 = vld [vmem:[%s3279_s25 + $0x380] sm:$0xf]  ;;  %393 = vst [vmem:[%s3286_s26 + $0x1b8] sm:$0xf] %v392_v46 }
  0x60   : > { %395 = vst [vmem:[%s3286_s26 + $0x1bc] sm:$0xf] %v394_v47  ;;  %397 = vst [vmem:[%s3286_s26 + $0x1c0] sm:$0xf] %v396_v48  ;;  %v398_v49 = vld [vmem:[%s3279_s25 + $0x388] sm:$0xf] }
  0x61   : > { %v400_v50 = vld [vmem:[%s3279_s25 + $0x390] sm:$0xf]  ;;  %v402_v51 = vld [vmem:[%s3279_s25 + $0x398] sm:$0xf]  ;;  %399 = vst [vmem:[%s3286_s26 + $0x1c4] sm:$0xf] %v398_v49 }
  0x62   : > { %401 = vst [vmem:[%s3286_s26 + $0x1c8] sm:$0xf] %v400_v50  ;;  %403 = vst [vmem:[%s3286_s26 + $0x1cc] sm:$0xf] %v402_v51  ;;  %v404_v52 = vld [vmem:[%s3279_s25 + $0x3a0] sm:$0xf] }
  0x63   : > { %v406_v53 = vld [vmem:[%s3279_s25 + $0x3a8] sm:$0xf]  ;;  %v408_v54 = vld [vmem:[%s3279_s25 + $0x3b0] sm:$0xf]  ;;  %405 = vst [vmem:[%s3286_s26 + $0x1d0] sm:$0xf] %v404_v52 }
  0x64   : > { %407 = vst [vmem:[%s3286_s26 + $0x1d4] sm:$0xf] %v406_v53  ;;  %409 = vst [vmem:[%s3286_s26 + $0x1d8] sm:$0xf] %v408_v54  ;;  %v410_v55 = vld [vmem:[%s3279_s25 + $0x3b8] sm:$0xf] }
  0x65   : > { %v412_v56 = vld [vmem:[%s3279_s25 + $0x3c0] sm:$0xf]  ;;  %v414_v57 = vld [vmem:[%s3279_s25 + $0x3c8] sm:$0xf]  ;;  %411 = vst [vmem:[%s3286_s26 + $0x1dc] sm:$0xf] %v410_v55 }
  0x66   : > { %413 = vst [vmem:[%s3286_s26 + $0x1e0] sm:$0xf] %v412_v56  ;;  %415 = vst [vmem:[%s3286_s26 + $0x1e4] sm:$0xf] %v414_v57  ;;  %v416_v58 = vld [vmem:[%s3279_s25 + $0x3d0] sm:$0xf] }
  0x67   : > { %v418_v59 = vld [vmem:[%s3279_s25 + $0x3d8] sm:$0xf]  ;;  %v420_v60 = vld [vmem:[%s3279_s25 + $0x3e0] sm:$0xf]  ;;  %417 = vst [vmem:[%s3286_s26 + $0x1e8] sm:$0xf] %v416_v58 }
  0x68   : > { %419 = vst [vmem:[%s3286_s26 + $0x1ec] sm:$0xf] %v418_v59  ;;  %421 = vst [vmem:[%s3286_s26 + $0x1f0] sm:$0xf] %v420_v60  ;;  %v422_v61 = vld [vmem:[%s3279_s25 + $0x3e8] sm:$0xf] }
  0x69   : > { %v424_v62 = vld [vmem:[%s3279_s25 + $0x3f0] sm:$0xf]  ;;  %v426_v63 = vld [vmem:[%s3279_s25 + $0x3f8] sm:$0xf]  ;;  %423 = vst [vmem:[%s3286_s26 + $0x1f4] sm:$0xf] %v422_v61 }
  0x6a   : > { %425 = vst [vmem:[%s3286_s26 + $0x1f8] sm:$0xf] %v424_v62  ;;  %427 = vst [vmem:[%s3286_s26 + $0x1fc] sm:$0xf] %v426_v63  ;;  %v428_v0 = vld [vmem:[%s3279_s25 + $0x400] sm:$0xf] }
  0x6b   : > { %v430_v1 = vld [vmem:[%s3279_s25 + $0x408] sm:$0xf]  ;;  %v432_v2 = vld [vmem:[%s3279_s25 + $0x410] sm:$0xf]  ;;  %429 = vst [vmem:[%s3286_s26 + $0x200] sm:$0xf] %v428_v0 }
  0x6c   : > { %431 = vst [vmem:[%s3286_s26 + $0x204] sm:$0xf] %v430_v1  ;;  %433 = vst [vmem:[%s3286_s26 + $0x208] sm:$0xf] %v432_v2  ;;  %v434_v3 = vld [vmem:[%s3279_s25 + $0x418] sm:$0xf] }
  0x6d   : > { %v436_v4 = vld [vmem:[%s3279_s25 + $0x420] sm:$0xf]  ;;  %v438_v5 = vld [vmem:[%s3279_s25 + $0x428] sm:$0xf]  ;;  %435 = vst [vmem:[%s3286_s26 + $0x20c] sm:$0xf] %v434_v3 }
  0x6e   : > { %437 = vst [vmem:[%s3286_s26 + $0x210] sm:$0xf] %v436_v4  ;;  %439 = vst [vmem:[%s3286_s26 + $0x214] sm:$0xf] %v438_v5  ;;  %v440_v6 = vld [vmem:[%s3279_s25 + $0x430] sm:$0xf] }
  0x6f   : > { %v442_v7 = vld [vmem:[%s3279_s25 + $0x438] sm:$0xf]  ;;  %v444_v8 = vld [vmem:[%s3279_s25 + $0x440] sm:$0xf]  ;;  %441 = vst [vmem:[%s3286_s26 + $0x218] sm:$0xf] %v440_v6 }
  0x70   : > { %443 = vst [vmem:[%s3286_s26 + $0x21c] sm:$0xf] %v442_v7  ;;  %445 = vst [vmem:[%s3286_s26 + $0x220] sm:$0xf] %v444_v8  ;;  %v446_v9 = vld [vmem:[%s3279_s25 + $0x448] sm:$0xf] }
  0x71   : > { %v448_v10 = vld [vmem:[%s3279_s25 + $0x450] sm:$0xf]  ;;  %v450_v11 = vld [vmem:[%s3279_s25 + $0x458] sm:$0xf]  ;;  %447 = vst [vmem:[%s3286_s26 + $0x224] sm:$0xf] %v446_v9 }
  0x72   : > { %449 = vst [vmem:[%s3286_s26 + $0x228] sm:$0xf] %v448_v10  ;;  %451 = vst [vmem:[%s3286_s26 + $0x22c] sm:$0xf] %v450_v11  ;;  %v452_v12 = vld [vmem:[%s3279_s25 + $0x460] sm:$0xf] }
  0x73   : > { %v454_v13 = vld [vmem:[%s3279_s25 + $0x468] sm:$0xf]  ;;  %v456_v14 = vld [vmem:[%s3279_s25 + $0x470] sm:$0xf]  ;;  %453 = vst [vmem:[%s3286_s26 + $0x230] sm:$0xf] %v452_v12 }
  0x74   : > { %455 = vst [vmem:[%s3286_s26 + $0x234] sm:$0xf] %v454_v13  ;;  %457 = vst [vmem:[%s3286_s26 + $0x238] sm:$0xf] %v456_v14  ;;  %v458_v15 = vld [vmem:[%s3279_s25 + $0x478] sm:$0xf] }
  0x75   : > { %459 = vst [vmem:[%s3286_s26 + $0x23c] sm:$0xf] %v458_v15 }
  0x76 PF: > { %p2520_p8 = scmp.ge.s32.totalorder %s3212_s13, 1  ;;  %p769_p9 = scmp.lt.s32.totalorder %s3212_s13, 3 }
  0x78   : > { %p770_p10 = pnand %p2520_p8, %p769_p9 }
  0x79   : > { %s776_s27 = sand.u32 (!%p770_p10), 1, %s3196_s9   ;;  %v3029_v16 = vld [vmem:[%s3974_s0 + $0x124] ss:$36 sps:$4 sm:$0xff] (!%p770_p10)   ;;  %v3042_v41 = vld [vmem:[%s3974_s0 + $0x4c] ss:$36 sps:$4 sm:$0xff] (!%p770_p10)   ;;  %vm3215_vm0 = vmmov (!%p770_p10), 0  }
  0x7a   : > { %773 = sbr.rel (%p770_p10) target bundleno = 525 (0x20d), region = 65  ;;  %v3033_v17 = vld [vmem:[%s3974_s0 + $0x4] ss:$36 sps:$4 sm:$0xff] (!%p770_p10)   ;;  %1885 = vmatprep.mubr.bf16.mxu1 (!%p770_p10), %v3029_v16  ;;  %v3049_v43 = vld [vmem:[%s3974_s0 + $0x16c] ss:$36 sps:$4 sm:$0xff] (!%p770_p10)  }
  0x7b   : > { %s2967_s28 = smul.u32 (!%p770_p10), 576, %s776_s27  ;;  %1853 = vmatprep.mubr.bf16.mxu0 (!%p770_p10), %v3033_v17  ;;  %v3027_v35 = vld [vmem:[%s3974_s0 + $0x120] ss:$36 sps:$4 sm:$0xff] (!%p770_p10)   ;;  %v3045_v47 = vld [vmem:[%s3974_s0 + $0x48] ss:$36 sps:$4 sm:$0xff] (!%p770_p10)  }
  0x7c   : > { %v3031_v36 = vld [vmem:[%s3974_s0] ss:$36 sps:$4 sm:$0xff] (!%p770_p10)   ;;  %v3052_v51 = vld [vmem:[%s3974_s0 + $0x168] ss:$36 sps:$4 sm:$0xff] (!%p770_p10)   ;;  %v3056_v55 = vld [vmem:[%s3974_s0 + $0x94] ss:$36 sps:$4 sm:$0xff] (!%p770_p10)  }
  0x7d   : > { %s3582_s5 = scalar_lea.vmem (!%p770_p10), [#allocation3], %s2967_s28  ;;  %v3063_v56 = vld [vmem:[%s3974_s0 + $0x1b4] ss:$36 sps:$4 sm:$0xff] (!%p770_p10)   ;;  %v3070_v3 = vld [vmem:[%s3974_s0 + $0xdc] ss:$36 sps:$4 sm:$0xff] (!%p770_p10)   ;;  %s2968_s25 = smul.u32 (!%p770_p10), 112, %s776_s27 }
  0x7e   : > { %v3011_v18 = vld [vmem:[%s3582_s5 + $0x40] sm:$0xff] (!%p770_p10)   ;;  %v3013_v20 = vld [vmem:[%s3582_s5 + $0x48] sm:$0xff] (!%p770_p10)   ;;  %v3015_v22 = vld [vmem:[%s3582_s5 + $0x50] sm:$0xff] (!%p770_p10)  }
  0x7f   : > { %v3012_v19 = vld [vmem:[%s3582_s5] sm:$0xff] (!%p770_p10)   ;;  %2950 = vmatprep.subr.bf16.mxu1 (!%p770_p10), %v3011_v18  ;;  %2659 = vmatprep.subr.bf16.mxu0 (!%p770_p10), %v3011_v18  ;;  %v3014_v21 = vld [vmem:[%s3582_s5 + $0x8] sm:$0xff] (!%p770_p10)   ;;  %v3016_v23 = vld [vmem:[%s3582_s5 + $0x10] sm:$0xff] (!%p770_p10)   ;;  %s3911_s26 = scalar_lea.vmem (!%p770_p10), [#allocation4], %s2968_s25 }
  0x80   : > { %2958 = vmatpush3.bf16.msra.mxu1 (!%p770_p10), %v3012_v19  ;;  %2660 = vmatpush3.bf16.msra.mxu0 (!%p770_p10), %v3012_v19  ;;  %v3017_v24 = vld [vmem:[%s3582_s5 + $0x58] sm:$0xff] (!%p770_p10)   ;;  %v3019_v26 = vld [vmem:[%s3582_s5 + $0x60] sm:$0xff] (!%p770_p10)   ;;  %v3021_v28 = vld [vmem:[%s3582_s5 + $0x68] sm:$0xff] (!%p770_p10)  }
  0x81   : > { %2951 = vmatprep.subr.bf16.mxu1 %v3013_v20  ;;  %2661 = vmatprep.subr.bf16.mxu0 %v3013_v20  ;;  %v3018_v25 = vld [vmem:[%s3582_s5 + $0x18] sm:$0xff]   ;;  %v3020_v27 = vld [vmem:[%s3582_s5 + $0x20] sm:$0xff]   ;;  %v3022_v29 = vld [vmem:[%s3582_s5 + $0x28] sm:$0xff]   ;;  %s2656_s9 = sshll.u32 (%p3266_p6), %s3204_s11, 3 }
  0x82   : > { %v3023_v30 = vld [vmem:[%s3582_s5 + $0x70] sm:$0xff]   ;;  %v3025_v32 = vld [vmem:[%s3582_s5 + $0x78] sm:$0xff]   ;;  %v3030_v34 = vld [vmem:[%s3582_s5 + $0xc0] sm:$0xff]   ;;  %s2336_s29 = scalar_lea.vmem (%p3266_p6), %s3976_s2, %s2656_s9 }
  0x83   : > { %v3024_v31 = vld [vmem:[%s3582_s5 + $0x30] sm:$0xff]   ;;  %v3026_v33 = vld [vmem:[%s3582_s5 + $0x38] sm:$0xff]   ;;  %v3035_v37 = vld [vmem:[%s3582_s5 + $0x140] sm:$0xff]  }
  0x84   : > { %2959 = vmatpush3.bf16.msra.mxu1 %v3014_v21  ;;  %2662 = vmatpush3.bf16.msra.mxu0 %v3014_v21  ;;  %v3034_v38 = vld [vmem:[%s3582_s5 + $0x80] sm:$0xff]   ;;  %v3037_v40 = vld [vmem:[%s3582_s5 + $0xc8] sm:$0xff]   ;;  %v3041_v46 = vld [vmem:[%s3582_s5 + $0xd0] sm:$0xff]  }
  0x85   : > { %2952 = vmatprep.subr.bf16.mxu1 %v3015_v22  ;;  %2663 = vmatprep.subr.bf16.mxu0 %v3015_v22  ;;  %v3036_v39 = vld [vmem:[%s3582_s5 + $0x100] sm:$0xff]   ;;  %v3039_v42 = vld [vmem:[%s3582_s5 + $0x148] sm:$0xff]   ;;  %v3046_v48 = vld [vmem:[%s3582_s5 + $0x150] sm:$0xff]   ;;  %v3214_v22 = vmov 0.0  }
  0x86   : > { %v3038_v44 = vld [vmem:[%s3582_s5 + $0x88] sm:$0xff]   ;;  %v3044_v49 = vld [vmem:[%s3582_s5 + $0x90] sm:$0xff]   ;;  %v3048_v52 = vld [vmem:[%s3582_s5 + $0xd8] sm:$0xff]  }
  0x87   : > { %v3040_v45 = vld [vmem:[%s3582_s5 + $0x108] sm:$0xff]   ;;  %v3047_v50 = vld [vmem:[%s3582_s5 + $0x110] sm:$0xff]   ;;  %v3053_v53 = vld [vmem:[%s3582_s5 + $0x158] sm:$0xff]  }
  0x88   : > { %2960 = vmatpush3.bf16.msra.mxu1 %v3016_v23  ;;  %2664 = vmatpush3.bf16.msra.mxu0 %v3016_v23  ;;  %v3051_v54 = vld [vmem:[%s3582_s5 + $0x98] sm:$0xff]   ;;  %v3055_v58 = vld [vmem:[%s3582_s5 + $0xe0] sm:$0xff]   ;;  %v3059_v59 = vld [vmem:[%s3974_s0 + $0x90] ss:$36 sps:$4 sm:$0xff]  }
  0x89   : > { %2953 = vmatprep.subr.bf16.mxu1 %v3017_v24  ;;  %2665 = vmatprep.subr.bf16.mxu0 %v3017_v24  ;;  %v3054_v57 = vld [vmem:[%s3582_s5 + $0x118] sm:$0xff]   ;;  %v3060_v60 = vld [vmem:[%s3582_s5 + $0x160] sm:$0xff]   ;;  %v3066_v63 = vld [vmem:[%s3974_s0 + $0x1b0] ss:$36 sps:$4 sm:$0xff]  }
  0x8a   : > { %v3058_v61 = vld [vmem:[%s3582_s5 + $0xa0] sm:$0xff]   ;;  %v3062_v0 = vld [vmem:[%s3582_s5 + $0xe8] sm:$0xff]   ;;  %v3069_v5 = vld [vmem:[%s3582_s5 + $0xf0] sm:$0xff]  }
  0x8b   : > { %v3061_v62 = vld [vmem:[%s3582_s5 + $0x120] sm:$0xff]   ;;  %v3067_v1 = vld [vmem:[%s3582_s5 + $0x168] sm:$0xff]   ;;  %v3074_v6 = vld [vmem:[%s3582_s5 + $0x170] sm:$0xff]  }
  0x8c   : > { %2961 = vmatpush3.bf16.msra.mxu1 %v3018_v25  ;;  %2666 = vmatpush3.bf16.msra.mxu0 %v3018_v25  ;;  %v3065_v2 = vld [vmem:[%s3582_s5 + $0xa8] sm:$0xff]   ;;  %v3072_v7 = vld [vmem:[%s3582_s5 + $0xb0] sm:$0xff]   ;;  %v3073_v9 = vld [vmem:[%s3974_s0 + $0xd8] ss:$36 sps:$4 sm:$0xff]  }
  0x8d   : > { %2954 = vmatprep.subr.bf16.mxu1 %v3019_v26  ;;  %2667 = vmatprep.subr.bf16.mxu0 %v3019_v26  ;;  %v3068_v4 = vld [vmem:[%s3582_s5 + $0x128] sm:$0xff]   ;;  %v3075_v10 = vld [vmem:[%s3582_s5 + $0x130] sm:$0xff]   ;;  %v3076_v11 = vld [vmem:[%s3582_s5 + $0xf8] sm:$0xff]  }
  0x8e   : > { %v3081_v8 = vld [vmem:[%s3974_s0 + $0xc] ss:$36 sps:$4 sm:$0xff]   ;;  %v3078_v12 = vld [vmem:[%s3582_s5 + $0x178] sm:$0xff]   ;;  %v3083_v17 = vld [vmem:[%s3582_s5 + $0x1c0] sm:$0xff]  }
  0x8f   : > { %v3086_v13 = vld [vmem:[%s3974_s0 + $0x14] ss:$36 sps:$4 sm:$0xff]   ;;  %v3079_v16 = vld [vmem:[%s3974_s0 + $0x8] ss:$36 sps:$4 sm:$0xff]   ;;  %v3087_v19 = vld [vmem:[%s3582_s5 + $0x180] sm:$0xff]  }
  0x90   : > { %2962 = vmatpush3.bf16.msra.mxu1 %v3020_v27  ;;  %2668 = vmatpush3.bf16.msra.mxu0 %v3020_v27  ;;  %v3077_v14 = vld [vmem:[%s3582_s5 + $0xb8] sm:$0xff]   ;;  %v3084_v18 = vld [vmem:[%s3974_s0 + $0x10] ss:$36 sps:$4 sm:$0xff]   ;;  %v3088_v20 = vld [vmem:[%s3582_s5 + $0x200] sm:$0xff]  }
  0x91   : > { %2955 = vmatprep.subr.bf16.mxu1 %v3021_v28  ;;  %2669 = vmatprep.subr.bf16.mxu0 %v3021_v28  ;;  %v3082_v15 = vld [vmem:[%s3582_s5 + $0x138] sm:$0xff]   ;;  %v3091_v23 = vld [vmem:[%s3582_s5 + $0x1c8] sm:$0xff]   ;;  %v3092_v27 = vld [vmem:[%s3974_s0 + $0x50] ss:$36 sps:$4 sm:$0xff]  }
  0x92   : > { %v3089_v21 = vld [vmem:[%s3974_s0 + $0x54] ss:$36 sps:$4 sm:$0xff]   ;;  %v3094_v24 = vld [vmem:[%s3974_s0 + $0x5c] ss:$36 sps:$4 sm:$0xff]   ;;  %v3093_v25 = vld [vmem:[%s3582_s5 + $0x188] sm:$0xff]  }
  0x93   : > { %v3097_v26 = vld [vmem:[%s3582_s5 + $0x208] sm:$0xff]   ;;  %v3096_v28 = vld [vmem:[%s3974_s0 + $0x58] ss:$36 sps:$4 sm:$0xff]  }
  0x94   : > { %2963 = vmatpush3.bf16.msra.mxu1 %v3022_v29  ;;  %2670 = vmatpush3.bf16.msra.mxu0 %v3022_v29  ;;  %v3098_v29 = vld [vmem:[%s3582_s5 + $0x1d0] sm:$0xff]  }
  0x95   : > { %2956 = vmatprep.subr.bf16.mxu1 %v3023_v30  ;;  %2671 = vmatprep.subr.bf16.mxu0 %v3023_v30  ;;  %v3099_v30 = vld [vmem:[%s3974_s0 + $0x9c] ss:$36 sps:$4 sm:$0xff]  }
  0x98   : > { %2964 = vmatpush3.bf16.msra.mxu1 %v3024_v31  ;;  %2672 = vmatpush3.bf16.msra.mxu0 %v3024_v31  ;;  %v3101_v31 = vld [vmem:[%s3582_s5 + $0x190] sm:$0xff]  }
  0x99   : > { %2957 = vmatprep.subr.bf16.mxu1 %v3025_v32  ;;  %2673 = vmatprep.subr.bf16.mxu0 %v3025_v32  ;;  %v3103_v32 = vld [vmem:[%s3974_s0 + $0xa4] ss:$36 sps:$4 sm:$0xff]  }
  0x9c   : > { %2965 = vmatpush3.bf16.msra.mxu1 %v3026_v33  ;;  %2674 = vmatpush3.bf16.msra.mxu0 %v3026_v33  ;;  %v3106_v33 = vld [vmem:[%s3582_s5 + $0x210] sm:$0xff]  }
  0x9d   : > { %2717 = vmatprep.subr.bf16.mxu1 %v3030_v34  ;;  %2775 = vmatprep.subr.bf16.mxu0 %v3035_v37  ;;  %v3107_v34 = vld [vmem:[%s3582_s5 + $0x1d8] sm:$0xff]  }
  0x9e   : > { %v3102_v37 = vld [vmem:[%s3974_s0 + $0x98] ss:$36 sps:$4 sm:$0xff]  }
  0x9f   : > { %1886 = vmatmul.mubr.bf16.vlgmr.msra.gmra.mrb[0].mxu1 %v3027_v35  ;;  %1854 = vmatmul.mubr.bf16.vlgmr.msra.gmra.mrb[0].mxu0 %v3031_v36  ;;  %v3108_v35 = vld [vmem:[%s3582_s5 + $0x198] sm:$0xff]  }
  0xa0   : > { %2718 = vmatpush3.bf16.msra.mxu1 %v3034_v38  ;;  %2776 = vmatpush3.bf16.msra.mxu0 %v3036_v39  ;;  %v3115_v36 = vld [vmem:[%s3582_s5 + $0x218] sm:$0xff]   ;;  %v3116_v38 = vld [vmem:[%s3582_s5 + $0x1e0] sm:$0xff]  }
  0xa1   : > { %2719 = vmatprep.subr.bf16.mxu1 %v3037_v40  ;;  %2777 = vmatprep.subr.bf16.mxu0 %v3039_v42  ;;  %v3105_v39 = vld [vmem:[%s3974_s0 + $0xa0] ss:$36 sps:$4 sm:$0xff]  }
  0xa2   : > { %1861 = vmatprep.mubr.bf16.mxu0 %v3042_v41  ;;  %1893 = vmatprep.mubr.bf16.mxu1 %v3049_v43  ;;  %v3109_v40 = vld [vmem:[%s3974_s0 + $0xe4] ss:$36 sps:$4 sm:$0xff]   ;;  %v3112_v41 = vld [vmem:[%s3974_s0 + $0xec] ss:$36 sps:$4 sm:$0xff]  }
  0xa3   : > { %v3117_v42 = vld [vmem:[%s3582_s5 + $0x1a0] sm:$0xff]  }
  0xa4   : > { %2720 = vmatpush3.bf16.msra.mxu1 %v3038_v44  ;;  %2778 = vmatpush3.bf16.msra.mxu0 %v3040_v45  ;;  %v3124_v43 = vld [vmem:[%s3582_s5 + $0x220] sm:$0xff]   ;;  %v3125_v44 = vld [vmem:[%s3582_s5 + $0x1e8] sm:$0xff]  }
  0xa5   : > { %2721 = vmatprep.subr.bf16.mxu1 %v3041_v46  ;;  %2779 = vmatprep.subr.bf16.mxu0 %v3046_v48  ;;  %v3111_v45 = vld [vmem:[%s3974_s0 + $0xe0] ss:$36 sps:$4 sm:$0xff]   ;;  %v3114_v46 = vld [vmem:[%s3974_s0 + $0xe8] ss:$36 sps:$4 sm:$0xff]  }
  0xa6   : > { %v3118_v48 = vld [vmem:[%s3974_s0 + $0x12c] ss:$36 sps:$4 sm:$0xff]  }
  0xa7   : > { %1862 = vmatmul.mubr.bf16.gmra.mrb[4].mxu0 %v3045_v47  ;;  %1894 = vmatmul.mubr.bf16.gmra.mrb[4].mxu1 %v3052_v51  ;;  %v3126_v47 = vld [vmem:[%s3582_s5 + $0x1a8] sm:$0xff]   ;;  %v3134_v51 = vld [vmem:[%s3582_s5 + $0x1f0] sm:$0xff]  }
  0xa8   : > { %2722 = vmatpush3.bf16.msra.mxu1 %v3044_v49  ;;  %2780 = vmatpush3.bf16.msra.mxu0 %v3047_v50  ;;  %v3132_v49 = vld [vmem:[%s3582_s5 + $0x228] sm:$0xff]   ;;  %v3121_v50 = vld [vmem:[%s3974_s0 + $0x134] ss:$36 sps:$4 sm:$0xff]  }
  0xa9   : > { %2723 = vmatprep.subr.bf16.mxu1 %v3048_v52  ;;  %2781 = vmatprep.subr.bf16.mxu0 %v3053_v53  ;;  %v3135_v52 = vld [vmem:[%s3582_s5 + $0x1b0] sm:$0xff]  }
  0xaa   : > { %1869 = vmatprep.mubr.bf16.mxu0 %v3056_v55  ;;  %1901 = vmatprep.mubr.bf16.mxu1 %v3063_v56  ;;  %v3139_v53 = vld [vmem:[%s3582_s5 + $0x230] sm:$0xff]  }
  0xab   : > { %v3123_v55 = vld [vmem:[%s3974_s0 + $0x130] ss:$36 sps:$4 sm:$0xff]  }
  0xac   : > { %2724 = vmatpush3.bf16.msra.mxu1 %v3051_v54  ;;  %2782 = vmatpush3.bf16.msra.mxu0 %v3054_v57  ;;  %v3120_v54 = vld [vmem:[%s3974_s0 + $0x128] ss:$36 sps:$4 sm:$0xff]   ;;  %v3127_v56 = vld [vmem:[%s3974_s0 + $0x174] ss:$36 sps:$4 sm:$0xff]  }
  0xad   : > { %2725 = vmatprep.subr.bf16.mxu1 %v3055_v58  ;;  %2783 = vmatprep.subr.bf16.mxu0 %v3060_v60  ;;  %v3142_v57 = vld [vmem:[%s3582_s5 + $0x1f8] sm:$0xff]  }
  0xae   : > { %v3144_v58 = vld [vmem:[%s3582_s5 + $0x1b8] sm:$0xff]  }
  0xaf   : > { %1870 = vmatmul.mubr.bf16.gmra.mrb[8].mxu0 %v3059_v59  ;;  %1902 = vmatmul.mubr.bf16.gmra.mrb[8].mxu1 %v3066_v63  ;;  %v3130_v59 = vld [vmem:[%s3974_s0 + $0x17c] ss:$36 sps:$4 sm:$0xff]  }
  0xb0   : > { %2726 = vmatpush3.bf16.msra.mxu1 %v3058_v61  ;;  %2784 = vmatpush3.bf16.msra.mxu0 %v3061_v62  ;;  %v3148_v60 = vld [vmem:[%s3582_s5 + $0x238] sm:$0xff]   ;;  %v3129_v61 = vld [vmem:[%s3974_s0 + $0x170] ss:$36 sps:$4 sm:$0xff]  }
  0xb1   : > { %2727 = vmatprep.subr.bf16.mxu1 %v3062_v0  ;;  %2785 = vmatprep.subr.bf16.mxu0 %v3067_v1  ;;  %v3133_v62 = vld [vmem:[%s3974_s0 + $0x178] ss:$36 sps:$4 sm:$0xff]   ;;  %v3140_v0 = vld [vmem:[%s3974_s0 + $0x1c4] ss:$36 sps:$4 sm:$0xff]  }
  0xb2   : > { %1877 = vmatprep.mubr.bf16.mxu0 %v3070_v3  ;;  %1942 = vmatprep.mubr.bf16.mxu1 %v3081_v8  ;;  %v3136_v63 = vld [vmem:[%s3974_s0 + $0x1bc] ss:$36 sps:$4 sm:$0xff]   ;;  %v3153_v8 = vld [vmem:[%s3974_s0 + $0x68] ss:$36 sps:$4 sm:$0xff]  }
  0xb3   : > { %v3138_v1 = vld [vmem:[%s3974_s0 + $0x1b8] ss:$36 sps:$4 sm:$0xff]  }
  0xb4   : > { %2728 = vmatpush3.bf16.msra.mxu1 %v3065_v2  ;;  %2786 = vmatpush3.bf16.msra.mxu0 %v3068_v4  ;;  %v3143_v2 = vld [vmem:[%s3974_s0 + $0x1c0] ss:$36 sps:$4 sm:$0xff]   ;;  %v3145_v4 = vld [vmem:[%s3974_s0 + $0x18] ss:$36 sps:$4 sm:$0xff]  }
  0xb5   : > { %2729 = vmatprep.subr.bf16.mxu1 %v3069_v5  ;;  %2787 = vmatprep.subr.bf16.mxu0 %v3074_v6  ;;  %v3147_v3 = vld [vmem:[%s3974_s0 + $0x1c] ss:$36 sps:$4 sm:$0xff]   ;;  %v3150_v6 = vld [vmem:[%s3974_s0 + $0x64] ss:$36 sps:$4 sm:$0xff]  }
  0xb6   : > { %v3149_v5 = vld [vmem:[%s3974_s0 + $0x20] ss:$36 sps:$4 sm:$0xff]  }
  0xb7   : > { %1878 = vmatmul.mubr.bf16.gmra.mrb[12].mxu0 %v3073_v9  ;;  %v3154_v9 = vld [vmem:[%s3974_s0 + $0xac] ss:$36 sps:$4 sm:$0xff]  }
  0xb8   : > { %2730 = vmatpush3.bf16.msra.mxu1 %v3072_v7  ;;  %2788 = vmatpush3.bf16.msra.mxu0 %v3075_v10  ;;  %v3152_v7 = vld [vmem:[%s3974_s0 + $0x60] ss:$36 sps:$4 sm:$0xff]   ;;  %v3156_v10 = vld [vmem:[%s3974_s0 + $0xa8] ss:$36 sps:$4 sm:$0xff]  }
  0xb9   : > { %2731 = vmatprep.subr.bf16.mxu1 %v3076_v11  ;;  %2789 = vmatprep.subr.bf16.mxu0 %v3078_v12  ;;  %v3157_v11 = vld [vmem:[%s3974_s0 + $0xb0] ss:$36 sps:$4 sm:$0xff]  }
  0xba   : > { %2031 = vmatprep.mubr.bf16.mxu0 %v3086_v13  ;;  %v3158_v12 = vld [vmem:[%s3974_s0 + $0xf4] ss:$36 sps:$4 sm:$0xff]  }
  0xbb   : > { %v3160_v13 = vld [vmem:[%s3974_s0 + $0xf0] ss:$36 sps:$4 sm:$0xff]  }
  0xbc   : > { %2732 = vmatpush3.bf16.msra.mxu1 %v3077_v14  ;;  %2790 = vmatpush3.bf16.msra.mxu0 %v3082_v15  ;;  %v3161_v14 = vld [vmem:[%s3974_s0 + $0xf8] ss:$36 sps:$4 sm:$0xff]  }
  0xbd   : > { %2833 = vmatprep.subr.bf16.mxu1 %v3083_v17  ;;  %2906 = vmatprep.subr.bf16.mxu0 %v3214_v22  ;;  %v3162_v15 = vld [vmem:[%s3974_s0 + $0x13c] ss:$36 sps:$4 sm:$0xff]  }
  0xbe   : > { %v3165_v17 = vld [vmem:[%s3974_s0 + $0x140] ss:$36 sps:$4 sm:$0xff]  }
  0xbf   : > { %1943 = vmatmul.mubr.bf16.vlgmr.msra.gmra.mrb[12].mxu1 %v3079_v16  ;;  %2032 = vmatmul.mubr.bf16.vlgmr.msra.gmra.mrb[16].mxu0 %v3084_v18  ;;  %v3164_v16 = vld [vmem:[%s3974_s0 + $0x138] ss:$36 sps:$4 sm:$0xff]   ;;  %v3166_v18 = vld [vmem:[%s3974_s0 + $0x184] ss:$36 sps:$4 sm:$0xff]  }
  0xc0   : > { %2834 = vmatpush3.bf16.msra.mxu1 %v3087_v19  ;;  %2907 = vmatpush3.bf16.msra.mxu0 %v3088_v20  ;;  %v3168_v19 = vld [vmem:[%s3974_s0 + $0x180] ss:$36 sps:$4 sm:$0xff]   ;;  %v3169_v20 = vld [vmem:[%s3974_s0 + $0x188] ss:$36 sps:$4 sm:$0xff]  }
  0xc1   : > { %1950 = vmatprep.mubr.bf16.mxu1 %v3089_v21  ;;  %2835 = vmatprep.subr.bf16.mxu1 %v3091_v23  ;;  %v3170_v21 = vld [vmem:[%s3974_s0 + $0x1cc] ss:$36 sps:$4 sm:$0xff]  }
  0xc2   : > { %2039 = vmatprep.mubr.bf16.mxu0 %v3094_v24  ;;  %2908 = vmatprep.subr.bf16.mxu0 %v3214_v22  ;;  %v3172_v23 = vld [vmem:[%s3974_s0 + $0x1c8] ss:$36 sps:$4 sm:$0xff]   ;;  %v3173_v24 = vld [vmem:[%s3974_s0 + $0x1d0] ss:$36 sps:$4 sm:$0xff]  }
  0xc4   : > { %2836 = vmatpush3.bf16.msra.mxu1 %v3093_v25  ;;  %2909 = vmatpush3.bf16.msra.mxu0 %v3097_v26 }
  0xc5   : > { %2837 = vmatprep.subr.bf16.mxu1 %v3098_v29  ;;  %2910 = vmatprep.subr.bf16.mxu0 %v3214_v22 }
  0xc7   : > { %1951 = vmatmul.mubr.bf16.gmra.mrb[16].mxu1 %v3092_v27  ;;  %2040 = vmatmul.mubr.bf16.gmra.mrb[20].mxu0 %v3096_v28 }
  0xc8   : > { %1958 = vmatprep.mubr.bf16.mxu1 %v3099_v30  ;;  %2838 = vmatpush3.bf16.msra.mxu1 %v3101_v31 }
  0xc9   : > { %2047 = vmatprep.mubr.bf16.mxu0 %v3103_v32  ;;  %2911 = vmatpush3.bf16.msra.mxu0 %v3106_v33 }
  0xca   : > { %2839 = vmatprep.subr.bf16.mxu1 %v3107_v34  ;;  %2912 = vmatprep.subr.bf16.mxu0 %v3214_v22 }
  0xcc   : > { %2840 = vmatpush3.bf16.msra.mxu1 %v3108_v35 }
  0xcd   : > { %2913 = vmatpush3.bf16.msra.mxu0 %v3115_v36  ;;  %2841 = vmatprep.subr.bf16.mxu1 %v3116_v38 }
  0xce   : > { %2914 = vmatprep.subr.bf16.mxu0 %v3214_v22 }
  0xcf   : > { %1959 = vmatmul.mubr.bf16.gmra.mrb[20].mxu1 %v3102_v37  ;;  %2048 = vmatmul.mubr.bf16.gmra.mrb[24].mxu0 %v3105_v39 }
  0xd0   : > { %1966 = vmatprep.mubr.bf16.mxu1 %v3109_v40  ;;  %2055 = vmatprep.mubr.bf16.mxu0 %v3112_v41 }
  0xd1   : > { %2842 = vmatpush3.bf16.msra.mxu1 %v3117_v42  ;;  %2915 = vmatpush3.bf16.msra.mxu0 %v3124_v43 }
  0xd2   : > { %2843 = vmatprep.subr.bf16.mxu1 %v3125_v44  ;;  %2916 = vmatprep.subr.bf16.mxu0 %v3214_v22 }
  0xd5   : > { %2844 = vmatpush3.bf16.msra.mxu1 %v3126_v47  ;;  %2917 = vmatpush3.bf16.msra.mxu0 %v3132_v49 }
  0xd6   : > { %2918 = vmatprep.subr.bf16.mxu0 %v3214_v22  ;;  %2845 = vmatprep.subr.bf16.mxu1 %v3134_v51 }
  0xd7   : > { %1967 = vmatmul.mubr.bf16.gmra.mrb[24].mxu1 %v3111_v45  ;;  %2056 = vmatmul.mubr.bf16.gmra.mrb[28].mxu0 %v3114_v46 }
  0xd8   : > { %1974 = vmatprep.mubr.bf16.mxu1 %v3118_v48  ;;  %2063 = vmatprep.mubr.bf16.mxu0 %v3121_v50 }
  0xd9   : > { %2846 = vmatpush3.bf16.msra.mxu1 %v3135_v52  ;;  %2919 = vmatpush3.bf16.msra.mxu0 %v3139_v53 }
  0xda   : > { %2920 = vmatprep.subr.bf16.mxu0 %v3214_v22  ;;  %2847 = vmatprep.subr.bf16.mxu1 %v3142_v57 }
  0xdd   : > { %2848 = vmatpush3.bf16.msra.mxu1 %v3144_v58  ;;  %2921 = vmatpush3.bf16.msra.mxu0 %v3148_v60 }
  0xdf   : > { %1975 = vmatmul.mubr.bf16.gmra.mrb[28].mxu1 %v3120_v54  ;;  %2064 = vmatmul.mubr.bf16.gmra.mrb[32].mxu0 %v3123_v55 }
  0xe0   : > { %1982 = vmatprep.mubr.bf16.mxu1 %v3127_v56  ;;  %2071 = vmatprep.mubr.bf16.mxu0 %v3130_v59 }
  0xe7   : > { %1983 = vmatmul.mubr.bf16.gmra.mrb[32].mxu1 %v3129_v61  ;;  %2072 = vmatmul.mubr.bf16.gmra.mrb[36].mxu0 %v3133_v62 }
  0xe8   : > { %1990 = vmatprep.mubr.bf16.mxu1 %v3136_v63  ;;  %2079 = vmatprep.mubr.bf16.mxu0 %v3140_v0 }
  0xef   : > { %1991 = vmatmul.mubr.bf16.gmra.mrb[36].mxu1 %v3138_v1  ;;  %2080 = vmatmul.mubr.bf16.gmra.mrb[40].mxu0 %v3143_v2 }
  0xf0   : > { %2120 = vmatprep.mubr.bf16.mxu1 %v3147_v3  ;;  %2922 = vmatprep.mubr.msk.bf16.mxu0 %vm3215_vm0, %v3214_v22 }
  0xf7   : > { %2121 = vmatmul.mubr.bf16.vlgmr.msra.gmra.mrb[40].mxu1 %v3145_v4  ;;  %2923 = vmatmul.mubr.bf16.vlgmr.msra.gmra.mrb[44].mxu0 %v3149_v5 }
  0xf8   : > { %2128 = vmatprep.mubr.bf16.mxu1 %v3150_v6  ;;  %2926 = vmatprep.mubr.msk.bf16.mxu0 %vm3215_vm0, %v3214_v22 }
  0xff   : > { %2129 = vmatmul.mubr.bf16.gmra.mrb[44].mxu1 %v3152_v7  ;;  %2927 = vmatmul.mubr.bf16.gmra.mrb[48].mxu0 %v3153_v8 }
 0x100   : > { %2136 = vmatprep.mubr.bf16.mxu1 %v3154_v9  ;;  %2930 = vmatprep.mubr.msk.bf16.mxu0 %vm3215_vm0, %v3214_v22 }
 0x107   : > { %2137 = vmatmul.mubr.bf16.gmra.mrb[48].mxu1 %v3156_v10  ;;  %2931 = vmatmul.mubr.bf16.gmra.mrb[52].mxu0 %v3157_v11 }
 0x108   : > { %2144 = vmatprep.mubr.bf16.mxu1 %v3158_v12  ;;  %2934 = vmatprep.mubr.msk.bf16.mxu0 %vm3215_vm0, %v3214_v22 }
 0x10f   : > { %2145 = vmatmul.mubr.bf16.gmra.mrb[52].mxu1 %v3160_v13  ;;  %2935 = vmatmul.mubr.bf16.gmra.mrb[56].mxu0 %v3161_v14 }
 0x110   : > { %2152 = vmatprep.mubr.bf16.mxu1 %v3162_v15  ;;  %2938 = vmatprep.mubr.msk.bf16.mxu0 %vm3215_vm0, %v3214_v22 }
 0x117   : > { %2153 = vmatmul.mubr.bf16.gmra.mrb[56].mxu1 %v3164_v16  ;;  %2939 = vmatmul.mubr.bf16.gmra.mrb[60].mxu0 %v3165_v17 }
 0x118   : > { %2160 = vmatprep.mubr.bf16.mxu1 %v3166_v18  ;;  %2942 = vmatprep.mubr.msk.bf16.mxu0 %vm3215_vm0, %v3214_v22 }
 0x11f   : > { %2161 = vmatmul.mubr.bf16.gmra.mrb[60].mxu1 %v3168_v19  ;;  %2943 = vmatmul.mubr.bf16.gmra.mrb[64].mxu0 %v3169_v20 }
 0x120   : > { %2168 = vmatprep.mubr.bf16.mxu1 %v3170_v21  ;;  %2946 = vmatprep.mubr.msk.bf16.mxu0 %vm3215_vm0, %v3214_v22 }
 0x127   : > { %2169 = vmatmul.mubr.bf16.gmra.mrb[64].mxu1 %v3172_v23  ;;  %2947 = vmatmul.mubr.bf16.gmra.mrb[68].mxu0 %v3173_v24 }
 0x172   : > { %v2699_v25 = vpop.f32.mrb[0].mxu1  ;;  %v2675_v26 = vpop.f32.mrb[0].mxu0 }
 0x173   : > { %v2700_v27 = vpop.f32.mrb[1].mxu1  ;;  %v2676_v28 = vpop.f32.mrb[1].mxu0 }
 0x174   : > { %v3861_v29 = vadd.f32 %v2700_v27, %v2699_v25  ;;  %v2702_v30 = vpop.f32.mrb[2].mxu1  ;;  %v2677_v31 = vadd.f32 %v2676_v28, %v2675_v26  ;;  %v2678_v32 = vpop.f32.mrb[2].mxu0 }
 0x175   : > { %v2703_v22 = vpop.f32.mrb[3].mxu1  ;;  %v2679_v33 = vpop.f32.mrb[3].mxu0 }
 0x176   : > { %v3863_v34 = vadd.f32 %v2703_v22, %v2702_v30  ;;  %v2680_v35 = vadd.f32 %v2679_v33, %v2678_v32 }
 0x17a   : > { %v2681_v36 = vpop.f32.mrb[4].mxu0  ;;  %v2705_v37 = vpop.f32.mrb[4].mxu1 }
 0x17b   : > { %v2682_v38 = vpop.f32.mrb[5].mxu0  ;;  %v2706_v39 = vpop.f32.mrb[5].mxu1 }
 0x17c   : > { %v2683_v40 = vadd.f32 %v2682_v38, %v2681_v36  ;;  %v2684_v41 = vpop.f32.mrb[6].mxu0  ;;  %v3865_v42 = vadd.f32 %v2706_v39, %v2705_v37  ;;  %v2708_v43 = vpop.f32.mrb[6].mxu1 }
 0x17d   : > { %v2685_v44 = vpop.f32.mrb[7].mxu0  ;;  %v2709_v45 = vpop.f32.mrb[7].mxu1 }
 0x17e   : > { %v2686_v46 = vadd.f32 %v2685_v44, %v2684_v41  ;;  %v3867_v47 = vadd.f32 %v2709_v45, %v2708_v43 }
 0x182   : > { %v2687_v48 = vpop.f32.mrb[8].mxu0  ;;  %v2711_v49 = vpop.f32.mrb[8].mxu1 }
 0x183   : > { %v2688_v50 = vpop.f32.mrb[9].mxu0  ;;  %v2712_v51 = vpop.f32.mrb[9].mxu1 }
 0x184   : > { %v2689_v52 = vadd.f32 %v2688_v50, %v2687_v48  ;;  %v2690_v53 = vpop.f32.mrb[10].mxu0  ;;  %v3869_v54 = vadd.f32 %v2712_v51, %v2711_v49  ;;  %v2714_v55 = vpop.f32.mrb[10].mxu1 }
 0x185   : > { %v2691_v56 = vpop.f32.mrb[11].mxu0  ;;  %v2715_v57 = vpop.f32.mrb[11].mxu1 }
 0x186   : > { %v2692_v58 = vadd.f32 %v2691_v56, %v2690_v53  ;;  %v3871_v59 = vadd.f32 %v2715_v57, %v2714_v55 }
 0x18a   : > { %v2693_v60 = vpop.f32.mrb[12].mxu0 }
 0x18b   : > { %v2694_v61 = vpop.f32.mrb[13].mxu0 }
 0x18c   : > { %v2695_v62 = vadd.f32 %v2694_v61, %v2693_v60  ;;  %v2696_v63 = vpop.f32.mrb[14].mxu0 }
 0x18d   : > { %v2697_v0 = vpop.f32.mrb[15].mxu0 }
 0x18e   : > { %v2698_v1 = vadd.f32 %v2697_v0, %v2696_v63 }
 0x192   : > { %v2733_v2 = vpop.f32.mrb[12].mxu1  ;;  %v2791_v3 = vpop.f32.mrb[16].mxu0 }
 0x193   : > { %v2734_v4 = vpop.f32.mrb[13].mxu1  ;;  %v2792_v5 = vpop.f32.mrb[17].mxu0 }
 0x194   : > { %v2735_v6 = vadd.f32 %v2734_v4, %v2733_v2  ;;  %v2736_v7 = vpop.f32.mrb[14].mxu1  ;;  %v2793_v8 = vadd.f32 %v2792_v5, %v2791_v3  ;;  %v2794_v9 = vpop.f32.mrb[18].mxu0 }
 0x195   : > { %v2737_v10 = vpop.f32.mrb[15].mxu1  ;;  %v2795_v11 = vpop.f32.mrb[19].mxu0 }
 0x196   : > { %v1945_v12 = vadd.f32 %v2735_v6, %v2677_v31  ;;  %v2738_v13 = vadd.f32 %v2737_v10, %v2736_v7  ;;  %v2796_v14 = vadd.f32 %v2795_v11, %v2794_v9 }
 0x198   : > { %v1948_v15 = vadd.f32 %v2738_v13, %v2680_v35  ;;  %v3873_v16 = vadd.f32 %v2793_v8, %v1945_v12 }
 0x19a   : > { %v3875_v17 = vadd.f32 %v2796_v14, %v1948_v15  ;;  %v2739_v18 = vpop.f32.mrb[16].mxu1  ;;  %v2797_v19 = vpop.f32.mrb[20].mxu0 }
 0x19b   : > { %v2740_v20 = vpop.f32.mrb[17].mxu1  ;;  %v2798_v21 = vpop.f32.mrb[21].mxu0 }
 0x19c   : > { %v2741_v23 = vadd.f32 %v2740_v20, %v2739_v18  ;;  %v2742_v24 = vpop.f32.mrb[18].mxu1  ;;  %v2799_v25 = vadd.f32 %v2798_v21, %v2797_v19  ;;  %v2800_v26 = vpop.f32.mrb[22].mxu0 }
 0x19d   : > { %v2743_v27 = vpop.f32.mrb[19].mxu1  ;;  %v2801_v28 = vpop.f32.mrb[23].mxu0 }
 0x19e   : > { %v1953_v30 = vadd.f32 %v2741_v23, %v2683_v40  ;;  %v2744_v32 = vadd.f32 %v2743_v27, %v2742_v24  ;;  %v2802_v31 = vadd.f32 %v2801_v28, %v2800_v26 }
 0x1a0   : > { %v1956_v22 = vadd.f32 %v2744_v32, %v2686_v46  ;;  %v3877_v33 = vadd.f32 %v2799_v25, %v1953_v30 }
 0x1a2   : > { %v3879_v35 = vadd.f32 %v2802_v31, %v1956_v22  ;;  %v2745_v36 = vpop.f32.mrb[20].mxu1  ;;  %v2803_v37 = vpop.f32.mrb[24].mxu0 }
 0x1a3   : > { %v2746_v38 = vpop.f32.mrb[21].mxu1  ;;  %v2804_v39 = vpop.f32.mrb[25].mxu0 }
 0x1a4   : > { %v2747_v41 = vadd.f32 %v2746_v38, %v2745_v36  ;;  %v2748_v43 = vpop.f32.mrb[22].mxu1  ;;  %v2805_v44 = vadd.f32 %v2804_v39, %v2803_v37  ;;  %v2806_v45 = vpop.f32.mrb[26].mxu0 }
 0x1a5   : > { %v2749_v48 = vpop.f32.mrb[23].mxu1  ;;  %v2807_v49 = vpop.f32.mrb[27].mxu0 }
 0x1a6   : > { %v1961_v50 = vadd.f32 %v2747_v41, %v2689_v52  ;;  %v2750_v51 = vadd.f32 %v2749_v48, %v2748_v43  ;;  %v2808_v40 = vadd.f32 %v2807_v49, %v2806_v45 }
 0x1a8   : > { %v1964_v53 = vadd.f32 %v2750_v51, %v2692_v58  ;;  %v3881_v55 = vadd.f32 %v2805_v44, %v1961_v50 }
 0x1aa   : > { %v3883_v46 = vadd.f32 %v2808_v40, %v1964_v53  ;;  %v2751_v56 = vpop.f32.mrb[24].mxu1  ;;  %v2809_v57 = vpop.f32.mrb[28].mxu0 }
 0x1ab   : > { %v2752_v60 = vpop.f32.mrb[25].mxu1  ;;  %v2810_v61 = vpop.f32.mrb[29].mxu0 }
 0x1ac   : > { %v2753_v63 = vadd.f32 %v2752_v60, %v2751_v56  ;;  %v2754_v0 = vpop.f32.mrb[26].mxu1  ;;  %v2811_v2 = vadd.f32 %v2810_v61, %v2809_v57  ;;  %v2812_v3 = vpop.f32.mrb[30].mxu0 }
 0x1ad   : > { %v2755_v4 = vpop.f32.mrb[27].mxu1  ;;  %v2813_v5 = vpop.f32.mrb[31].mxu0 }
 0x1ae   : > { %v1969_v6 = vadd.f32 %v2753_v63, %v2695_v62  ;;  %v2756_v7 = vadd.f32 %v2755_v4, %v2754_v0  ;;  %v2814_v52 = vadd.f32 %v2813_v5, %v2812_v3 }
 0x1b0   : > { %v1972_v8 = vadd.f32 %v2756_v7, %v2698_v1  ;;  %v3885_v9 = vadd.f32 %v2811_v2, %v1969_v6 }
 0x1b2   : > { %v3887_v58 = vadd.f32 %v2814_v52, %v1972_v8  ;;  %v2757_v10 = vpop.f32.mrb[28].mxu1  ;;  %v2815_v11 = vpop.f32.mrb[32].mxu0 }
 0x1b3   : > { %v2758_v12 = vpop.f32.mrb[29].mxu1  ;;  %v2816_v13 = vpop.f32.mrb[33].mxu0 }
 0x1b4   : > { %v2759_v14 = vadd.f32 %v2758_v12, %v2757_v10  ;;  %v2760_v15 = vpop.f32.mrb[30].mxu1  ;;  %v2817_v18 = vadd.f32 %v2816_v13, %v2815_v11  ;;  %v2818_v19 = vpop.f32.mrb[34].mxu0 }
 0x1b5   : > { %v2761_v20 = vpop.f32.mrb[31].mxu1  ;;  %v2819_v21 = vpop.f32.mrb[35].mxu0 }
 0x1b6   : > { %v1977_v23 = vadd.f32 %v2759_v14, %v3861_v29  ;;  %v2762_v62 = vadd.f32 %v2761_v20, %v2760_v15  ;;  %v2820_v24 = vadd.f32 %v2819_v21, %v2818_v19 }
 0x1b8   : > { %v1980_v1 = vadd.f32 %v2762_v62, %v3863_v34  ;;  %v3891_v25 = vadd.f32 %v2817_v18, %v1977_v23 }
 0x1ba   : > { %v3893_v26 = vadd.f32 %v2820_v24, %v1980_v1  ;;  %v2763_v27 = vpop.f32.mrb[32].mxu1  ;;  %v2821_v28 = vpop.f32.mrb[36].mxu0 }
 0x1bb   : > { %v2764_v30 = vpop.f32.mrb[33].mxu1  ;;  %v2822_v32 = vpop.f32.mrb[37].mxu0 }
 0x1bc   : > { %v2765_v31 = vadd.f32 %v2764_v30, %v2763_v27  ;;  %v2766_v22 = vpop.f32.mrb[34].mxu1  ;;  %v2823_v36 = vadd.f32 %v2822_v32, %v2821_v28  ;;  %v2824_v37 = vpop.f32.mrb[38].mxu0 }
 0x1bd   : > { %v2767_v38 = vpop.f32.mrb[35].mxu1  ;;  %v2825_v39 = vpop.f32.mrb[39].mxu0 }
 0x1be   : > { %v1985_v29 = vadd.f32 %v2765_v31, %v3865_v42  ;;  %v2768_v41 = vadd.f32 %v2767_v38, %v2766_v22  ;;  %v2826_v43 = vadd.f32 %v2825_v39, %v2824_v37 }
 0x1c0   : > { %v1988_v34 = vadd.f32 %v2768_v41, %v3867_v47  ;;  %v3897_v44 = vadd.f32 %v2823_v36, %v1985_v29 }
 0x1c2   : > { %v3899_v45 = vadd.f32 %v2826_v43, %v1988_v34  ;;  %v2769_v48 = vpop.f32.mrb[36].mxu1  ;;  %v2827_v49 = vpop.f32.mrb[40].mxu0 }
 0x1c3   : > { %v2770_v50 = vpop.f32.mrb[37].mxu1  ;;  %v2828_v51 = vpop.f32.mrb[41].mxu0 }
 0x1c4   : > { %v2771_v40 = vadd.f32 %v2770_v50, %v2769_v48  ;;  %v2772_v53 = vpop.f32.mrb[38].mxu1  ;;  %v2829_v56 = vadd.f32 %v2828_v51, %v2827_v49  ;;  %v2830_v57 = vpop.f32.mrb[42].mxu0 }
 0x1c5   : > { %v2773_v60 = vpop.f32.mrb[39].mxu1  ;;  %v2831_v61 = vpop.f32.mrb[43].mxu0 }
 0x1c6   : > { %v1993_v42 = vadd.f32 %v2771_v40, %v3869_v54  ;;  %v2774_v63 = vadd.f32 %v2773_v60, %v2772_v53  ;;  %v2832_v0 = vadd.f32 %v2831_v61, %v2830_v57 }
 0x1c8   : > { %v1996_v47 = vadd.f32 %v2774_v63, %v3871_v59  ;;  %v3903_v2 = vadd.f32 %v2829_v56, %v1993_v42 }
 0x1ca   : > { %v3905_v3 = vadd.f32 %v2832_v0, %v1996_v47  ;;  %v2849_v4 = vpop.f32.mrb[40].mxu1  ;;  %v2211_v5 = vpop.f32.mrb[44].mxu0 }
 0x1cb   : > { %v2850_v6 = vpop.f32.mrb[41].mxu1  ;;  %v2924_v7 = vpop.f32.mrb[45].mxu0 }
 0x1cc   : > { %v2851_v52 = vadd.f32 %v2850_v6, %v2849_v4  ;;  %v2852_v8 = vpop.f32.mrb[42].mxu1  ;;  %v2214_v10 = vpop.f32.mrb[46].mxu0 }
 0x1cd   : > { %v2853_v11 = vpop.f32.mrb[43].mxu1  ;;  %v2925_v12 = vpop.f32.mrb[47].mxu0 }
 0x1ce   : > { %v2854_v54 = vadd.f32 %v2853_v11, %v2852_v8  ;;  %v2123_v13 = vadd.f32 %v2851_v52, %v3873_v16 }
 0x1d0   : > { %v2212_v14 = vadd.f32 %v2211_v5, %v2123_v13  ;;  %v2126_v59 = vadd.f32 %v2854_v54, %v3875_v17 }
 0x1d2   : > { %2311 = vst [vmem:[%s3911_s26] sm:$0xff] %v2212_v14  ;;  %v2215_v15 = vadd.f32 %v2214_v10, %v2126_v59  ;;  %v2855_v18 = vpop.f32.mrb[44].mxu1  ;;  %v2219_v19 = vpop.f32.mrb[48].mxu0 }
 0x1d3   : > { %v2856_v20 = vpop.f32.mrb[45].mxu1  ;;  %v2928_v21 = vpop.f32.mrb[49].mxu0 }
 0x1d4   : > { %2312 = vst [vmem:[%s3911_s26 + $0x8] sm:$0xff] %v2215_v15  ;;  %v2857_v23 = vadd.f32 %v2856_v20, %v2855_v18  ;;  %v2858_v62 = vpop.f32.mrb[46].mxu1  ;;  %v2222_v24 = vpop.f32.mrb[50].mxu0 }
 0x1d5   : > { %v2859_v16 = vpop.f32.mrb[47].mxu1  ;;  %v2929_v1 = vpop.f32.mrb[51].mxu0 }
 0x1d6   : > { %v2860_v27 = vadd.f32 %v2859_v16, %v2858_v62  ;;  %v2131_v17 = vadd.f32 %v2857_v23, %v3877_v33 }
 0x1d8   : > { %v2220_v28 = vadd.f32 %v2219_v19, %v2131_v17  ;;  %v2134_v30 = vadd.f32 %v2860_v27, %v3879_v35 }
 0x1da   : > { %2313 = vst [vmem:[%s3911_s26 + $0x10] sm:$0xff] %v2220_v28  ;;  %v2223_v32 = vadd.f32 %v2222_v24, %v2134_v30  ;;  %v2861_v31 = vpop.f32.mrb[48].mxu1  ;;  %v2227_v22 = vpop.f32.mrb[52].mxu0 }
 0x1db   : > { %v2862_v36 = vpop.f32.mrb[49].mxu1  ;;  %v2932_v37 = vpop.f32.mrb[53].mxu0 }
 0x1dc   : > { %2314 = vst [vmem:[%s3911_s26 + $0x18] sm:$0xff] %v2223_v32  ;;  %v2863_v38 = vadd.f32 %v2862_v36, %v2861_v31  ;;  %v2864_v39 = vpop.f32.mrb[50].mxu1  ;;  %v2230_v29 = vpop.f32.mrb[54].mxu0 }
 0x1dd   : > { %v2865_v41 = vpop.f32.mrb[51].mxu1  ;;  %v2933_v43 = vpop.f32.mrb[55].mxu0 }
 0x1de   : > { %v2866_v34 = vadd.f32 %v2865_v41, %v2864_v39  ;;  %v2139_v33 = vadd.f32 %v2863_v38, %v3881_v55  ;;  %v2392_v43 = vld [vmem:[%s3911_s26 + $0x8] sm:$0xff] (%p3266_p6) }
 0x1df   : > { %2393 = vst [vmem:[%s2336_s29 + $0x10] sm:$0xff] (%p3266_p6), %v2392_v43 }
 0x1e0   : > { %v2228_v48 = vadd.f32 %v2227_v22, %v2139_v33  ;;  %v2142_v35 = vadd.f32 %v2866_v34, %v3883_v46 }
 0x1e2   : > { %2315 = vst [vmem:[%s3911_s26 + $0x20] sm:$0xff] %v2228_v48  ;;  %v2231_v49 = vadd.f32 %v2230_v29, %v2142_v35  ;;  %v2867_v50 = vpop.f32.mrb[52].mxu1  ;;  %v2235_v51 = vpop.f32.mrb[56].mxu0 }
 0x1e3   : > { %v2868_v40 = vpop.f32.mrb[53].mxu1  ;;  %v2936_v53 = vpop.f32.mrb[57].mxu0  ;;  %v2396_v34 = vld [vmem:[%s3911_s26 + $0x18] sm:$0xff] (%p3266_p6) }
 0x1e4   : > { %2316 = vst [vmem:[%s3911_s26 + $0x28] sm:$0xff] %v2231_v49  ;;  %v2869_v56 = vadd.f32 %v2868_v40, %v2867_v50  ;;  %v2870_v57 = vpop.f32.mrb[54].mxu1  ;;  %v2238_v60 = vpop.f32.mrb[58].mxu0  ;;  %2397 = vst [vmem:[%s2336_s29 + $0x30] sm:$0xff] (%p3266_p6), %v2396_v34 }
 0x1e5   : > { %v2871_v61 = vpop.f32.mrb[55].mxu1  ;;  %v2937_v42 = vpop.f32.mrb[59].mxu0 }
 0x1e6   : > { %v2872_v63 = vadd.f32 %v2871_v61, %v2870_v57  ;;  %v2147_v55 = vadd.f32 %v2869_v56, %v3885_v9 }
 0x1e8   : > { %v2236_v0 = vadd.f32 %v2235_v51, %v2147_v55  ;;  %v2150_v46 = vadd.f32 %v2872_v63, %v3887_v58 }
 0x1e9   : > { %v2398_v33 = vld [vmem:[%s3911_s26 + $0x20] sm:$0xff] (%p3266_p6) }
 0x1ea   : > { %2317 = vst [vmem:[%s3911_s26 + $0x30] sm:$0xff] %v2236_v0  ;;  %v2239_v47 = vadd.f32 %v2238_v60, %v2150_v46  ;;  %v2873_v4 = vpop.f32.mrb[56].mxu1  ;;  %v2243_v5 = vpop.f32.mrb[60].mxu0  ;;  %2399 = vst [vmem:[%s2336_s29 + $0x40] sm:$0xff] (%p3266_p6), %v2398_v33 }
 0x1eb   : > { %v2874_v6 = vpop.f32.mrb[57].mxu1  ;;  %v2940_v7 = vpop.f32.mrb[61].mxu0  ;;  %v2400_v48 = vld [vmem:[%s3911_s26 + $0x28] sm:$0xff] (%p3266_p6) }
 0x1ec   : > { %2318 = vst [vmem:[%s3911_s26 + $0x38] sm:$0xff] %v2239_v47  ;;  %v2875_v52 = vadd.f32 %v2874_v6, %v2873_v4  ;;  %v2876_v8 = vpop.f32.mrb[58].mxu1  ;;  %v2246_v10 = vpop.f32.mrb[62].mxu0  ;;  %2401 = vst [vmem:[%s2336_s29 + $0x50] sm:$0xff] (%p3266_p6), %v2400_v48 }
 0x1ed   : > { %v2877_v11 = vpop.f32.mrb[59].mxu1  ;;  %v2941_v12 = vpop.f32.mrb[63].mxu0 }
 0x1ee   : > { %v2878_v54 = vadd.f32 %v2877_v11, %v2876_v8  ;;  %v2155_v9 = vadd.f32 %v2875_v52, %v3891_v25 }
 0x1f0   : > { %v2244_v13 = vadd.f32 %v2243_v5, %v2155_v9  ;;  %v2158_v58 = vadd.f32 %v2878_v54, %v3893_v26 }
 0x1f1   : > { %v2402_v35 = vld [vmem:[%s3911_s26 + $0x30] sm:$0xff] (%p3266_p6) }
 0x1f2   : > { %2319 = vst [vmem:[%s3911_s26 + $0x40] sm:$0xff] %v2244_v13  ;;  %v2247_v14 = vadd.f32 %v2246_v10, %v2158_v58  ;;  %v2879_v59 = vpop.f32.mrb[60].mxu1  ;;  %v2251_v15 = vpop.f32.mrb[64].mxu0  ;;  %2403 = vst [vmem:[%s2336_s29 + $0x60] sm:$0xff] (%p3266_p6), %v2402_v35 }
 0x1f3   : > { %v2880_v18 = vpop.f32.mrb[61].mxu1  ;;  %v2944_v19 = vpop.f32.mrb[65].mxu0  ;;  %v2404_v49 = vld [vmem:[%s3911_s26 + $0x38] sm:$0xff] (%p3266_p6) }
 0x1f4   : > { %2320 = vst [vmem:[%s3911_s26 + $0x48] sm:$0xff] %v2247_v14  ;;  %v2881_v20 = vadd.f32 %v2880_v18, %v2879_v59  ;;  %v2882_v21 = vpop.f32.mrb[62].mxu1  ;;  %v2254_v23 = vpop.f32.mrb[66].mxu0  ;;  %2405 = vst [vmem:[%s2336_s29 + $0x70] sm:$0xff] (%p3266_p6), %v2404_v49 }
 0x1f5   : > { %v2883_v62 = vpop.f32.mrb[63].mxu1  ;;  %v2945_v24 = vpop.f32.mrb[67].mxu0 }
 0x1f6   : > { %v2884_v16 = vadd.f32 %v2883_v62, %v2882_v21  ;;  %v2163_v25 = vadd.f32 %v2881_v20, %v3897_v44 }
 0x1f8   : > { %v2252_v1 = vadd.f32 %v2251_v15, %v2163_v25  ;;  %v2166_v26 = vadd.f32 %v2884_v16, %v3899_v45 }
 0x1f9   : > { %v2406_v50 = vld [vmem:[%s3911_s26 + $0x40] sm:$0xff] (%p3266_p6) }
 0x1fa   : > { %2321 = vst [vmem:[%s3911_s26 + $0x50] sm:$0xff] %v2252_v1  ;;  %v2255_v27 = vadd.f32 %v2254_v23, %v2166_v26  ;;  %v2885_v17 = vpop.f32.mrb[64].mxu1  ;;  %v2259_v28 = vpop.f32.mrb[68].mxu0  ;;  %2407 = vst [vmem:[%s2336_s29 + $0x80] sm:$0xff] (%p3266_p6), %v2406_v50 }
 0x1fb   : > { %v2886_v30 = vpop.f32.mrb[65].mxu1  ;;  %v2948_v32 = vpop.f32.mrb[69].mxu0  ;;  %v2408_v51 = vld [vmem:[%s3911_s26 + $0x48] sm:$0xff] (%p3266_p6) }
 0x1fc   : > { %2322 = vst [vmem:[%s3911_s26 + $0x58] sm:$0xff] %v2255_v27  ;;  %v2887_v31 = vadd.f32 %v2886_v30, %v2885_v17  ;;  %v2888_v22 = vpop.f32.mrb[66].mxu1  ;;  %v2262_v36 = vpop.f32.mrb[70].mxu0  ;;  %2409 = vst [vmem:[%s2336_s29 + $0x90] sm:$0xff] (%p3266_p6), %v2408_v51 }
 0x1fd   : > { %v2889_v37 = vpop.f32.mrb[67].mxu1  ;;  %v2949_v38 = vpop.f32.mrb[71].mxu0 }
 0x1fe   : > { %v2890_v39 = vadd.f32 %v2889_v37, %v2888_v22  ;;  %v2171_v44 = vadd.f32 %v2887_v31, %v3903_v2  ;;  %2331 = sbr.rel (!%p3266_p6) target bundleno = 525 (0x20d), region = 81  ;;  %v2390_v2 = vld [vmem:[%s3911_s26] sm:$0xff] (%p3266_p6) }
 0x1ff   : > { %2391 = vst [vmem:[%s2336_s29] sm:$0xff] (%p3266_p6), %v2390_v2 }
 0x200   : > { %v2260_v29 = vadd.f32 %v2259_v28, %v2171_v44  ;;  %v2174_v45 = vadd.f32 %v2890_v39, %v3905_v3  ;;  %v2394_v3 = vld [vmem:[%s3911_s26 + $0x10] sm:$0xff] (%p3266_p6) }
 0x201   : > { %2395 = vst [vmem:[%s2336_s29 + $0x20] sm:$0xff] (%p3266_p6), %v2394_v3  ;;  %v2410_v40 = vld [vmem:[%s3911_s26 + $0x50] sm:$0xff] (%p3266_p6) }
 0x202   : > { %2323 = vst [vmem:[%s3911_s26 + $0x60] sm:$0xff] %v2260_v29  ;;  %v2263_v41 = vadd.f32 %v2262_v36, %v2174_v45  ;;  %2411 = vst [vmem:[%s2336_s29 + $0xa0] sm:$0xff] (%p3266_p6), %v2410_v40 }
 0x203   : > { %v2412_v53 = vld [vmem:[%s3911_s26 + $0x58] sm:$0xff] (%p3266_p6) }
 0x204   : > { %2324 = vst [vmem:[%s3911_s26 + $0x68] sm:$0xff] %v2263_v41  ;;  %2413 = vst [vmem:[%s2336_s29 + $0xb0] sm:$0xff] (%p3266_p6), %v2412_v53 }
 0x209   : > { %v2414_v56 = vld [vmem:[%s3911_s26 + $0x60] sm:$0xff] }
 0x20a   : > { %2415 = vst [vmem:[%s2336_s29 + $0xc0] sm:$0xff] %v2414_v56 }
 0x20b   : > { %v2416_v57 = vld [vmem:[%s3911_s26 + $0x68] sm:$0xff] }
 0x20c   : > { %2417 = vst [vmem:[%s2336_s29 + $0xd0] sm:$0xff] %v2416_v57 }
 0x20d PF: > { %s12_s13 = sadd.s32 1, %s3212_s13   ;;  %s3978_s9 = smov %s3200_s10 }
 0x20e   : > { %p9_p11 = scmp.ge.s32.totalorder %s12_s13, 4   ;;  %s3979_s10 = smov %s3271_s19 }
 0x20f   : > { %s3980_s11 = smov %s3208_s12  ;;  %s3981_s12 = smov %s3983_s14 }
 0x210   :  { %11 = sbr.rel (!%p9_p11) target bundleno = 3 (0x3), region = 153 }

// kernel: g_forward.5
= control target key start
LH: loop header
LB: loop body
LE: loop exit
PB: predicated region body
PF: predicated region fallthrough
CT: control target
= control target key end

     0   :  { %s1739_s9 = smov 0   ;;  %s1741_s10 = smov 0   ;;  %s2076_s0 = inlined_call_operand.vmem [shape: bf16[16,640], index: 0, kind: input, shape index: {}]   ;;  %s2077_s1 = inlined_call_operand.vmem [shape: bf16[640,512], index: 1, kind: input, shape index: {}]   ;;  %s2078_s2 = inlined_call_operand.vmem [shape: f32[16,512], index: 2, kind: output, shape index: {}]  }
   0x1   :  { %s1743_s11 = smov 0   ;;  %s1745_s12 = smov 0  }
   0x2   :  { %s1747_s13 = smov 0  }
   0x3 LB: > { %s27_s14 = sadd.s32 1, %s1717_s12  ;;  %s1388_s15 = sadd.s32 4294967295, %s1721_s13   ;;  %s1721_s13 = sphi %s1747_s13, %s12_s13   ;;  %s1717_s12 = sphi %s1745_s12, %s2083_s12   ;;  %s1713_s11 = sphi %s1743_s11, %s2082_s11   ;;  %s1709_s10 = sphi %s1741_s10, %s2081_s10   ;;  %s1705_s9 = sphi %s1739_s9, %s2080_s9  }
   0x4   : > { %p29_p0 = scmp.ge.s32.totalorder %s27_s14, 2  ;;  %p75_p1 = scmp.ne.s32.totalorder %s1709_s10, %s1705_s9 }
   0x5   : > { %p76_p2 = scmp.eq.s32.totalorder %s1721_s13, 0  ;;  %p107_p4 = scmp.eq.s32.totalorder %s1388_s15, 1 }
   0x6   : > { %s2085_s14 = smov (%p29_p0, %s27_s14), 0  ;;  %s68_s17 = sadd.s32 1, %s1709_s10 }
   0x7   : > { %p77_p3 = por %p76_p2, %p75_p1  ;;  %s64_s16 = ssub.s32 %s1717_s12, %s2085_s14 }
   0x8   : > { %p66_p5 = scmp.eq.s32.totalorder %s64_s16, 0  ;;  %p1774_p6 = por %p107_p4, %p75_p1 }
   0x9   : > { %p1392_p7 = scmp.ge.s32.totalorder %s1721_s13, 2 }
   0xa   : > { %s1779_s19 = scalar_select %p66_p5, %s1709_s10, %s68_s17  }
   0xb   : > { %144 = sbr.rel (%p1392_p7) target bundleno = 62 (0x3e), region = 20 }
  0x12   : > { %147 = sbr.rel (!%p77_p3) target bundleno = 62 (0x3e), region = 24  ;;  %s149_s20 = sand.u32 (%p77_p3), 1, %s1709_s10  }
  0x13   : > { %s1487_s21 = sshll.u32 (%p77_p3), %s1717_s12, 3  ;;  %s1497_s22 = smul.u32 (%p77_p3), 640, %s149_s20 }
  0x14   : > { %s1787_s25 = scalar_lea.vmem (%p77_p3), %s2077_s1, %s1487_s21 }
  0x15   : > { %v343_v0 = vld [vmem:[%s1787_s25] sm:$0xff] (%p77_p3)  ;;  %v345_v1 = vld [vmem:[%s1787_s25 + $0x10] sm:$0xff] (%p77_p3)  ;;  %s1795_s26 = scalar_lea.vmem (%p77_p3), [#allocation3], %s1497_s22 }
  0x16   : > { %v347_v2 = vld [vmem:[%s1787_s25 + $0x20] sm:$0xff] (%p77_p3)  ;;  %v349_v3 = vld [vmem:[%s1787_s25 + $0x30] sm:$0xff] (%p77_p3)  ;;  %344 = vst [vmem:[%s1795_s26] sm:$0xff] (%p77_p3), %v343_v0  ;;  %346 = vst [vmem:[%s1795_s26 + $0x8] sm:$0xff] (%p77_p3), %v345_v1 }
  0x17   : > { %v351_v4 = vld [vmem:[%s1787_s25 + $0x40] sm:$0xff] (%p77_p3)  ;;  %v353_v5 = vld [vmem:[%s1787_s25 + $0x50] sm:$0xff] (%p77_p3)  ;;  %348 = vst [vmem:[%s1795_s26 + $0x10] sm:$0xff] (%p77_p3), %v347_v2  ;;  %350 = vst [vmem:[%s1795_s26 + $0x18] sm:$0xff] (%p77_p3), %v349_v3 }
  0x18   : > { %352 = vst [vmem:[%s1795_s26 + $0x20] sm:$0xff] (%p77_p3), %v351_v4  ;;  %354 = vst [vmem:[%s1795_s26 + $0x28] sm:$0xff] (%p77_p3), %v353_v5  ;;  %v355_v6 = vld [vmem:[%s1787_s25 + $0x60] sm:$0xff] (%p77_p3)  ;;  %v357_v7 = vld [vmem:[%s1787_s25 + $0x70] sm:$0xff] (%p77_p3) }
  0x19   : > { %v359_v8 = vld [vmem:[%s1787_s25 + $0x80] sm:$0xff]  ;;  %356 = vst [vmem:[%s1795_s26 + $0x30] sm:$0xff] %v355_v6  ;;  %358 = vst [vmem:[%s1795_s26 + $0x38] sm:$0xff] %v357_v7  ;;  %v361_v9 = vld [vmem:[%s1787_s25 + $0x90] sm:$0xff] }
  0x1a   : > { %360 = vst [vmem:[%s1795_s26 + $0x40] sm:$0xff] %v359_v8  ;;  %v363_v10 = vld [vmem:[%s1787_s25 + $0xa0] sm:$0xff]  ;;  %v365_v11 = vld [vmem:[%s1787_s25 + $0xb0] sm:$0xff]  ;;  %362 = vst [vmem:[%s1795_s26 + $0x48] sm:$0xff] %v361_v9 }
  0x1b   : > { %364 = vst [vmem:[%s1795_s26 + $0x50] sm:$0xff] %v363_v10  ;;  %366 = vst [vmem:[%s1795_s26 + $0x58] sm:$0xff] %v365_v11  ;;  %v367_v12 = vld [vmem:[%s1787_s25 + $0xc0] sm:$0xff]  ;;  %v369_v13 = vld [vmem:[%s1787_s25 + $0xd0] sm:$0xff] }
  0x1c   : > { %v371_v14 = vld [vmem:[%s1787_s25 + $0xe0] sm:$0xff]  ;;  %368 = vst [vmem:[%s1795_s26 + $0x60] sm:$0xff] %v367_v12  ;;  %370 = vst [vmem:[%s1795_s26 + $0x68] sm:$0xff] %v369_v13  ;;  %v373_v15 = vld [vmem:[%s1787_s25 + $0xf0] sm:$0xff] }
  0x1d   : > { %372 = vst [vmem:[%s1795_s26 + $0x70] sm:$0xff] %v371_v14  ;;  %v375_v16 = vld [vmem:[%s1787_s25 + $0x100] sm:$0xff]  ;;  %v377_v17 = vld [vmem:[%s1787_s25 + $0x110] sm:$0xff]  ;;  %374 = vst [vmem:[%s1795_s26 + $0x78] sm:$0xff] %v373_v15 }
  0x1e   : > { %376 = vst [vmem:[%s1795_s26 + $0x80] sm:$0xff] %v375_v16  ;;  %378 = vst [vmem:[%s1795_s26 + $0x88] sm:$0xff] %v377_v17  ;;  %v379_v18 = vld [vmem:[%s1787_s25 + $0x120] sm:$0xff]  ;;  %v381_v19 = vld [vmem:[%s1787_s25 + $0x130] sm:$0xff] }
  0x1f   : > { %v383_v20 = vld [vmem:[%s1787_s25 + $0x140] sm:$0xff]  ;;  %380 = vst [vmem:[%s1795_s26 + $0x90] sm:$0xff] %v379_v18  ;;  %382 = vst [vmem:[%s1795_s26 + $0x98] sm:$0xff] %v381_v19  ;;  %v385_v21 = vld [vmem:[%s1787_s25 + $0x150] sm:$0xff] }
  0x20   : > { %384 = vst [vmem:[%s1795_s26 + $0xa0] sm:$0xff] %v383_v20  ;;  %v387_v22 = vld [vmem:[%s1787_s25 + $0x160] sm:$0xff]  ;;  %v389_v23 = vld [vmem:[%s1787_s25 + $0x170] sm:$0xff]  ;;  %386 = vst [vmem:[%s1795_s26 + $0xa8] sm:$0xff] %v385_v21 }
  0x21   : > { %388 = vst [vmem:[%s1795_s26 + $0xb0] sm:$0xff] %v387_v22  ;;  %390 = vst [vmem:[%s1795_s26 + $0xb8] sm:$0xff] %v389_v23  ;;  %v391_v24 = vld [vmem:[%s1787_s25 + $0x180] sm:$0xff]  ;;  %v393_v25 = vld [vmem:[%s1787_s25 + $0x190] sm:$0xff] }
  0x22   : > { %v395_v26 = vld [vmem:[%s1787_s25 + $0x1a0] sm:$0xff]  ;;  %392 = vst [vmem:[%s1795_s26 + $0xc0] sm:$0xff] %v391_v24  ;;  %394 = vst [vmem:[%s1795_s26 + $0xc8] sm:$0xff] %v393_v25  ;;  %v397_v27 = vld [vmem:[%s1787_s25 + $0x1b0] sm:$0xff] }
  0x23   : > { %396 = vst [vmem:[%s1795_s26 + $0xd0] sm:$0xff] %v395_v26  ;;  %v399_v28 = vld [vmem:[%s1787_s25 + $0x1c0] sm:$0xff]  ;;  %v401_v29 = vld [vmem:[%s1787_s25 + $0x1d0] sm:$0xff]  ;;  %398 = vst [vmem:[%s1795_s26 + $0xd8] sm:$0xff] %v397_v27 }
  0x24   : > { %400 = vst [vmem:[%s1795_s26 + $0xe0] sm:$0xff] %v399_v28  ;;  %402 = vst [vmem:[%s1795_s26 + $0xe8] sm:$0xff] %v401_v29  ;;  %v403_v30 = vld [vmem:[%s1787_s25 + $0x1e0] sm:$0xff]  ;;  %v405_v31 = vld [vmem:[%s1787_s25 + $0x1f0] sm:$0xff] }
  0x25   : > { %v407_v32 = vld [vmem:[%s1787_s25 + $0x200] sm:$0xff]  ;;  %404 = vst [vmem:[%s1795_s26 + $0xf0] sm:$0xff] %v403_v30  ;;  %406 = vst [vmem:[%s1795_s26 + $0xf8] sm:$0xff] %v405_v31  ;;  %v409_v33 = vld [vmem:[%s1787_s25 + $0x210] sm:$0xff] }
  0x26   : > { %408 = vst [vmem:[%s1795_s26 + $0x100] sm:$0xff] %v407_v32  ;;  %v411_v34 = vld [vmem:[%s1787_s25 + $0x220] sm:$0xff]  ;;  %v413_v35 = vld [vmem:[%s1787_s25 + $0x230] sm:$0xff]  ;;  %410 = vst [vmem:[%s1795_s26 + $0x108] sm:$0xff] %v409_v33 }
  0x27   : > { %412 = vst [vmem:[%s1795_s26 + $0x110] sm:$0xff] %v411_v34  ;;  %414 = vst [vmem:[%s1795_s26 + $0x118] sm:$0xff] %v413_v35  ;;  %v415_v36 = vld [vmem:[%s1787_s25 + $0x240] sm:$0xff]  ;;  %v417_v37 = vld [vmem:[%s1787_s25 + $0x250] sm:$0xff] }
  0x28   : > { %v419_v38 = vld [vmem:[%s1787_s25 + $0x260] sm:$0xff]  ;;  %416 = vst [vmem:[%s1795_s26 + $0x120] sm:$0xff] %v415_v36  ;;  %418 = vst [vmem:[%s1795_s26 + $0x128] sm:$0xff] %v417_v37  ;;  %v421_v39 = vld [vmem:[%s1787_s25 + $0x270] sm:$0xff] }
  0x29   : > { %420 = vst [vmem:[%s1795_s26 + $0x130] sm:$0xff] %v419_v38  ;;  %v423_v40 = vld [vmem:[%s1787_s25 + $0x280] sm:$0xff]  ;;  %v425_v41 = vld [vmem:[%s1787_s25 + $0x290] sm:$0xff]  ;;  %422 = vst [vmem:[%s1795_s26 + $0x138] sm:$0xff] %v421_v39 }
  0x2a   : > { %424 = vst [vmem:[%s1795_s26 + $0x140] sm:$0xff] %v423_v40  ;;  %426 = vst [vmem:[%s1795_s26 + $0x148] sm:$0xff] %v425_v41  ;;  %v427_v42 = vld [vmem:[%s1787_s25 + $0x2a0] sm:$0xff]  ;;  %v429_v43 = vld [vmem:[%s1787_s25 + $0x2b0] sm:$0xff] }
  0x2b   : > { %v431_v44 = vld [vmem:[%s1787_s25 + $0x2c0] sm:$0xff]  ;;  %428 = vst [vmem:[%s1795_s26 + $0x150] sm:$0xff] %v427_v42  ;;  %430 = vst [vmem:[%s1795_s26 + $0x158] sm:$0xff] %v429_v43  ;;  %v433_v45 = vld [vmem:[%s1787_s25 + $0x2d0] sm:$0xff] }
  0x2c   : > { %432 = vst [vmem:[%s1795_s26 + $0x160] sm:$0xff] %v431_v44  ;;  %v435_v46 = vld [vmem:[%s1787_s25 + $0x2e0] sm:$0xff]  ;;  %v437_v47 = vld [vmem:[%s1787_s25 + $0x2f0] sm:$0xff]  ;;  %434 = vst [vmem:[%s1795_s26 + $0x168] sm:$0xff] %v433_v45 }
  0x2d   : > { %436 = vst [vmem:[%s1795_s26 + $0x170] sm:$0xff] %v435_v46  ;;  %438 = vst [vmem:[%s1795_s26 + $0x178] sm:$0xff] %v437_v47  ;;  %v439_v48 = vld [vmem:[%s1787_s25 + $0x300] sm:$0xff]  ;;  %v441_v49 = vld [vmem:[%s1787_s25 + $0x310] sm:$0xff] }
  0x2e   : > { %v443_v50 = vld [vmem:[%s1787_s25 + $0x320] sm:$0xff]  ;;  %440 = vst [vmem:[%s1795_s26 + $0x180] sm:$0xff] %v439_v48  ;;  %442 = vst [vmem:[%s1795_s26 + $0x188] sm:$0xff] %v441_v49  ;;  %v445_v51 = vld [vmem:[%s1787_s25 + $0x330] sm:$0xff] }
  0x2f   : > { %444 = vst [vmem:[%s1795_s26 + $0x190] sm:$0xff] %v443_v50  ;;  %v447_v52 = vld [vmem:[%s1787_s25 + $0x340] sm:$0xff]  ;;  %v449_v53 = vld [vmem:[%s1787_s25 + $0x350] sm:$0xff]  ;;  %446 = vst [vmem:[%s1795_s26 + $0x198] sm:$0xff] %v445_v51 }
  0x30   : > { %448 = vst [vmem:[%s1795_s26 + $0x1a0] sm:$0xff] %v447_v52  ;;  %450 = vst [vmem:[%s1795_s26 + $0x1a8] sm:$0xff] %v449_v53  ;;  %v451_v54 = vld [vmem:[%s1787_s25 + $0x360] sm:$0xff]  ;;  %v453_v55 = vld [vmem:[%s1787_s25 + $0x370] sm:$0xff] }
  0x31   : > { %v455_v56 = vld [vmem:[%s1787_s25 + $0x380] sm:$0xff]  ;;  %452 = vst [vmem:[%s1795_s26 + $0x1b0] sm:$0xff] %v451_v54  ;;  %454 = vst [vmem:[%s1795_s26 + $0x1b8] sm:$0xff] %v453_v55  ;;  %v457_v57 = vld [vmem:[%s1787_s25 + $0x390] sm:$0xff] }
  0x32   : > { %456 = vst [vmem:[%s1795_s26 + $0x1c0] sm:$0xff] %v455_v56  ;;  %v459_v58 = vld [vmem:[%s1787_s25 + $0x3a0] sm:$0xff]  ;;  %v461_v59 = vld [vmem:[%s1787_s25 + $0x3b0] sm:$0xff]  ;;  %458 = vst [vmem:[%s1795_s26 + $0x1c8] sm:$0xff] %v457_v57 }
  0x33   : > { %460 = vst [vmem:[%s1795_s26 + $0x1d0] sm:$0xff] %v459_v58  ;;  %462 = vst [vmem:[%s1795_s26 + $0x1d8] sm:$0xff] %v461_v59  ;;  %v463_v60 = vld [vmem:[%s1787_s25 + $0x3c0] sm:$0xff]  ;;  %v465_v61 = vld [vmem:[%s1787_s25 + $0x3d0] sm:$0xff] }
  0x34   : > { %v467_v62 = vld [vmem:[%s1787_s25 + $0x3e0] sm:$0xff]  ;;  %464 = vst [vmem:[%s1795_s26 + $0x1e0] sm:$0xff] %v463_v60  ;;  %466 = vst [vmem:[%s1795_s26 + $0x1e8] sm:$0xff] %v465_v61  ;;  %v469_v63 = vld [vmem:[%s1787_s25 + $0x3f0] sm:$0xff] }
  0x35   : > { %468 = vst [vmem:[%s1795_s26 + $0x1f0] sm:$0xff] %v467_v62  ;;  %v471_v0 = vld [vmem:[%s1787_s25 + $0x400] sm:$0xff]  ;;  %v473_v1 = vld [vmem:[%s1787_s25 + $0x410] sm:$0xff]  ;;  %470 = vst [vmem:[%s1795_s26 + $0x1f8] sm:$0xff] %v469_v63 }
  0x36   : > { %472 = vst [vmem:[%s1795_s26 + $0x200] sm:$0xff] %v471_v0  ;;  %474 = vst [vmem:[%s1795_s26 + $0x208] sm:$0xff] %v473_v1  ;;  %v475_v2 = vld [vmem:[%s1787_s25 + $0x420] sm:$0xff]  ;;  %v477_v3 = vld [vmem:[%s1787_s25 + $0x430] sm:$0xff] }
  0x37   : > { %v479_v4 = vld [vmem:[%s1787_s25 + $0x440] sm:$0xff]  ;;  %476 = vst [vmem:[%s1795_s26 + $0x210] sm:$0xff] %v475_v2  ;;  %478 = vst [vmem:[%s1795_s26 + $0x218] sm:$0xff] %v477_v3  ;;  %v481_v5 = vld [vmem:[%s1787_s25 + $0x450] sm:$0xff] }
  0x38   : > { %480 = vst [vmem:[%s1795_s26 + $0x220] sm:$0xff] %v479_v4  ;;  %v483_v6 = vld [vmem:[%s1787_s25 + $0x460] sm:$0xff]  ;;  %v485_v7 = vld [vmem:[%s1787_s25 + $0x470] sm:$0xff]  ;;  %482 = vst [vmem:[%s1795_s26 + $0x228] sm:$0xff] %v481_v5 }
  0x39   : > { %484 = vst [vmem:[%s1795_s26 + $0x230] sm:$0xff] %v483_v6  ;;  %486 = vst [vmem:[%s1795_s26 + $0x238] sm:$0xff] %v485_v7  ;;  %v487_v8 = vld [vmem:[%s1787_s25 + $0x480] sm:$0xff]  ;;  %v489_v9 = vld [vmem:[%s1787_s25 + $0x490] sm:$0xff] }
  0x3a   : > { %v491_v10 = vld [vmem:[%s1787_s25 + $0x4a0] sm:$0xff]  ;;  %488 = vst [vmem:[%s1795_s26 + $0x240] sm:$0xff] %v487_v8  ;;  %490 = vst [vmem:[%s1795_s26 + $0x248] sm:$0xff] %v489_v9  ;;  %v493_v11 = vld [vmem:[%s1787_s25 + $0x4b0] sm:$0xff] }
  0x3b   : > { %492 = vst [vmem:[%s1795_s26 + $0x250] sm:$0xff] %v491_v10  ;;  %v495_v12 = vld [vmem:[%s1787_s25 + $0x4c0] sm:$0xff]  ;;  %v497_v13 = vld [vmem:[%s1787_s25 + $0x4d0] sm:$0xff]  ;;  %494 = vst [vmem:[%s1795_s26 + $0x258] sm:$0xff] %v493_v11 }
  0x3c   : > { %496 = vst [vmem:[%s1795_s26 + $0x260] sm:$0xff] %v495_v12  ;;  %498 = vst [vmem:[%s1795_s26 + $0x268] sm:$0xff] %v497_v13  ;;  %v499_v14 = vld [vmem:[%s1787_s25 + $0x4e0] sm:$0xff]  ;;  %v501_v15 = vld [vmem:[%s1787_s25 + $0x4f0] sm:$0xff] }
  0x3d   : > { %500 = vst [vmem:[%s1795_s26 + $0x270] sm:$0xff] %v499_v14  ;;  %502 = vst [vmem:[%s1795_s26 + $0x278] sm:$0xff] %v501_v15 }
  0x3e PF: > { %p1395_p8 = scmp.ge.s32.totalorder %s1721_s13, 1  ;;  %p507_p9 = scmp.lt.s32.totalorder %s1721_s13, 3 }
  0x40   : > { %p508_p10 = pnand %p1395_p8, %p507_p9 }
  0x41   : > { %s514_s27 = sand.u32 (!%p508_p10), 1, %s1705_s9   ;;  %v1617_v16 = vld [vmem:[%s2076_s0 + $0xc] ss:$20 sps:$4 sm:$0xff] (!%p508_p10)   ;;  %v1662_v17 = vld [vmem:[%s2076_s0 + $0x4] ss:$20 sps:$4 sm:$0xff] (!%p508_p10)  }
  0x42   : > { %511 = sbr.rel (%p508_p10) target bundleno = 421 (0x1a5), region = 62  ;;  %1160 = vmatprep.mubr.bf16.mxu0 (!%p508_p10), %v1617_v16  ;;  %1117 = vmatprep.mubr.bf16.mxu1 (!%p508_p10), %v1662_v17  ;;  %v1615_v14 = vld [vmem:[%s2076_s0 + $0x8] ss:$20 sps:$4 sm:$0xff] (!%p508_p10)   ;;  %s1396_s20 = sshll.u32 (!%p508_p10), %s514_s27, 5 }
  0x43   : > { %s1498_s28 = smul.u32 (!%p508_p10), 640, %s514_s27  ;;  %s543_s21 = scalar_lea.vmem (!%p508_p10), [#allocation4], %s1396_s20 }
  0x45   : > { %s1962_s5 = scalar_lea.vmem (!%p508_p10), [#allocation3], %s1498_s28 }
  0x46   : > { %v1540_v18 = vld [vmem:[%s1962_s5 + $0x104] ss:$8 sps:$4 sm:$0xff] (!%p508_p10)   ;;  %v1542_v19 = vld [vmem:[%s1962_s5 + $0x100] ss:$8 sps:$4 sm:$0xff] (!%p508_p10)   ;;  %v1543_v20 = vld [vmem:[%s1962_s5 + $0x114] ss:$8 sps:$4 sm:$0xff] (!%p508_p10)  }
  0x47   : > { %1128 = vmatprep.subr.bf16.mxu0 (!%p508_p10), %v1540_v18  ;;  %v1545_v21 = vld [vmem:[%s1962_s5 + $0x110] ss:$8 sps:$4 sm:$0xff] (!%p508_p10)   ;;  %v1546_v22 = vld [vmem:[%s1962_s5 + $0x124] ss:$8 sps:$4 sm:$0xff] (!%p508_p10)   ;;  %v1548_v23 = vld [vmem:[%s1962_s5 + $0x120] ss:$8 sps:$4 sm:$0xff] (!%p508_p10)  }
  0x48   : > { %1129 = vmatpush1.bf16.msra.mxu0 (!%p508_p10), %v1542_v19  ;;  %v1549_v24 = vld [vmem:[%s1962_s5 + $0x134] ss:$8 sps:$4 sm:$0xff] (!%p508_p10)   ;;  %v1551_v25 = vld [vmem:[%s1962_s5 + $0x130] ss:$8 sps:$4 sm:$0xff] (!%p508_p10)   ;;  %v1563_v26 = vld [vmem:[%s1962_s5 + $0x4] ss:$8 sps:$4 sm:$0xff] (!%p508_p10)  }
  0x49   : > { %1130 = vmatprep.subr.bf16.mxu0 %v1543_v20  ;;  %v1566_v27 = vld [vmem:[%s1962_s5] ss:$8 sps:$4 sm:$0xff]   ;;  %v1552_v28 = vld [vmem:[%s1962_s5 + $0x144] ss:$8 sps:$4 sm:$0xff]   ;;  %1085 = vmatprep.subr.bf16.mxu1 %v1563_v26  ;;  %v1569_v29 = vld [vmem:[%s1962_s5 + $0x14] ss:$8 sps:$4 sm:$0xff]  }
  0x4a   : > { %1086 = vmatpush1.bf16.msra.mxu1 %v1566_v27  ;;  %v1572_v30 = vld [vmem:[%s1962_s5 + $0x10] ss:$8 sps:$4 sm:$0xff]   ;;  %v1554_v31 = vld [vmem:[%s1962_s5 + $0x140] ss:$8 sps:$4 sm:$0xff]   ;;  %v1555_v32 = vld [vmem:[%s1962_s5 + $0x154] ss:$8 sps:$4 sm:$0xff]  }
  0x4b   : > { %1087 = vmatprep.subr.bf16.mxu1 %v1569_v29  ;;  %v1575_v33 = vld [vmem:[%s1962_s5 + $0x24] ss:$8 sps:$4 sm:$0xff]   ;;  %v1578_v34 = vld [vmem:[%s1962_s5 + $0x20] ss:$8 sps:$4 sm:$0xff]   ;;  %v1557_v35 = vld [vmem:[%s1962_s5 + $0x150] ss:$8 sps:$4 sm:$0xff]  }
  0x4c   : > { %1131 = vmatpush1.bf16.msra.mxu0 %v1545_v21  ;;  %v1581_v36 = vld [vmem:[%s1962_s5 + $0x34] ss:$8 sps:$4 sm:$0xff]   ;;  %v1558_v37 = vld [vmem:[%s1962_s5 + $0x164] ss:$8 sps:$4 sm:$0xff]   ;;  %v1560_v38 = vld [vmem:[%s1962_s5 + $0x160] ss:$8 sps:$4 sm:$0xff]  }
  0x4d   : > { %1132 = vmatprep.subr.bf16.mxu0 %v1546_v22  ;;  %v1584_v39 = vld [vmem:[%s1962_s5 + $0x30] ss:$8 sps:$4 sm:$0xff]   ;;  %v1587_v40 = vld [vmem:[%s1962_s5 + $0x44] ss:$8 sps:$4 sm:$0xff]   ;;  %v1561_v41 = vld [vmem:[%s1962_s5 + $0x174] ss:$8 sps:$4 sm:$0xff]  }
  0x4e   : > { %1088 = vmatpush1.bf16.msra.mxu1 %v1572_v30  ;;  %v1590_v42 = vld [vmem:[%s1962_s5 + $0x40] ss:$8 sps:$4 sm:$0xff]   ;;  %v1565_v43 = vld [vmem:[%s1962_s5 + $0x170] ss:$8 sps:$4 sm:$0xff]   ;;  %v1593_v44 = vld [vmem:[%s1962_s5 + $0x54] ss:$8 sps:$4 sm:$0xff]  }
  0x4f   : > { %1089 = vmatprep.subr.bf16.mxu1 %v1575_v33  ;;  %v1567_v45 = vld [vmem:[%s1962_s5 + $0x184] ss:$8 sps:$4 sm:$0xff]   ;;  %v1571_v46 = vld [vmem:[%s1962_s5 + $0x180] ss:$8 sps:$4 sm:$0xff]   ;;  %v1596_v47 = vld [vmem:[%s1962_s5 + $0x50] ss:$8 sps:$4 sm:$0xff]  }
  0x50   : > { %1133 = vmatpush1.bf16.msra.mxu0 %v1548_v23  ;;  %v1599_v48 = vld [vmem:[%s1962_s5 + $0x64] ss:$8 sps:$4 sm:$0xff]   ;;  %v1573_v49 = vld [vmem:[%s1962_s5 + $0x194] ss:$8 sps:$4 sm:$0xff]   ;;  %v1602_v50 = vld [vmem:[%s1962_s5 + $0x60] ss:$8 sps:$4 sm:$0xff]  }
  0x51   : > { %1134 = vmatprep.subr.bf16.mxu0 %v1549_v24  ;;  %v1577_v51 = vld [vmem:[%s1962_s5 + $0x190] ss:$8 sps:$4 sm:$0xff]   ;;  %v1605_v52 = vld [vmem:[%s1962_s5 + $0x74] ss:$8 sps:$4 sm:$0xff]   ;;  %v1579_v53 = vld [vmem:[%s1962_s5 + $0x1a4] ss:$8 sps:$4 sm:$0xff]  }
  0x52   : > { %1090 = vmatpush1.bf16.msra.mxu1 %v1578_v34  ;;  %v1608_v54 = vld [vmem:[%s1962_s5 + $0x70] ss:$8 sps:$4 sm:$0xff]   ;;  %v1583_v55 = vld [vmem:[%s1962_s5 + $0x1a0] ss:$8 sps:$4 sm:$0xff]   ;;  %v1611_v56 = vld [vmem:[%s1962_s5 + $0x84] ss:$8 sps:$4 sm:$0xff]  }
  0x53   : > { %1091 = vmatprep.subr.bf16.mxu1 %v1581_v36  ;;  %v1585_v57 = vld [vmem:[%s1962_s5 + $0x1b4] ss:$8 sps:$4 sm:$0xff]   ;;  %v1614_v58 = vld [vmem:[%s1962_s5 + $0x80] ss:$8 sps:$4 sm:$0xff]   ;;  %v1589_v59 = vld [vmem:[%s1962_s5 + $0x1b0] ss:$8 sps:$4 sm:$0xff]  }
  0x54   : > { %1135 = vmatpush1.bf16.msra.mxu0 %v1551_v25  ;;  %v1621_v60 = vld [vmem:[%s1962_s5 + $0x94] ss:$8 sps:$4 sm:$0xff]   ;;  %v1591_v61 = vld [vmem:[%s1962_s5 + $0x1c4] ss:$8 sps:$4 sm:$0xff]   ;;  %v1623_v62 = vld [vmem:[%s1962_s5 + $0x90] ss:$8 sps:$4 sm:$0xff]  }
  0x55   : > { %1136 = vmatprep.subr.bf16.mxu0 %v1552_v28  ;;  %v1595_v63 = vld [vmem:[%s1962_s5 + $0x1c0] ss:$8 sps:$4 sm:$0xff]   ;;  %v1627_v0 = vld [vmem:[%s1962_s5 + $0xa4] ss:$8 sps:$4 sm:$0xff]   ;;  %v1597_v1 = vld [vmem:[%s1962_s5 + $0x1d4] ss:$8 sps:$4 sm:$0xff]  }
  0x56   : > { %1092 = vmatpush1.bf16.msra.mxu1 %v1584_v39  ;;  %v1629_v2 = vld [vmem:[%s1962_s5 + $0xa0] ss:$8 sps:$4 sm:$0xff]   ;;  %v1601_v3 = vld [vmem:[%s1962_s5 + $0x1d0] ss:$8 sps:$4 sm:$0xff]   ;;  %v1633_v4 = vld [vmem:[%s1962_s5 + $0xb4] ss:$8 sps:$4 sm:$0xff]  }
  0x57   : > { %1093 = vmatprep.subr.bf16.mxu1 %v1587_v40  ;;  %v1603_v5 = vld [vmem:[%s1962_s5 + $0x1e4] ss:$8 sps:$4 sm:$0xff]   ;;  %v1635_v6 = vld [vmem:[%s1962_s5 + $0xb0] ss:$8 sps:$4 sm:$0xff]   ;;  %v1607_v7 = vld [vmem:[%s1962_s5 + $0x1e0] ss:$8 sps:$4 sm:$0xff]  }
  0x58   : > { %1137 = vmatpush1.bf16.msra.mxu0 %v1554_v31  ;;  %v1639_v8 = vld [vmem:[%s1962_s5 + $0xc4] ss:$8 sps:$4 sm:$0xff]   ;;  %v1609_v9 = vld [vmem:[%s1962_s5 + $0x1f4] ss:$8 sps:$4 sm:$0xff]   ;;  %v1641_v10 = vld [vmem:[%s1962_s5 + $0xc0] ss:$8 sps:$4 sm:$0xff]  }
  0x59   : > { %1138 = vmatprep.subr.bf16.mxu0 %v1555_v32  ;;  %v1613_v11 = vld [vmem:[%s1962_s5 + $0x1f0] ss:$8 sps:$4 sm:$0xff]   ;;  %v1645_v12 = vld [vmem:[%s1962_s5 + $0xd4] ss:$8 sps:$4 sm:$0xff]   ;;  %v1620_v13 = vld [vmem:[%s1962_s5 + $0x204] ss:$8 sps:$4 sm:$0xff]  }
  0x5a   : > { %1094 = vmatpush1.bf16.msra.mxu1 %v1590_v42  ;;  %v1647_v15 = vld [vmem:[%s1962_s5 + $0xd0] ss:$8 sps:$4 sm:$0xff]   ;;  %v1618_v16 = vld [vmem:[%s1962_s5 + $0x200] ss:$8 sps:$4 sm:$0xff]   ;;  %v1651_v17 = vld [vmem:[%s1962_s5 + $0xe4] ss:$8 sps:$4 sm:$0xff]  }
  0x5b   : > { %1095 = vmatprep.subr.bf16.mxu1 %v1593_v44  ;;  %v1626_v18 = vld [vmem:[%s1962_s5 + $0x214] ss:$8 sps:$4 sm:$0xff]   ;;  %v1653_v19 = vld [vmem:[%s1962_s5 + $0xe0] ss:$8 sps:$4 sm:$0xff]   ;;  %v1624_v20 = vld [vmem:[%s1962_s5 + $0x210] ss:$8 sps:$4 sm:$0xff]  }
  0x5c   : > { %1139 = vmatpush1.bf16.msra.mxu0 %v1557_v35  ;;  %v1657_v21 = vld [vmem:[%s1962_s5 + $0xf4] ss:$8 sps:$4 sm:$0xff]   ;;  %v1632_v22 = vld [vmem:[%s1962_s5 + $0x224] ss:$8 sps:$4 sm:$0xff]   ;;  %v1723_v23 = vmov 0   ;;  %s1488_s22 = sshll.u32 (%p1774_p6), %s1713_s11, 4 }
  0x5d   : > { %1140 = vmatprep.subr.bf16.mxu0 %v1558_v37  ;;  %v1659_v24 = vld [vmem:[%s1962_s5 + $0xf0] ss:$8 sps:$4 sm:$0xff]   ;;  %v1630_v25 = vld [vmem:[%s1962_s5 + $0x220] ss:$8 sps:$4 sm:$0xff]   ;;  %v1638_v26 = vld [vmem:[%s1962_s5 + $0x234] ss:$8 sps:$4 sm:$0xff]   ;;  %s1269_s24 = scalar_lea.vmem (%p1774_p6), %s2078_s2, %s1488_s22 }
  0x5e   : > { %1096 = vmatpush1.bf16.msra.mxu1 %v1596_v47  ;;  %v1660_v27 = vld [vmem:[%s2076_s0] ss:$20 sps:$4 sm:$0xff]   ;;  %v1636_v28 = vld [vmem:[%s1962_s5 + $0x230] ss:$8 sps:$4 sm:$0xff]   ;;  %v1644_v29 = vld [vmem:[%s1962_s5 + $0x244] ss:$8 sps:$4 sm:$0xff]  }
  0x5f   : > { %1097 = vmatprep.subr.bf16.mxu1 %v1599_v48  ;;  %v1642_v30 = vld [vmem:[%s1962_s5 + $0x240] ss:$8 sps:$4 sm:$0xff]   ;;  %v1650_v31 = vld [vmem:[%s1962_s5 + $0x254] ss:$8 sps:$4 sm:$0xff]   ;;  %v1648_v32 = vld [vmem:[%s1962_s5 + $0x250] ss:$8 sps:$4 sm:$0xff]  }
  0x60   : > { %1141 = vmatpush1.bf16.msra.mxu0 %v1560_v38  ;;  %v1656_v33 = vld [vmem:[%s1962_s5 + $0x264] ss:$8 sps:$4 sm:$0xff]   ;;  %v1654_v34 = vld [vmem:[%s1962_s5 + $0x260] ss:$8 sps:$4 sm:$0xff]   ;;  %v1665_v35 = vld [vmem:[%s1962_s5 + $0x274] ss:$8 sps:$4 sm:$0xff]  }
  0x61   : > { %1142 = vmatprep.subr.bf16.mxu0 %v1561_v41  ;;  %v1663_v36 = vld [vmem:[%s1962_s5 + $0x270] ss:$8 sps:$4 sm:$0xff]  }
  0x62   : > { %1098 = vmatpush1.bf16.msra.mxu1 %v1602_v50  ;;  %v1666_v37 = vld [vmem:[%s2076_s0 + $0x10] ss:$20 sps:$4 sm:$0xff]  }
  0x63   : > { %1099 = vmatprep.subr.bf16.mxu1 %v1605_v52 }
  0x64   : > { %1143 = vmatpush1.bf16.msra.mxu0 %v1565_v43 }
  0x65   : > { %1144 = vmatprep.subr.bf16.mxu0 %v1567_v45 }
  0x66   : > { %1100 = vmatpush1.bf16.msra.mxu1 %v1608_v54 }
  0x67   : > { %1101 = vmatprep.subr.bf16.mxu1 %v1611_v56 }
  0x68   : > { %1145 = vmatpush1.bf16.msra.mxu0 %v1571_v46 }
  0x69   : > { %1146 = vmatprep.subr.bf16.mxu0 %v1573_v49 }
  0x6a   : > { %1102 = vmatpush1.bf16.msra.mxu1 %v1614_v58 }
  0x6b   : > { %1103 = vmatprep.subr.bf16.mxu1 %v1621_v60 }
  0x6c   : > { %1147 = vmatpush1.bf16.msra.mxu0 %v1577_v51 }
  0x6d   : > { %1148 = vmatprep.subr.bf16.mxu0 %v1579_v53 }
  0x6e   : > { %1104 = vmatpush1.bf16.msra.mxu1 %v1623_v62 }
  0x6f   : > { %1105 = vmatprep.subr.bf16.mxu1 %v1627_v0 }
  0x70   : > { %1149 = vmatpush1.bf16.msra.mxu0 %v1583_v55 }
  0x71   : > { %1150 = vmatprep.subr.bf16.mxu0 %v1585_v57 }
  0x72   : > { %1106 = vmatpush1.bf16.msra.mxu1 %v1629_v2 }
  0x73   : > { %1107 = vmatprep.subr.bf16.mxu1 %v1633_v4 }
  0x74   : > { %1151 = vmatpush1.bf16.msra.mxu0 %v1589_v59 }
  0x75   : > { %1152 = vmatprep.subr.bf16.mxu0 %v1591_v61 }
  0x76   : > { %1108 = vmatpush1.bf16.msra.mxu1 %v1635_v6 }
  0x77   : > { %1109 = vmatprep.subr.bf16.mxu1 %v1639_v8 }
  0x78   : > { %1153 = vmatpush1.bf16.msra.mxu0 %v1595_v63 }
  0x79   : > { %1154 = vmatprep.subr.bf16.mxu0 %v1597_v1 }
  0x7a   : > { %1110 = vmatpush1.bf16.msra.mxu1 %v1641_v10 }
  0x7b   : > { %1111 = vmatprep.subr.bf16.mxu1 %v1645_v12 }
  0x7c   : > { %1155 = vmatpush1.bf16.msra.mxu0 %v1601_v3 }
  0x7d   : > { %1156 = vmatprep.subr.bf16.mxu0 %v1603_v5 }
  0x7e   : > { %1112 = vmatpush1.bf16.msra.mxu1 %v1647_v15 }
  0x7f   : > { %1113 = vmatprep.subr.bf16.mxu1 %v1651_v17 }
  0x80   : > { %1157 = vmatpush1.bf16.msra.mxu0 %v1607_v7 }
  0x81   : > { %1158 = vmatprep.subr.bf16.mxu0 %v1609_v9 }
  0x82   : > { %1114 = vmatpush1.bf16.msra.mxu1 %v1653_v19 }
  0x83   : > { %1115 = vmatprep.subr.bf16.mxu1 %v1657_v21 }
  0x84   : > { %1159 = vmatpush1.bf16.msra.mxu0 %v1613_v11 }
  0x85   : > { %1171 = vmatprep.subr.bf16.mxu0 %v1620_v13 }
  0x86   : > { %1116 = vmatpush1.bf16.msra.mxu1 %v1659_v24 }
  0x87   : > { %1161 = vmatmul.mubr.bf16.vlgmr.msra.gmra.mrb[0].mxu0 %v1615_v14 }
  0x88   : > { %1172 = vmatpush1.bf16.msra.mxu0 %v1618_v16  ;;  %1203 = vmatprep.mubr.bf16.mxu0 %v1723_v23 }
  0x89   : > { %1173 = vmatprep.subr.bf16.mxu0 %v1626_v18  ;;  %1118 = vmatmul.mubr.bf16.vlgmr.msra.gmra.mrb[0].mxu1 %v1660_v27 }
  0x8c   : > { %1174 = vmatpush1.bf16.msra.mxu0 %v1624_v20 }
  0x8d   : > { %1175 = vmatprep.subr.bf16.mxu0 %v1632_v22 }
  0x90   : > { %1176 = vmatpush1.bf16.msra.mxu0 %v1630_v25 }
  0x91   : > { %1177 = vmatprep.subr.bf16.mxu0 %v1638_v26 }
  0x94   : > { %1178 = vmatpush1.bf16.msra.mxu0 %v1636_v28 }
  0x95   : > { %1179 = vmatprep.subr.bf16.mxu0 %v1644_v29 }
  0x98   : > { %1180 = vmatpush1.bf16.msra.mxu0 %v1642_v30 }
  0x99   : > { %1181 = vmatprep.subr.bf16.mxu0 %v1650_v31 }
  0x9c   : > { %1182 = vmatpush1.bf16.msra.mxu0 %v1648_v32 }
  0x9d   : > { %1183 = vmatprep.subr.bf16.mxu0 %v1656_v33 }
  0xa0   : > { %1184 = vmatpush1.bf16.msra.mxu0 %v1654_v34 }
  0xa1   : > { %1185 = vmatprep.subr.bf16.mxu0 %v1665_v35 }
  0xa4   : > { %1186 = vmatpush1.bf16.msra.mxu0 %v1663_v36 }
  0xa7   : > { %1204 = vmatmul.mubr.bf16.vlgmr.msra.gmra.mrb[0].mxu0 %v1666_v37 }
 0x15c   : > { %v1119_v38 = vpop.f32.mrb[0].mxu1 }
 0x15d   : > { %v1121_v39 = vpop.f32.mrb[1].mxu1 }
 0x15e   : > { %v1123_v40 = vpop.f32.mrb[2].mxu1 }
 0x15f   : > { %v1125_v41 = vpop.f32.mrb[3].mxu1 }
 0x17a   : > { %v1205_v42 = vpop.f32.mrb[0].mxu0 }
 0x17b   : > { %v1489_v43 = vadd.f32 %v1205_v42, %v1119_v38  ;;  %v1207_v44 = vpop.f32.mrb[1].mxu0 }
 0x17c   : > { %v1490_v45 = vadd.f32 %v1207_v44, %v1121_v39  ;;  %v1209_v46 = vpop.f32.mrb[2].mxu0 }
 0x17d   : > { %v1229_v47 = vsub.f32 0.0, %v1489_v43  ;;  %v1491_v48 = vadd.f32 %v1209_v46, %v1123_v40  ;;  %v1211_v49 = vpop.f32.mrb[3].mxu0 }
 0x17e   : > { %v1230_v50 = vsub.f32 0.0, %v1490_v45  ;;  %v1492_v51 = vadd.f32 %v1211_v49, %v1125_v41 }
 0x17f   : > { %v1233_v52 = vmul.f32 1.442695, %v1229_v47  ;;  %v1231_v53 = vsub.f32 0.0, %v1491_v48 }
 0x180   : > { %v1235_v54 = vmul.f32 1.442695, %v1230_v50  ;;  %v1232_v55 = vsub.f32 0.0, %v1492_v51 }
 0x181   : > { %1667 = vpow2.f32 %v1233_v52  ;;  %v1237_v56 = vmul.f32 1.442695, %v1231_v53 }
 0x182   : > { %1669 = vpow2.f32 %v1235_v54  ;;  %v1239_v57 = vmul.f32 1.442695, %v1232_v55 }
 0x183   : > { %1671 = vpow2.f32 %v1237_v56 }
 0x184   : > { %1673 = vpow2.f32 %v1239_v57 }
 0x18b   : > { %v1668_v58 = vpop.eup %1667 }
 0x18c   : > { %v1670_v59 = vpop.eup %1669  ;;  %v1241_v60 = vadd.f32 1.0, %v1668_v58 }
 0x18d   : > { %v1672_v61 = vpop.eup %1671  ;;  %v1242_v62 = vadd.f32 1.0, %v1670_v59 }
 0x18e   : > { %v1674_v63 = vpop.eup %1673  ;;  %1675 = vrcp.f32 %v1241_v60  ;;  %v1243_v0 = vadd.f32 1.0, %v1672_v61 }
 0x18f   : > { %1677 = vrcp.f32 %v1242_v62  ;;  %v1244_v1 = vadd.f32 1.0, %v1674_v63 }
 0x190   : > { %1679 = vrcp.f32 %v1243_v0 }
 0x191   : > { %1681 = vrcp.f32 %v1244_v1 }
 0x196   : > { %1263 = sbr.rel (!%p1774_p6) target bundleno = 421 (0x1a5), region = 78 }
 0x198   : > { %v1676_v2 = vpop.eup %1675 }
 0x199   : > { %v1678_v3 = vpop.eup %1677  ;;  %1253 = vst [vmem:[%s543_s21] sm:$0xff] %v1676_v2 }
 0x19a   : > { %v1680_v4 = vpop.eup %1679  ;;  %1254 = vst [vmem:[%s543_s21 + $0x8] sm:$0xff] %v1678_v3 }
 0x19b   : > { %v1682_v5 = vpop.eup %1681  ;;  %1255 = vst [vmem:[%s543_s21 + $0x10] sm:$0xff] %v1680_v4 }
 0x19c   : > { %1256 = vst [vmem:[%s543_s21 + $0x18] sm:$0xff] %v1682_v5 }
 0x1a0   : > { %v1282_v6 = vld [vmem:[%s543_s21] sm:$0xff] }
 0x1a1   : > { %v1284_v7 = vld [vmem:[%s543_s21 + $0x8] sm:$0xff]  ;;  %1283 = vst [vmem:[%s1269_s24] sm:$0xff] %v1282_v6 }
 0x1a2   : > { %v1286_v8 = vld [vmem:[%s543_s21 + $0x10] sm:$0xff]  ;;  %1285 = vst [vmem:[%s1269_s24 + $0x8] sm:$0xff] %v1284_v7 }
 0x1a3   : > { %v1288_v9 = vld [vmem:[%s543_s21 + $0x18] sm:$0xff]  ;;  %1287 = vst [vmem:[%s1269_s24 + $0x20] sm:$0xff] %v1286_v8 }
 0x1a4   : > { %1289 = vst [vmem:[%s1269_s24 + $0x28] sm:$0xff] %v1288_v9 }
 0x1a5 PF: > { %s12_s13 = sadd.s32 1, %s1721_s13   ;;  %s2080_s9 = smov %s1709_s10 }
 0x1a6   : > { %p9_p11 = scmp.ge.s32.totalorder %s12_s13, 4   ;;  %s2081_s10 = smov %s1779_s19 }
 0x1a7   : > { %s2082_s11 = smov %s1717_s12  ;;  %s2083_s12 = smov %s2085_s14 }
 0x1a8   :  { %11 = sbr.rel (!%p9_p11) target bundleno = 3 (0x3), region = 135 }

</bundles_post_ra>
